<compile_context>
chip_gen: v7x
topology: tpu7x:2x2x1
jax: 0.10.0
libtpu: 0.0.40
codegen_flags: <defaults>
</compile_context>

<pallas_src>
import functools

import jax
import jax.numpy as jnp
from jax.experimental import pallas as pl
from jax.experimental.pallas import tpu as pltpu

LANE = 128
NEG_SLOPE = 0.2            # GATConv default negative_slope
MASK_VAL = 1e30            # additive mask kept in f32 (never cast the mask path to bf16)
ALPHA_LANES = 128          # lane-dense width of the fused per-node alpha output
DST_OFF = 64               # dst-head columns start here inside the alpha output
SRC_ROWS = 8               # sublane-padded row count of alpha_src^T (=> heads <= 8)

# bf16 MXU operands only when actually running on TPU; CPU/interpret keeps f32.
_ON_TPU = jax.default_backend() == "tpu"
ACT_DT = jnp.bfloat16 if _ON_TPU else jnp.float32

_VMEM_LIMIT = None


def _vmem_limit_bytes():
    """Generation-aware scoped-VMEM limit (~75% of capacity), 48 MiB fallback."""
    global _VMEM_LIMIT
    if _VMEM_LIMIT is None:
        try:
            cap = int(pltpu.get_tpu_info().vmem_capacity_bytes)
            _VMEM_LIMIT = max(32 << 20, min((cap * 3) // 4, 96 << 20))
        except Exception:
            _VMEM_LIMIT = 48 << 20
    return _VMEM_LIMIT


def _round_up(x, m):
    return (x + m - 1) // m * m


# --------------------------- projection kernel (row-tiled) ---------------------------
def _project_kernel(x_ref, w_ref, amat_ref, h_ref, alpha_ref, *, sum_lane):
    # h = X @ W on the MXU (bf16 operands on TPU, f32 accumulation).
    h = jnp.dot(x_ref[...], w_ref[...], preferred_element_type=jnp.float32)
    # One lane-dense [T, 128] alpha output for all heads:
    #   cols 0..H-1      = per-node src attention scalars,
    #   cols 64..64+H-1  = per-node dst attention scalars.
    alpha_ref[...] = jnp.dot(h.astype(amat_ref.dtype), amat_ref[...],
                             preferred_element_type=jnp.float32)
    # Write a "ones" lane into h so the attention kernel gets its softmax row-sum
    # straight out of the aggregation matmul (no cross-lane reduction).
    lane = jax.lax.broadcasted_iota(jnp.int32, h.shape, 1)
    h_ref[...] = jnp.where(lane == sum_lane, jnp.float32(1.0), h).astype(h_ref.dtype)


# ----------------------- row-tiled attention kernel ---------------------------
def _attention_kernel(h_ref, asrc_t_ref, alpha_ref, adj_ref, bias_ref, out_ref,
                      *, heads, c, sum_lane, apply_relu):
    # Additive mask (0 where edge, -1e30 where not); int8 -> f32 dequant-style convert.
    adj_f = adj_ref[...].astype(jnp.float32)                          # [T, Np]
    mask = (adj_f - jnp.float32(1.0)) * jnp.float32(MASK_VAL)         # 0 / -1e30
    lane = jax.lax.broadcasted_iota(jnp.int32, out_ref.shape, 1)      # [T, HCp]
    acc = jnp.zeros(out_ref.shape, jnp.float32)
    for hd in range(heads):                                           # static unroll
        a_src = asrc_t_ref[hd:hd + 1, :]                              # [1, Np] lane-dense
        a_dst = alpha_ref[:, DST_OFF + hd:DST_OFF + hd + 1]           # [T, 1]
        e = a_dst + a_src                                             # [T, Np]
        e = jnp.maximum(e, NEG_SLOPE * e) + mask                      # LeakyReLU + mask
        m = jnp.max(e, axis=1, keepdims=True)                         # [T, 1]
        p = jnp.exp(e - m)                                            # masked entries -> 0
        agg = jnp.dot(p.astype(h_ref.dtype), h_ref[...],
                      preferred_element_type=jnp.float32)             # [T, HCp] f32 acc
        s = agg[:, sum_lane:sum_lane + 1]                             # row-sum via MXU ones lane
        out_hd = agg * (jnp.float32(1.0) / s)                         # exact divide on [T,1]
        head_cols = (lane >= hd * c) & (lane < (hd + 1) * c)
        acc = jnp.where(head_cols, out_hd, acc)                       # pack head hd's columns
    out = acc + bias_ref[...]
    if apply_relu:
        out = jnp.maximum(out, jnp.float32(0.0))
    out_ref[...] = out.astype(out_ref.dtype)


# ------------------------------- GAT layer ------------------------------------
def gat_layer(x_pad, w_pad, amat, bias_pad, adj_i8, *, heads, c, hc_pad,
              apply_relu, tile_n, out_dtype):
    n_pad, f_in = x_pad.shape
    sum_lane = hc_pad - 1
    grid_n = n_pad // tile_n
    vmem_limit = _vmem_limit_bytes()

    # 1) projection + fused per-node attention scalars, row-tiled for DMA/compute overlap.
    h, alpha = pl.pallas_call(
        functools.partial(_project_kernel, sum_lane=sum_lane),
        out_shape=(jax.ShapeDtypeStruct((n_pad, hc_pad), ACT_DT),
                   jax.ShapeDtypeStruct((n_pad, ALPHA_LANES), jnp.float32)),
        grid=(grid_n,),
        in_specs=[pl.BlockSpec((tile_n, f_in), lambda i: (i, 0)),          # X row tile
                  pl.BlockSpec((f_in, hc_pad), lambda i: (0, 0)),          # W (resident)
                  pl.BlockSpec((hc_pad, ALPHA_LANES), lambda i: (0, 0))],  # alpha matrix (resident)
        out_specs=(pl.BlockSpec((tile_n, hc_pad), lambda i: (i, 0)),
                   pl.BlockSpec((tile_n, ALPHA_LANES), lambda i: (i, 0))),
        compiler_params=pltpu.CompilerParams(
            dimension_semantics=("parallel",), vmem_limit_bytes=vmem_limit),
    )(x_pad, w_pad, amat)

    # tiny [Np, 8] -> [8, Np] XLA transpose so src scalars are a lane-dense row block.
    asrc_t = alpha[:, :SRC_ROWS].T

    # 2) attention, tiled over destination-node rows.
    # NOTE: resident inputs (h, asrc_t, bias) keep default buffering; pl.Buffered(1)
    #       would halve their VMEM but is omitted for lowering portability.
    # TODO(synk): flash-style source blocking + bit-packed adjacency for graphs whose
    #             resident h / dense adjacency exceed the VMEM/HBM budget (v7x 64 MiB/TC).
    kernel = functools.partial(_attention_kernel, heads=heads, c=c,
                               sum_lane=sum_lane, apply_relu=apply_relu)
    return pl.pallas_call(
        kernel,
        out_shape=jax.ShapeDtypeStruct((n_pad, hc_pad), out_dtype),
        grid=(grid_n,),
        in_specs=[
            pl.BlockSpec((n_pad, hc_pad), lambda i: (0, 0)),         # h (resident, packed heads + ones lane)
            pl.BlockSpec((SRC_ROWS, n_pad), lambda i: (0, 0)),       # alpha_src^T (resident)
            pl.BlockSpec((tile_n, ALPHA_LANES), lambda i: (i, 0)),   # alpha row tile (dst cols)
            pl.BlockSpec((tile_n, n_pad), lambda i: (i, 0)),         # int8 adjacency row tile
            pl.BlockSpec((1, hc_pad), lambda i: (0, 0)),             # bias (resident)
        ],
        out_specs=pl.BlockSpec((tile_n, hc_pad), lambda i: (i, 0)),
        compiler_params=pltpu.CompilerParams(
            dimension_semantics=("parallel",), vmem_limit_bytes=vmem_limit),
    )(h, asrc_t, alpha, adj_i8, bias_pad)


# ------------------------------ padding helpers --------------------------------
def _pad2d(a, rows, cols, dtype):
    out = jnp.zeros((rows, cols), dtype)
    return out.at[:a.shape[0], :a.shape[1]].set(a.astype(dtype))


def _alpha_mat(att_src, att_dst, heads, c, hc_pad):
    """[hc_pad, 128] matrix so h @ m gives all heads' src (cols 0..H-1) and dst
    (cols 64..64+H-1) attention scalars in one lane-dense MXU output."""
    m = jnp.zeros((hc_pad, ALPHA_LANES), jnp.float32)
    for hd in range(heads):
        m = m.at[hd * c:(hd + 1) * c, hd].set(att_src[hd])
        m = m.at[hd * c:(hd + 1) * c, DST_OFF + hd].set(att_dst[hd])
    return m


# ------------------------------ model wrapper -----------------------------------
def init_params(key, in_dim, hidden_dim, out_dim, heads):
    ks = jax.random.split(key, 6)
    scale = 0.2
    return {
        "w1": scale * jax.random.normal(ks[0], (in_dim, heads * hidden_dim), jnp.float32),
        "att_src1": scale * jax.random.normal(ks[1], (heads, hidden_dim), jnp.float32),
        "att_dst1": scale * jax.random.normal(ks[2], (heads, hidden_dim), jnp.float32),
        "b1": jnp.zeros((1, heads * hidden_dim), jnp.float32),
        "w2": scale * jax.random.normal(ks[3], (heads * hidden_dim, out_dim), jnp.float32),
        "att_src2": scale * jax.random.normal(ks[4], (1, out_dim), jnp.float32),
        "att_dst2": scale * jax.random.normal(ks[5], (1, out_dim), jnp.float32),
        "b2": jnp.zeros((1, out_dim), jnp.float32),
    }


def gat_link_pred(params, x, edge_index, edge_label_index, *,
                  hidden_dim, out_dim, heads, tile_n=256):
    n, in_dim = x.shape
    assert heads <= SRC_ROWS and heads <= DST_OFF

    # tile_n: multiple of 128, >= 128, clamped to the 128-rounded node count.
    tile_n = max(LANE, (int(tile_n) // LANE) * LANE)
    tile_n = min(tile_n, _round_up(n, LANE))
    n_pad = _round_up(n, tile_n)

    f_pad = _round_up(in_dim, LANE)
    # heads packed into one lane block; +1 reserves the ones / row-sum lane.
    hc1_pad = _round_up(heads * hidden_dim + 1, LANE)
    hc2_pad = _round_up(out_dim + 1, LANE)

    # Dense adjacency adj[dst, src]=1 with self loops (incl. padded rows so every softmax
    # row is non-empty); built with int32 scatter (robust on TPU), stored as int8 and
    # reused by both layers.  Duplicate/parallel edges collapse (simple-graph semantics).
    adj = jnp.zeros((n_pad, n_pad), jnp.int32)
    adj = adj.at[edge_index[1], edge_index[0]].set(1)
    diag = jnp.arange(n_pad)
    adj = adj.at[diag, diag].set(1)
    adj_i8 = adj.astype(jnp.int8)

    # Lane-dense zero padding; weights/activations in bf16 on TPU, f32 elsewhere.
    x_pad = _pad2d(x, n_pad, f_pad, ACT_DT)
    w1 = _pad2d(params["w1"], f_pad, hc1_pad, ACT_DT)
    amat1 = _alpha_mat(params["att_src1"], params["att_dst1"],
                       heads, hidden_dim, hc1_pad).astype(ACT_DT)
    b1 = _pad2d(params["b1"], 1, hc1_pad, jnp.float32)

    # Layer 2 consumes layer 1's packed-head layout directly (cols 0..heads*hidden-1).
    w2 = _pad2d(params["w2"], hc1_pad, hc2_pad, ACT_DT)
    amat2 = _alpha_mat(params["att_src2"], params["att_dst2"],
                       1, out_dim, hc2_pad).astype(ACT_DT)
    b2 = _pad2d(params["b2"], 1, hc2_pad, jnp.float32)

    # encode: conv1 (heads=H, concat) + relu, then conv2 (heads=1).
    h = gat_layer(x_pad, w1, amat1, b1, adj_i8, heads=heads, c=hidden_dim,
                  hc_pad=hc1_pad, apply_relu=True, tile_n=tile_n, out_dtype=ACT_DT)
    z_pad = gat_layer(h, w2, amat2, b2, adj_i8, heads=1, c=out_dim,
                      hc_pad=hc2_pad, apply_relu=False, tile_n=tile_n,
                      out_dtype=jnp.float32)
    z = z_pad[:n, :out_dim]

    # decode: (z[src] * z[dst]).sum(-1) — data-dependent gather left to XLA.
    src, dst = edge_label_index[0], edge_label_index[1]
    return jnp.sum(z[src] * z[dst], axis=-1)


# ----------------------------------- main ----------------------------------------
if __name__ == "__main__":
    N, IN_DIM, HIDDEN, OUT_DIM, HEADS = 64, 8, 8, 16, 4
    E, L = 160, 16

    key = jax.random.PRNGKey(0)
    k_x, k_e, k_l, k_p = jax.random.split(key, 4)

    x = jax.random.normal(k_x, (N, IN_DIM), jnp.float32)
    edge_index = jax.random.randint(k_e, (2, E), 0, N, dtype=jnp.int32)
    edge_label_index = jax.random.randint(k_l, (2, L), 0, N, dtype=jnp.int32)

    params = init_params(k_p, IN_DIM, HIDDEN, OUT_DIM, HEADS)

    fwd = jax.jit(functools.partial(gat_link_pred, hidden_dim=HIDDEN,
                                    out_dim=OUT_DIM, heads=HEADS, tile_n=256))
    scores = jax.block_until_ready(fwd(params, x, edge_index, edge_label_index))

    assert scores.shape == (L,) and scores.dtype == jnp.float32
    assert bool(jnp.all(jnp.isfinite(scores)))
    print("KERNEL_OK")
</pallas_src>

<mosaic_0001>
module attributes {stable_mosaic.version = 11 : i64} {
  func.func @_project_kernel(%arg0: i32, %arg1: memref<128x128xf32, #tpu.memory_space<vmem>>, %arg2: memref<128x128xf32, #tpu.memory_space<vmem>>, %arg3: memref<128x128xf32, #tpu.memory_space<vmem>>, %arg4: memref<128x128xf32, #tpu.memory_space<vmem>>, %arg5: memref<128x128xf32, #tpu.memory_space<vmem>>) attributes {dimension_semantics = [#tpu.dimension_semantics<parallel>], iteration_bounds = array<i64: 1>, scalar_prefetch = 0 : i64, scratch_operands = 0 : i64, tpu.core_type = #tpu.core_type<tc>, window_params = [{transform_indices = @transform_0, window_bounds = array<i64: 128, 128>}, {pipeline_mode = #tpu.pipeline_mode<synchronous>, transform_indices = @transform_1, window_bounds = array<i64: 128, 128>}, {pipeline_mode = #tpu.pipeline_mode<synchronous>, transform_indices = @transform_2, window_bounds = array<i64: 128, 128>}, {transform_indices = @transform_3, window_bounds = array<i64: 128, 128>}, {transform_indices = @transform_4, window_bounds = array<i64: 128, 128>}]} {
    %c0 = arith.constant 0 : index
    %c0_0 = arith.constant 0 : index
    %0 = vector.load %arg1[%c0, %c0_0] : memref<128x128xf32, #tpu.memory_space<vmem>>, vector<128x128xf32>
    %c0_1 = arith.constant 0 : index
    %c0_2 = arith.constant 0 : index
    %1 = vector.load %arg2[%c0_1, %c0_2] : memref<128x128xf32, #tpu.memory_space<vmem>>, vector<128x128xf32>
    %cst = arith.constant dense<0.000000e+00> : vector<128x128xf32>
    %2 = tpu.matmul %0, %1, %cst {dimension_numbers = #tpu.dot_dimension_numbers<[1], [0], [0], [1], [0, 0, 1, 1], [], []>} : vector<128x128xf32>, vector<128x128xf32>, vector<128x128xf32> -> vector<128x128xf32>
    %c0_3 = arith.constant 0 : index
    %c0_4 = arith.constant 0 : index
    %3 = vector.load %arg3[%c0_3, %c0_4] : memref<128x128xf32, #tpu.memory_space<vmem>>, vector<128x128xf32>
    %cst_5 = arith.constant dense<0.000000e+00> : vector<128x128xf32>
    %4 = tpu.matmul %2, %3, %cst_5 {dimension_numbers = #tpu.dot_dimension_numbers<[1], [0], [0], [1], [0, 0, 1, 1], [], []>} : vector<128x128xf32>, vector<128x128xf32>, vector<128x128xf32> -> vector<128x128xf32>
    %c0_6 = arith.constant 0 : index
    %c0_7 = arith.constant 0 : index
    %5 = vector.load %arg5[%c0_6, %c0_7] : memref<128x128xf32, #tpu.memory_space<vmem>>, vector<128x128xf32>
    tpu.vector_store %arg5[%c0_6, %c0_7], %4 {strides = array<i32>} : memref<128x128xf32, #tpu.memory_space<vmem>>, vector<128x128xf32>,
    %6 = tpu.iota {dimensions = array<i32: 1>} : vector<128x128xi32>
    %c127_i32 = arith.constant 127 : i32
    %7 = vector.broadcast %c127_i32 : i32 to vector<128x128xi32>
    %8 = arith.cmpi eq, %6, %7 : vector<128x128xi32>
    %cst_8 = arith.constant 1.000000e+00 : f32
    %9 = vector.broadcast %cst_8 : f32 to vector<128x128xf32>
    %10 = arith.select %8, %9, %2 : vector<128x128xi1>, vector<128x128xf32>
    %c0_9 = arith.constant 0 : index
    %c0_10 = arith.constant 0 : index
    %11 = vector.load %arg4[%c0_9, %c0_10] : memref<128x128xf32, #tpu.memory_space<vmem>>, vector<128x128xf32>
    tpu.vector_store %arg4[%c0_9, %c0_10], %10 {strides = array<i32>} : memref<128x128xf32, #tpu.memory_space<vmem>>, vector<128x128xf32>,
    return
  }
  func.func @transform_0(%arg0: i32) -> (i32, i32) {
    %c0_i32 = arith.constant 0 : i32
    %c0_i32_0 = arith.constant 0 : i32
    return %arg0, %c0_i32 : i32, i32
  }
  func.func @transform_1(%arg0: i32) -> (i32, i32) {
    %c0_i32 = arith.constant 0 : i32
    %c0_i32_0 = arith.constant 0 : i32
    %c0_i32_1 = arith.constant 0 : i32
    return %c0_i32, %c0_i32_0 : i32, i32
  }
  func.func @transform_2(%arg0: i32) -> (i32, i32) {
    %c0_i32 = arith.constant 0 : i32
    %c0_i32_0 = arith.constant 0 : i32
    %c0_i32_1 = arith.constant 0 : i32
    return %c0_i32, %c0_i32_0 : i32, i32
  }
  func.func @transform_3(%arg0: i32) -> (i32, i32) {
    %c0_i32 = arith.constant 0 : i32
    %c0_i32_0 = arith.constant 0 : i32
    return %arg0, %c0_i32 : i32, i32
  }
  func.func @transform_4(%arg0: i32) -> (i32, i32) {
    %c0_i32 = arith.constant 0 : i32
    %c0_i32_0 = arith.constant 0 : i32
    return %arg0, %c0_i32 : i32, i32
  }
}

module attributes {stable_mosaic.version = 11 : i64} {
  func.func @_attention_kernel(%arg0: i32, %arg1: memref<128x128xf32, #tpu.memory_space<vmem>>, %arg2: memref<8x128xf32, #tpu.memory_space<vmem>>, %arg3: memref<128x128xf32, #tpu.memory_space<vmem>>, %arg4: memref<128x128xi8, #tpu.memory_space<vmem>>, %arg5: memref<1x128xf32, #tpu.memory_space<vmem>>, %arg6: memref<128x128xf32, #tpu.memory_space<vmem>>) attributes {dimension_semantics = [#tpu.dimension_semantics<parallel>], iteration_bounds = array<i64: 1>, scalar_prefetch = 0 : i64, scratch_operands = 0 : i64, tpu.core_type = #tpu.core_type<tc>, window_params = [{pipeline_mode = #tpu.pipeline_mode<synchronous>, transform_indices = @transform_0, window_bounds = array<i64: 128, 128>}, {pipeline_mode = #tpu.pipeline_mode<synchronous>, transform_indices = @transform_1, window_bounds = array<i64: 8, 128>}, {transform_indices = @transform_2, window_bounds = array<i64: 128, 128>}, {transform_indices = @transform_3, window_bounds = array<i64: 128, 128>}, {pipeline_mode = #tpu.pipeline_mode<synchronous>, transform_indices = @transform_4, window_bounds = array<i64: 1, 128>}, {transform_indices = @transform_5, window_bounds = array<i64: 128, 128>}]} {
    %c0 = arith.constant 0 : index
    %c0_0 = arith.constant 0 : index
    %0 = vector.load %arg4[%c0, %c0_0] : memref<128x128xi8, #tpu.memory_space<vmem>>, vector<128x128xi8>
    %1 = arith.sitofp %0 : vector<128x128xi8> to vector<128x128xf32>
    %cst = arith.constant 1.000000e+00 : f32
    %2 = vector.broadcast %cst : f32 to vector<128x128xf32>
    %3 = arith.subf %1, %2 : vector<128x128xf32>
    %cst_1 = arith.constant 1.000000e+30 : f32
    %4 = vector.broadcast %cst_1 : f32 to vector<128x128xf32>
    %5 = arith.mulf %3, %4 : vector<128x128xf32>
    %6 = tpu.iota {dimensions = array<i32: 1>} : vector<128x128xi32>
    %cst_2 = arith.constant 0.000000e+00 : f32
    %7 = vector.broadcast %cst_2 : f32 to vector<128x128xf32>
    %c0_3 = arith.constant 0 : index
    %c0_4 = arith.constant 0 : index
    %8 = vector.load %arg2[%c0_3, %c0_4] : memref<8x128xf32, #tpu.memory_space<vmem>>, vector<1x128xf32>
    %c0_5 = arith.constant 0 : index
    %c64 = arith.constant 64 : index
    %9 = vector.load %arg3[%c0_5, %c64] : memref<128x128xf32, #tpu.memory_space<vmem>>, vector<128x1xf32>
    %10 = vector.broadcast %9 : vector<128x1xf32> to vector<128x128xf32>
    %11 = vector.broadcast %8 : vector<1x128xf32> to vector<128x128xf32>
    %12 = arith.addf %10, %11 : vector<128x128xf32>
    %cst_6 = arith.constant 2.000000e-01 : f32
    %13 = vector.broadcast %cst_6 : f32 to vector<128x128xf32>
    %14 = arith.mulf %13, %12 : vector<128x128xf32>
    %15 = arith.maximumf %12, %14 : vector<128x128xf32>
    %16 = arith.addf %15, %5 : vector<128x128xf32>
    %cst_7 = arith.constant dense<0xFF800000> : vector<128xf32>
    %17 = vector.multi_reduction <maximumf>, %16, %cst_7 [1] : vector<128x128xf32> to vector<128xf32>
    %18 = vector.shape_cast %17 : vector<128xf32> to vector<128x1xf32>
    %19 = vector.broadcast %18 : vector<128x1xf32> to vector<128x128xf32>
    %20 = arith.subf %16, %19 : vector<128x128xf32>
    %21 = math.exp %20 : vector<128x128xf32>
    %c0_8 = arith.constant 0 : index
    %c0_9 = arith.constant 0 : index
    %22 = vector.load %arg1[%c0_8, %c0_9] : memref<128x128xf32, #tpu.memory_space<vmem>>, vector<128x128xf32>
    %cst_10 = arith.constant dense<0.000000e+00> : vector<128x128xf32>
    %23 = tpu.matmul %21, %22, %cst_10 {dimension_numbers = #tpu.dot_dimension_numbers<[1], [0], [0], [1], [0, 0, 1, 1], [], []>} : vector<128x128xf32>, vector<128x128xf32>, vector<128x128xf32> -> vector<128x128xf32>
    %24 = vector.extract_strided_slice %23 {offsets = [0, 127], sizes = [128, 1], strides = [1, 1]} : vector<128x128xf32> to vector<128x1xf32>
    %cst_11 = arith.constant 1.000000e+00 : f32
    %25 = vector.broadcast %cst_11 : f32 to vector<128x1xf32>
    %26 = arith.divf %25, %24 : vector<128x1xf32>
    %27 = vector.broadcast %26 : vector<128x1xf32> to vector<128x128xf32>
    %28 = arith.mulf %23, %27 : vector<128x128xf32>
    %c0_i32 = arith.constant 0 : i32
    %29 = vector.broadcast %c0_i32 : i32 to vector<128x128xi32>
    %30 = arith.cmpi sge, %6, %29 : vector<128x128xi32>
    %c8_i32 = arith.constant 8 : i32
    %31 = vector.broadcast %c8_i32 : i32 to vector<128x128xi32>
    %32 = arith.cmpi slt, %6, %31 : vector<128x128xi32>
    %33 = arith.andi %30, %32 : vector<128x128xi1>
    %34 = arith.select %33, %28, %7 : vector<128x128xi1>, vector<128x128xf32>
    %c1 = arith.constant 1 : index
    %c0_12 = arith.constant 0 : index
    %35 = vector.load %arg2[%c1, %c0_12] : memref<8x128xf32, #tpu.memory_space<vmem>>, vector<1x128xf32>
    %c0_13 = arith.constant 0 : index
    %c65 = arith.constant 65 : index
    %36 = vector.load %arg3[%c0_13, %c65] : memref<128x128xf32, #tpu.memory_space<vmem>>, vector<128x1xf32>
    %37 = vector.broadcast %36 : vector<128x1xf32> to vector<128x128xf32>
    %38 = vector.broadcast %35 : vector<1x128xf32> to vector<128x128xf32>
    %39 = arith.addf %37, %38 : vector<128x128xf32>
    %cst_14 = arith.constant 2.000000e-01 : f32
    %40 = vector.broadcast %cst_14 : f32 to vector<128x128xf32>
    %41 = arith.mulf %40, %39 : vector<128x128xf32>
    %42 = arith.maximumf %39, %41 : vector<128x128xf32>
    %43 = arith.addf %42, %5 : vector<128x128xf32>
    %cst_15 = arith.constant dense<0xFF800000> : vector<128xf32>
    %44 = vector.multi_reduction <maximumf>, %43, %cst_15 [1] : vector<128x128xf32> to vector<128xf32>
    %45 = vector.shape_cast %44 : vector<128xf32> to vector<128x1xf32>
    %46 = vector.broadcast %45 : vector<128x1xf32> to vector<128x128xf32>
    %47 = arith.subf %43, %46 : vector<128x128xf32>
    %48 = math.exp %47 : vector<128x128xf32>
    %c0_16 = arith.constant 0 : index
    %c0_17 = arith.constant 0 : index
    %49 = vector.load %arg1[%c0_16, %c0_17] : memref<128x128xf32, #tpu.memory_space<vmem>>, vector<128x128xf32>
    %cst_18 = arith.constant dense<0.000000e+00> : vector<128x128xf32>
    %50 = tpu.matmul %48, %49, %cst_18 {dimension_numbers = #tpu.dot_dimension_numbers<[1], [0], [0], [1], [0, 0, 1, 1], [], []>} : vector<128x128xf32>, vector<128x128xf32>, vector<128x128xf32> -> vector<128x128xf32>
    %51 = vector.extract_strided_slice %50 {offsets = [0, 127], sizes = [128, 1], strides = [1, 1]} : vector<128x128xf32> to vector<128x1xf32>
    %cst_19 = arith.constant 1.000000e+00 : f32
    %52 = vector.broadcast %cst_19 : f32 to vector<128x1xf32>
    %53 = arith.divf %52, %51 : vector<128x1xf32>
    %54 = vector.broadcast %53 : vector<128x1xf32> to vector<128x128xf32>
    %55 = arith.mulf %50, %54 : vector<128x128xf32>
    %c8_i32_20 = arith.constant 8 : i32
    %56 = vector.broadcast %c8_i32_20 : i32 to vector<128x128xi32>
    %57 = arith.cmpi sge, %6, %56 : vector<128x128xi32>
    %c16_i32 = arith.constant 16 : i32
    %58 = vector.broadcast %c16_i32 : i32 to vector<128x128xi32>
    %59 = arith.cmpi slt, %6, %58 : vector<128x128xi32>
    %60 = arith.andi %57, %59 : vector<128x128xi1>
    %61 = arith.select %60, %55, %34 : vector<128x128xi1>, vector<128x128xf32>
    %c2 = arith.constant 2 : index
    %c0_21 = arith.constant 0 : index
    %62 = vector.load %arg2[%c2, %c0_21] : memref<8x128xf32, #tpu.memory_space<vmem>>, vector<1x128xf32>
    %c0_22 = arith.constant 0 : index
    %c66 = arith.constant 66 : index
    %63 = vector.load %arg3[%c0_22, %c66] : memref<128x128xf32, #tpu.memory_space<vmem>>, vector<128x1xf32>
    %64 = vector.broadcast %63 : vector<128x1xf32> to vector<128x128xf32>
    %65 = vector.broadcast %62 : vector<1x128xf32> to vector<128x128xf32>
    %66 = arith.addf %64, %65 : vector<128x128xf32>
    %cst_23 = arith.constant 2.000000e-01 : f32
    %67 = vector.broadcast %cst_23 : f32 to vector<128x128xf32>
    %68 = arith.mulf %67, %66 : vector<128x128xf32>
    %69 = arith.maximumf %66, %68 : vector<128x128xf32>
    %70 = arith.addf %69, %5 : vector<128x128xf32>
    %cst_24 = arith.constant dense<0xFF800000> : vector<128xf32>
    %71 = vector.multi_reduction <maximumf>, %70, %cst_24 [1] : vector<128x128xf32> to vector<128xf32>
    %72 = vector.shape_cast %71 : vector<128xf32> to vector<128x1xf32>
    %73 = vector.broadcast %72 : vector<128x1xf32> to vector<128x128xf32>
    %74 = arith.subf %70, %73 : vector<128x128xf32>
    %75 = math.exp %74 : vector<128x128xf32>
    %c0_25 = arith.constant 0 : index
    %c0_26 = arith.constant 0 : index
    %76 = vector.load %arg1[%c0_25, %c0_26] : memref<128x128xf32, #tpu.memory_space<vmem>>, vector<128x128xf32>
    %cst_27 = arith.constant dense<0.000000e+00> : vector<128x128xf32>
    %77 = tpu.matmul %75, %76, %cst_27 {dimension_numbers = #tpu.dot_dimension_numbers<[1], [0], [0], [1], [0, 0, 1, 1], [], []>} : vector<128x128xf32>, vector<128x128xf32>, vector<128x128xf32> -> vector<128x128xf32>
    %78 = vector.extract_strided_slice %77 {offsets = [0, 127], sizes = [128, 1], strides = [1, 1]} : vector<128x128xf32> to vector<128x1xf32>
    %cst_28 = arith.constant 1.000000e+00 : f32
    %79 = vector.broadcast %cst_28 : f32 to vector<128x1xf32>
    %80 = arith.divf %79, %78 : vector<128x1xf32>
    %81 = vector.broadcast %80 : vector<128x1xf32> to vector<128x128xf32>
    %82 = arith.mulf %77, %81 : vector<128x128xf32>
    %c16_i32_29 = arith.constant 16 : i32
    %83 = vector.broadcast %c16_i32_29 : i32 to vector<128x128xi32>
    %84 = arith.cmpi sge, %6, %83 : vector<128x128xi32>
    %c24_i32 = arith.constant 24 : i32
    %85 = vector.broadcast %c24_i32 : i32 to vector<128x128xi32>
    %86 = arith.cmpi slt, %6, %85 : vector<128x128xi32>
    %87 = arith.andi %84, %86 : vector<128x128xi1>
    %88 = arith.select %87, %82, %61 : vector<128x128xi1>, vector<128x128xf32>
    %c3 = arith.constant 3 : index
    %c0_30 = arith.constant 0 : index
    %89 = vector.load %arg2[%c3, %c0_30] : memref<8x128xf32, #tpu.memory_space<vmem>>, vector<1x128xf32>
    %c0_31 = arith.constant 0 : index
    %c67 = arith.constant 67 : index
    %90 = vector.load %arg3[%c0_31, %c67] : memref<128x128xf32, #tpu.memory_space<vmem>>, vector<128x1xf32>
    %91 = vector.broadcast %90 : vector<128x1xf32> to vector<128x128xf32>
    %92 = vector.broadcast %89 : vector<1x128xf32> to vector<128x128xf32>
    %93 = arith.addf %91, %92 : vector<128x128xf32>
    %cst_32 = arith.constant 2.000000e-01 : f32
    %94 = vector.broadcast %cst_32 : f32 to vector<128x128xf32>
    %95 = arith.mulf %94, %93 : vector<128x128xf32>
    %96 = arith.maximumf %93, %95 : vector<128x128xf32>
    %97 = arith.addf %96, %5 : vector<128x128xf32>
    %cst_33 = arith.constant dense<0xFF800000> : vector<128xf32>
    %98 = vector.multi_reduction <maximumf>, %97, %cst_33 [1] : vector<128x128xf32> to vector<128xf32>
    %99 = vector.shape_cast %98 : vector<128xf32> to vector<128x1xf32>
    %100 = vector.broadcast %99 : vector<128x1xf32> to vector<128x128xf32>
    %101 = arith.subf %97, %100 : vector<128x128xf32>
    %102 = math.exp %101 : vector<128x128xf32>
    %c0_34 = arith.constant 0 : index
    %c0_35 = arith.constant 0 : index
    %103 = vector.load %arg1[%c0_34, %c0_35] : memref<128x128xf32, #tpu.memory_space<vmem>>, vector<128x128xf32>
    %cst_36 = arith.constant dense<0.000000e+00> : vector<128x128xf32>
    %104 = tpu.matmul %102, %103, %cst_36 {dimension_numbers = #tpu.dot_dimension_numbers<[1], [0], [0], [1], [0, 0, 1, 1], [], []>} : vector<128x128xf32>, vector<128x128xf32>, vector<128x128xf32> -> vector<128x128xf32>
    %105 = vector.extract_strided_slice %104 {offsets = [0, 127], sizes = [128, 1], strides = [1, 1]} : vector<128x128xf32> to vector<128x1xf32>
    %cst_37 = arith.constant 1.000000e+00 : f32
    %106 = vector.broadcast %cst_37 : f32 to vector<128x1xf32>
    %107 = arith.divf %106, %105 : vector<128x1xf32>
    %108 = vector.broadcast %107 : vector<128x1xf32> to vector<128x128xf32>
    %109 = arith.mulf %104, %108 : vector<128x128xf32>
    %c24_i32_38 = arith.constant 24 : i32
    %110 = vector.broadcast %c24_i32_38 : i32 to vector<128x128xi32>
    %111 = arith.cmpi sge, %6, %110 : vector<128x128xi32>
    %c32_i32 = arith.constant 32 : i32
    %112 = vector.broadcast %c32_i32 : i32 to vector<128x128xi32>
    %113 = arith.cmpi slt, %6, %112 : vector<128x128xi32>
    %114 = arith.andi %111, %113 : vector<128x128xi1>
    %115 = arith.select %114, %109, %88 : vector<128x128xi1>, vector<128x128xf32>
    %c0_39 = arith.constant 0 : index
    %c0_40 = arith.constant 0 : index
    %116 = vector.load %arg5[%c0_39, %c0_40] : memref<1x128xf32, #tpu.memory_space<vmem>>, vector<1x128xf32>
    %117 = vector.broadcast %116 : vector<1x128xf32> to vector<128x128xf32>
    %118 = arith.addf %115, %117 : vector<128x128xf32>
    %cst_41 = arith.constant 0.000000e+00 : f32
    %119 = vector.broadcast %cst_41 : f32 to vector<128x128xf32>
    %120 = arith.maximumf %118, %119 : vector<128x128xf32>
    %c0_42 = arith.constant 0 : index
    %c0_43 = arith.constant 0 : index
    %121 = vector.load %arg6[%c0_42, %c0_43] : memref<128x128xf32, #tpu.memory_space<vmem>>, vector<128x128xf32>
    tpu.vector_store %arg6[%c0_42, %c0_43], %120 {strides = array<i32>} : memref<128x128xf32, #tpu.memory_space<vmem>>, vector<128x128xf32>,
    return
  }
  func.func @transform_0(%arg0: i32) -> (i32, i32) {
    %c0_i32 = arith.constant 0 : i32
    %c0_i32_0 = arith.constant 0 : i32
    %c0_i32_1 = arith.constant 0 : i32
    return %c0_i32, %c0_i32_0 : i32, i32
  }
  func.func @transform_1(%arg0: i32) -> (i32, i32) {
    %c0_i32 = arith.constant 0 : i32
    %c0_i32_0 = arith.constant 0 : i32
    %c0_i32_1 = arith.constant 0 : i32
    return %c0_i32, %c0_i32_0 : i32, i32
  }
  func.func @transform_2(%arg0: i32) -> (i32, i32) {
    %c0_i32 = arith.constant 0 : i32
    %c0_i32_0 = arith.constant 0 : i32
    return %arg0, %c0_i32 : i32, i32
  }
  func.func @transform_3(%arg0: i32) -> (i32, i32) {
    %c0_i32 = arith.constant 0 : i32
    %c0_i32_0 = arith.constant 0 : i32
    return %arg0, %c0_i32 : i32, i32
  }
  func.func @transform_4(%arg0: i32) -> (i32, i32) {
    %c0_i32 = arith.constant 0 : i32
    %c0_i32_0 = arith.constant 0 : i32
    %c0_i32_1 = arith.constant 0 : i32
    return %c0_i32, %c0_i32_0 : i32, i32
  }
  func.func @transform_5(%arg0: i32) -> (i32, i32) {
    %c0_i32 = arith.constant 0 : i32
    %c0_i32_0 = arith.constant 0 : i32
    return %arg0, %c0_i32 : i32, i32
  }
}

module attributes {stable_mosaic.version = 11 : i64} {
  func.func @_attention_kernel(%arg0: i32, %arg1: memref<128x128xf32, #tpu.memory_space<vmem>>, %arg2: memref<8x128xf32, #tpu.memory_space<vmem>>, %arg3: memref<128x128xf32, #tpu.memory_space<vmem>>, %arg4: memref<128x128xi8, #tpu.memory_space<vmem>>, %arg5: memref<1x128xf32, #tpu.memory_space<vmem>>, %arg6: memref<128x128xf32, #tpu.memory_space<vmem>>) attributes {dimension_semantics = [#tpu.dimension_semantics<parallel>], iteration_bounds = array<i64: 1>, scalar_prefetch = 0 : i64, scratch_operands = 0 : i64, tpu.core_type = #tpu.core_type<tc>, window_params = [{pipeline_mode = #tpu.pipeline_mode<synchronous>, transform_indices = @transform_0, window_bounds = array<i64: 128, 128>}, {pipeline_mode = #tpu.pipeline_mode<synchronous>, transform_indices = @transform_1, window_bounds = array<i64: 8, 128>}, {transform_indices = @transform_2, window_bounds = array<i64: 128, 128>}, {transform_indices = @transform_3, window_bounds = array<i64: 128, 128>}, {pipeline_mode = #tpu.pipeline_mode<synchronous>, transform_indices = @transform_4, window_bounds = array<i64: 1, 128>}, {transform_indices = @transform_5, window_bounds = array<i64: 128, 128>}]} {
    %c0 = arith.constant 0 : index
    %c0_0 = arith.constant 0 : index
    %0 = vector.load %arg4[%c0, %c0_0] : memref<128x128xi8, #tpu.memory_space<vmem>>, vector<128x128xi8>
    %1 = arith.sitofp %0 : vector<128x128xi8> to vector<128x128xf32>
    %cst = arith.constant 1.000000e+00 : f32
    %2 = vector.broadcast %cst : f32 to vector<128x128xf32>
    %3 = arith.subf %1, %2 : vector<128x128xf32>
    %cst_1 = arith.constant 1.000000e+30 : f32
    %4 = vector.broadcast %cst_1 : f32 to vector<128x128xf32>
    %5 = arith.mulf %3, %4 : vector<128x128xf32>
    %6 = tpu.iota {dimensions = array<i32: 1>} : vector<128x128xi32>
    %cst_2 = arith.constant 0.000000e+00 : f32
    %7 = vector.broadcast %cst_2 : f32 to vector<128x128xf32>
    %c0_3 = arith.constant 0 : index
    %c0_4 = arith.constant 0 : index
    %8 = vector.load %arg2[%c0_3, %c0_4] : memref<8x128xf32, #tpu.memory_space<vmem>>, vector<1x128xf32>
    %c0_5 = arith.constant 0 : index
    %c64 = arith.constant 64 : index
    %9 = vector.load %arg3[%c0_5, %c64] : memref<128x128xf32, #tpu.memory_space<vmem>>, vector<128x1xf32>
    %10 = vector.broadcast %9 : vector<128x1xf32> to vector<128x128xf32>
    %11 = vector.broadcast %8 : vector<1x128xf32> to vector<128x128xf32>
    %12 = arith.addf %10, %11 : vector<128x128xf32>
    %cst_6 = arith.constant 2.000000e-01 : f32
    %13 = vector.broadcast %cst_6 : f32 to vector<128x128xf32>
    %14 = arith.mulf %13, %12 : vector<128x128xf32>
    %15 = arith.maximumf %12, %14 : vector<128x128xf32>
    %16 = arith.addf %15, %5 : vector<128x128xf32>
    %cst_7 = arith.constant dense<0xFF800000> : vector<128xf32>
    %17 = vector.multi_reduction <maximumf>, %16, %cst_7 [1] : vector<128x128xf32> to vector<128xf32>
    %18 = vector.shape_cast %17 : vector<128xf32> to vector<128x1xf32>
    %19 = vector.broadcast %18 : vector<128x1xf32> to vector<128x128xf32>
    %20 = arith.subf %16, %19 : vector<128x128xf32>
    %21 = math.exp %20 : vector<128x128xf32>
    %c0_8 = arith.constant 0 : index
    %c0_9 = arith.constant 0 : index
    %22 = vector.load %arg1[%c0_8, %c0_9] : memref<128x128xf32, #tpu.memory_space<vmem>>, vector<128x128xf32>
    %cst_10 = arith.constant dense<0.000000e+00> : vector<128x128xf32>
    %23 = tpu.matmul %21, %22, %cst_10 {dimension_numbers = #tpu.dot_dimension_numbers<[1], [0], [0], [1], [0, 0, 1, 1], [], []>} : vector<128x128xf32>, vector<128x128xf32>, vector<128x128xf32> -> vector<128x128xf32>
    %24 = vector.extract_strided_slice %23 {offsets = [0, 127], sizes = [128, 1], strides = [1, 1]} : vector<128x128xf32> to vector<128x1xf32>
    %cst_11 = arith.constant 1.000000e+00 : f32
    %25 = vector.broadcast %cst_11 : f32 to vector<128x1xf32>
    %26 = arith.divf %25, %24 : vector<128x1xf32>
    %27 = vector.broadcast %26 : vector<128x1xf32> to vector<128x128xf32>
    %28 = arith.mulf %23, %27 : vector<128x128xf32>
    %c0_i32 = arith.constant 0 : i32
    %29 = vector.broadcast %c0_i32 : i32 to vector<128x128xi32>
    %30 = arith.cmpi sge, %6, %29 : vector<128x128xi32>
    %c16_i32 = arith.constant 16 : i32
    %31 = vector.broadcast %c16_i32 : i32 to vector<128x128xi32>
    %32 = arith.cmpi slt, %6, %31 : vector<128x128xi32>
    %33 = arith.andi %30, %32 : vector<128x128xi1>
    %34 = arith.select %33, %28, %7 : vector<128x128xi1>, vector<128x128xf32>
    %c0_12 = arith.constant 0 : index
    %c0_13 = arith.constant 0 : index
    %35 = vector.load %arg5[%c0_12, %c0_13] : memref<1x128xf32, #tpu.memory_space<vmem>>, vector<1x128xf32>
    %36 = vector.broadcast %35 : vector<1x128xf32> to vector<128x128xf32>
    %37 = arith.addf %34, %36 : vector<128x128xf32>
    %c0_14 = arith.constant 0 : index
    %c0_15 = arith.constant 0 : index
    %38 = vector.load %arg6[%c0_14, %c0_15] : memref<128x128xf32, #tpu.memory_space<vmem>>, vector<128x128xf32>
    tpu.vector_store %arg6[%c0_14, %c0_15], %37 {strides = array<i32>} : memref<128x128xf32, #tpu.memory_space<vmem>>, vector<128x128xf32>,
    return
  }
  func.func @transform_0(%arg0: i32) -> (i32, i32) {
    %c0_i32 = arith.constant 0 : i32
    %c0_i32_0 = arith.constant 0 : i32
    %c0_i32_1 = arith.constant 0 : i32
    return %c0_i32, %c0_i32_0 : i32, i32
  }
  func.func @transform_1(%arg0: i32) -> (i32, i32) {
    %c0_i32 = arith.constant 0 : i32
    %c0_i32_0 = arith.constant 0 : i32
    %c0_i32_1 = arith.constant 0 : i32
    return %c0_i32, %c0_i32_0 : i32, i32
  }
  func.func @transform_2(%arg0: i32) -> (i32, i32) {
    %c0_i32 = arith.constant 0 : i32
    %c0_i32_0 = arith.constant 0 : i32
    return %arg0, %c0_i32 : i32, i32
  }
  func.func @transform_3(%arg0: i32) -> (i32, i32) {
    %c0_i32 = arith.constant 0 : i32
    %c0_i32_0 = arith.constant 0 : i32
    return %arg0, %c0_i32 : i32, i32
  }
  func.func @transform_4(%arg0: i32) -> (i32, i32) {
    %c0_i32 = arith.constant 0 : i32
    %c0_i32_0 = arith.constant 0 : i32
    %c0_i32_1 = arith.constant 0 : i32
    return %c0_i32, %c0_i32_0 : i32, i32
  }
  func.func @transform_5(%arg0: i32) -> (i32, i32) {
    %c0_i32 = arith.constant 0 : i32
    %c0_i32_0 = arith.constant 0 : i32
    return %arg0, %c0_i32 : i32, i32
  }
}

</mosaic_0001>

<bundles_post_ra>
// kernel: gat_link_pred.4
= control target key start
LH: loop header
LB: loop body
LE: loop exit
PB: predicated region body
PF: predicated region fallthrough
CT: control target
= control target key end

     0   :  { %s953_s1 = inlined_call_operand.vmem [shape: f32[128,128], index: 1, kind: input, shape index: {}]   ;;  %s954_s0 = inlined_call_operand.vmem [shape: f32[128,128], index: 0, kind: input, shape index: {}]   ;;  %s955_s2 = inlined_call_operand.vmem [shape: f32[128,128], index: 2, kind: input, shape index: {}]   ;;  %s956_s3 = inlined_call_operand.vmem [shape: f32[128,128], index: 3, kind: output, shape index: {0}]   ;;  %s957_s4 = inlined_call_operand.vmem [shape: f32[128,128], index: 4, kind: output, shape index: {1}]  }
   0x1   :  { %v32_v0 = vld [vmem:[%s953_s1] sm:$0xff]  ;;  %v33_v1 = vld [vmem:[%s953_s1 + $0x8] sm:$0xff]  ;;  %v34_v2 = vld [vmem:[%s953_s1 + $0x10] sm:$0xff] }
   0x2   :  { %v589_v3 = vpack.c.bf16 %v33_v1, %v32_v0  ;;  %v35_v4 = vld [vmem:[%s953_s1 + $0x18] sm:$0xff]  ;;  %v36_v6 = vld [vmem:[%s953_s1 + $0x20] sm:$0xff]  ;;  %v37_v7 = vld [vmem:[%s953_s1 + $0x28] sm:$0xff]  ;;  %v370_v0 = vlaneseq }
   0x3   :  { %v593_v5 = vpack.c.bf16 %v35_v4, %v34_v2  ;;  %v597_v8 = vpack.c.bf16 %v37_v7, %v36_v6  ;;  %v16_v9 = vld [vmem:[%s954_s0] sm:$0xff]  ;;  %v38_v10 = vld [vmem:[%s953_s1 + $0x30] sm:$0xff]  ;;  %v39_v11 = vld [vmem:[%s953_s1 + $0x38] sm:$0xff] }
   0x4   :  { %590 = vmatprep.subr.bf16.mxu0 %v589_v3  ;;  %509 = vmatprep.mubr.f32.mxu0 %v16_v9  ;;  %v601_v12 = vpack.c.bf16 %v39_v11, %v38_v10  ;;  %v40_v13 = vld [vmem:[%s953_s1 + $0x40] sm:$0xff]  ;;  %v41_v14 = vld [vmem:[%s953_s1 + $0x48] sm:$0xff]  ;;  %v195_v17 = vld [vmem:[%s955_s2 + $0x10] sm:$0xff]  ;;  %v822_v1 = vand.u32 127, %v370_v0 }
   0x5   :  { %592 = vmatpush3.bf16.msra.mxu0 %v589_v3  ;;  %v193_v15 = vld [vmem:[%s955_s2] sm:$0xff]  ;;  %v194_v16 = vld [vmem:[%s955_s2 + $0x8] sm:$0xff]  ;;  %v196_v18 = vld [vmem:[%s955_s2 + $0x18] sm:$0xff]  ;;  %v605_v21 = vpack.c.bf16 %v41_v14, %v40_v13 }
   0x6   :  { %594 = vmatprep.subr.bf16.mxu0 %v593_v5  ;;  %v621_v19 = vpack.c.bf16 %v194_v16, %v193_v15  ;;  %v625_v20 = vpack.c.bf16 %v196_v18, %v195_v17  ;;  %v197_v22 = vld [vmem:[%s955_s2 + $0x20] sm:$0xff]  ;;  %v198_v23 = vld [vmem:[%s955_s2 + $0x28] sm:$0xff]  ;;  %v42_v24 = vld [vmem:[%s953_s1 + $0x50] sm:$0xff]  ;;  %vm372_vm0 = vcmp.eq.s32.totalorder %v822_v1, 127 }
   0x7   :  { %v43_v25 = vld [vmem:[%s953_s1 + $0x58] sm:$0xff]  ;;  %v629_v26 = vpack.c.bf16 %v198_v23, %v197_v22  ;;  %v199_v28 = vld [vmem:[%s955_s2 + $0x30] sm:$0xff]  ;;  %v44_v30 = vld [vmem:[%s953_s1 + $0x60] sm:$0xff] }
   0x8   :  { %622 = vmatprep.subr.bf16.mxu1 %v621_v19  ;;  %v609_v27 = vpack.c.bf16 %v43_v25, %v42_v24  ;;  %v200_v29 = vld [vmem:[%s955_s2 + $0x38] sm:$0xff]  ;;  %v45_v31 = vld [vmem:[%s953_s1 + $0x68] sm:$0xff]  ;;  %v201_v34 = vld [vmem:[%s955_s2 + $0x40] sm:$0xff] }
   0x9   :  { %596 = vmatpush3.bf16.msra.mxu0 %v593_v5  ;;  %624 = vmatpush3.bf16.msra.mxu1 %v621_v19  ;;  %v633_v32 = vpack.c.bf16 %v200_v29, %v199_v28  ;;  %v613_v33 = vpack.c.bf16 %v45_v31, %v44_v30  ;;  %v202_v35 = vld [vmem:[%s955_s2 + $0x48] sm:$0xff]  ;;  %v46_v36 = vld [vmem:[%s953_s1 + $0x70] sm:$0xff]  ;;  %v47_v37 = vld [vmem:[%s953_s1 + $0x78] sm:$0xff] }
   0xa   :  { %598 = vmatprep.subr.bf16.mxu0 %v597_v8  ;;  %626 = vmatprep.subr.bf16.mxu1 %v625_v20  ;;  %v637_v38 = vpack.c.bf16 %v202_v35, %v201_v34  ;;  %v617_v39 = vpack.c.bf16 %v47_v37, %v46_v36  ;;  %v203_v40 = vld [vmem:[%s955_s2 + $0x50] sm:$0xff]  ;;  %v204_v41 = vld [vmem:[%s955_s2 + $0x58] sm:$0xff]  ;;  %v205_v43 = vld [vmem:[%s955_s2 + $0x60] sm:$0xff] }
   0xb   :  { %v641_v42 = vpack.c.bf16 %v204_v41, %v203_v40  ;;  %v206_v44 = vld [vmem:[%s955_s2 + $0x68] sm:$0xff]  ;;  %v18_v47 = vld [vmem:[%s954_s0 + $0x10] sm:$0xff]  ;;  %v208_v49 = vld [vmem:[%s955_s2 + $0x78] sm:$0xff] }
   0xc   :  { %v17_v45 = vld [vmem:[%s954_s0 + $0x8] sm:$0xff]  ;;  %v645_v46 = vpack.c.bf16 %v206_v44, %v205_v43  ;;  %v207_v48 = vld [vmem:[%s955_s2 + $0x70] sm:$0xff]  ;;  %v19_v50 = vld [vmem:[%s954_s0 + $0x18] sm:$0xff] }
   0xd   :  { %600 = vmatpush3.bf16.msra.mxu0 %v597_v8  ;;  %628 = vmatpush3.bf16.msra.mxu1 %v625_v20  ;;  %v649_v51 = vpack.c.bf16 %v208_v49, %v207_v48  ;;  %v20_v52 = vld [vmem:[%s954_s0 + $0x20] sm:$0xff]  ;;  %v21_v53 = vld [vmem:[%s954_s0 + $0x28] sm:$0xff]  ;;  %v22_v54 = vld [vmem:[%s954_s0 + $0x30] sm:$0xff] }
   0xe   :  { %602 = vmatprep.subr.bf16.mxu0 %v601_v12  ;;  %630 = vmatprep.subr.bf16.mxu1 %v629_v26  ;;  %v23_v55 = vld [vmem:[%s954_s0 + $0x38] sm:$0xff]  ;;  %v24_v56 = vld [vmem:[%s954_s0 + $0x40] sm:$0xff]  ;;  %v25_v57 = vld [vmem:[%s954_s0 + $0x48] sm:$0xff] }
   0xf   :  { %v26_v58 = vld [vmem:[%s954_s0 + $0x50] sm:$0xff]  ;;  %v27_v59 = vld [vmem:[%s954_s0 + $0x58] sm:$0xff]  ;;  %v28_v60 = vld [vmem:[%s954_s0 + $0x60] sm:$0xff] }
  0x10   :  { %v29_v61 = vld [vmem:[%s954_s0 + $0x68] sm:$0xff]  ;;  %v30_v62 = vld [vmem:[%s954_s0 + $0x70] sm:$0xff]  ;;  %v31_v63 = vld [vmem:[%s954_s0 + $0x78] sm:$0xff] }
  0x11   :  { %604 = vmatpush3.bf16.msra.mxu0 %v601_v12  ;;  %632 = vmatpush3.bf16.msra.mxu1 %v629_v26 }
  0x12   :  { %606 = vmatprep.subr.bf16.mxu0 %v605_v21  ;;  %634 = vmatprep.subr.bf16.mxu1 %v633_v32 }
  0x15   :  { %608 = vmatpush3.bf16.msra.mxu0 %v605_v21  ;;  %636 = vmatpush3.bf16.msra.mxu1 %v633_v32 }
  0x16   :  { %610 = vmatprep.subr.bf16.mxu0 %v609_v27  ;;  %638 = vmatprep.subr.bf16.mxu1 %v637_v38 }
  0x19   :  { %612 = vmatpush3.bf16.msra.mxu0 %v609_v27  ;;  %640 = vmatpush3.bf16.msra.mxu1 %v637_v38 }
  0x1a   :  { %614 = vmatprep.subr.bf16.mxu0 %v613_v33  ;;  %642 = vmatprep.subr.bf16.mxu1 %v641_v42 }
  0x1d   :  { %616 = vmatpush3.bf16.msra.mxu0 %v613_v33  ;;  %644 = vmatpush3.bf16.msra.mxu1 %v641_v42 }
  0x1e   :  { %618 = vmatprep.subr.bf16.mxu0 %v617_v39  ;;  %646 = vmatprep.subr.bf16.mxu1 %v645_v46 }
  0x21   :  { %620 = vmatpush3.bf16.msra.mxu0 %v617_v39  ;;  %648 = vmatpush3.bf16.msra.mxu1 %v645_v46 }
  0x22   :  { %650 = vmatprep.subr.bf16.mxu1 %v649_v51 }
  0x24   :  { %510 = vmatmul.mubr.f32.vlgmr.msra.gmra.mrb[0].mxu0 %v17_v45 }
  0x25   :  { %512 = vmatprep.mubr.f32.mxu0 %v18_v47  ;;  %652 = vmatpush3.bf16.msra.mxu1 %v649_v51 }
  0x28   :  { %513 = vmatmul.mubr.f32.gmra.mrb[2].mxu0 %v19_v50 }
  0x29   :  { %515 = vmatprep.mubr.f32.mxu0 %v20_v52 }
  0x2c   :  { %516 = vmatmul.mubr.f32.gmra.mrb[4].mxu0 %v21_v53 }
  0x2d   :  { %518 = vmatprep.mubr.f32.mxu0 %v22_v54 }
  0x30   :  { %519 = vmatmul.mubr.f32.gmra.mrb[6].mxu0 %v23_v55 }
  0x31   :  { %521 = vmatprep.mubr.f32.mxu0 %v24_v56 }
  0x34   :  { %522 = vmatmul.mubr.f32.gmra.mrb[8].mxu0 %v25_v57 }
  0x35   :  { %524 = vmatprep.mubr.f32.mxu0 %v26_v58 }
  0x38   :  { %525 = vmatmul.mubr.f32.gmra.mrb[10].mxu0 %v27_v59 }
  0x39   :  { %527 = vmatprep.mubr.f32.mxu0 %v28_v60 }
  0x3c   :  { %528 = vmatmul.mubr.f32.gmra.mrb[12].mxu0 %v29_v61 }
  0x3d   :  { %530 = vmatprep.mubr.f32.mxu0 %v30_v62 }
  0x40   :  { %531 = vmatmul.mubr.f32.gmra.mrb[14].mxu0 %v31_v63 }
  0xf7   :  { %v511_v2 = vpop.f32.mrb[0].mxu0 }
  0xf8   :  { %v374_v3 = vsel %vm372_vm0, 1.0, %v511_v2  ;;  %v114_v4 = vpop.f32.mrb[1].mxu0 }
  0xf9   :  { %390 = vst [vmem:[%s956_s3 + $0x8] sm:$0xff] %v374_v3  ;;  %v373_v5 = vsel %vm372_vm0, 1.0, %v114_v4  ;;  %565 = vmatprep.mubr.f32.mxu1 %v114_v4 }
  0xfa   :  { %389 = vst [vmem:[%s956_s3] sm:$0xff] %v373_v5  ;;  %566 = vmatmul.mubr.f32.vlgmr.msra.gmra.mrb[0].mxu1 %v511_v2 }
  0xfb   :  { %v514_v6 = vpop.f32.mrb[2].mxu0 }
  0xfc   :  { %v376_v7 = vsel %vm372_vm0, 1.0, %v514_v6  ;;  %v124_v8 = vpop.f32.mrb[3].mxu0 }
  0xfd   :  { %392 = vst [vmem:[%s956_s3 + $0x18] sm:$0xff] %v376_v7  ;;  %v375_v9 = vsel %vm372_vm0, 1.0, %v124_v8  ;;  %568 = vmatprep.mubr.f32.mxu1 %v124_v8 }
  0xfe   :  { %391 = vst [vmem:[%s956_s3 + $0x10] sm:$0xff] %v375_v9  ;;  %569 = vmatmul.mubr.f32.gmra.mrb[2].mxu1 %v514_v6 }
  0xff   :  { %v517_v10 = vpop.f32.mrb[4].mxu0 }
 0x100   :  { %v378_v11 = vsel %vm372_vm0, 1.0, %v517_v10  ;;  %v134_v12 = vpop.f32.mrb[5].mxu0 }
 0x101   :  { %394 = vst [vmem:[%s956_s3 + $0x28] sm:$0xff] %v378_v11  ;;  %v377_v13 = vsel %vm372_vm0, 1.0, %v134_v12  ;;  %571 = vmatprep.mubr.f32.mxu1 %v134_v12 }
 0x102   :  { %393 = vst [vmem:[%s956_s3 + $0x20] sm:$0xff] %v377_v13  ;;  %572 = vmatmul.mubr.f32.gmra.mrb[4].mxu1 %v517_v10 }
 0x103   :  { %v520_v14 = vpop.f32.mrb[6].mxu0 }
 0x104   :  { %v380_v15 = vsel %vm372_vm0, 1.0, %v520_v14  ;;  %v144_v16 = vpop.f32.mrb[7].mxu0 }
 0x105   :  { %396 = vst [vmem:[%s956_s3 + $0x38] sm:$0xff] %v380_v15  ;;  %v379_v17 = vsel %vm372_vm0, 1.0, %v144_v16  ;;  %574 = vmatprep.mubr.f32.mxu1 %v144_v16 }
 0x106   :  { %395 = vst [vmem:[%s956_s3 + $0x30] sm:$0xff] %v379_v17  ;;  %575 = vmatmul.mubr.f32.gmra.mrb[6].mxu1 %v520_v14 }
 0x107   :  { %v523_v18 = vpop.f32.mrb[8].mxu0 }
 0x108   :  { %v382_v19 = vsel %vm372_vm0, 1.0, %v523_v18  ;;  %v154_v20 = vpop.f32.mrb[9].mxu0 }
 0x109   :  { %398 = vst [vmem:[%s956_s3 + $0x48] sm:$0xff] %v382_v19  ;;  %v381_v21 = vsel %vm372_vm0, 1.0, %v154_v20  ;;  %577 = vmatprep.mubr.f32.mxu1 %v154_v20 }
 0x10a   :  { %397 = vst [vmem:[%s956_s3 + $0x40] sm:$0xff] %v381_v21  ;;  %578 = vmatmul.mubr.f32.gmra.mrb[8].mxu1 %v523_v18 }
 0x10b   :  { %v526_v22 = vpop.f32.mrb[10].mxu0 }
 0x10c   :  { %v384_v23 = vsel %vm372_vm0, 1.0, %v526_v22  ;;  %v164_v24 = vpop.f32.mrb[11].mxu0 }
 0x10d   :  { %400 = vst [vmem:[%s956_s3 + $0x58] sm:$0xff] %v384_v23  ;;  %v383_v25 = vsel %vm372_vm0, 1.0, %v164_v24  ;;  %580 = vmatprep.mubr.f32.mxu1 %v164_v24 }
 0x10e   :  { %399 = vst [vmem:[%s956_s3 + $0x50] sm:$0xff] %v383_v25  ;;  %581 = vmatmul.mubr.f32.gmra.mrb[10].mxu1 %v526_v22 }
 0x10f   :  { %v529_v26 = vpop.f32.mrb[12].mxu0 }
 0x110   :  { %v386_v27 = vsel %vm372_vm0, 1.0, %v529_v26  ;;  %v174_v28 = vpop.f32.mrb[13].mxu0 }
 0x111   :  { %402 = vst [vmem:[%s956_s3 + $0x68] sm:$0xff] %v386_v27  ;;  %v385_v29 = vsel %vm372_vm0, 1.0, %v174_v28  ;;  %583 = vmatprep.mubr.f32.mxu1 %v174_v28 }
 0x112   :  { %401 = vst [vmem:[%s956_s3 + $0x60] sm:$0xff] %v385_v29  ;;  %584 = vmatmul.mubr.f32.gmra.mrb[12].mxu1 %v529_v26 }
 0x113   :  { %v532_v30 = vpop.f32.mrb[14].mxu0 }
 0x114   :  { %v388_v31 = vsel %vm372_vm0, 1.0, %v532_v30  ;;  %v184_v32 = vpop.f32.mrb[15].mxu0 }
 0x115   :  { %404 = vst [vmem:[%s956_s3 + $0x78] sm:$0xff] %v388_v31  ;;  %v387_v33 = vsel %vm372_vm0, 1.0, %v184_v32  ;;  %586 = vmatprep.mubr.f32.mxu1 %v184_v32 }
 0x116   :  { %403 = vst [vmem:[%s956_s3 + $0x70] sm:$0xff] %v387_v33  ;;  %587 = vmatmul.mubr.f32.gmra.mrb[14].mxu1 %v532_v30 }
 0x1cd   :  { %v567_v34 = vpop.f32.mrb[0].mxu1 }
 0x1ce   :  { %355 = vst [vmem:[%s957_s4 + $0x8] sm:$0xff] %v567_v34  ;;  %v275_v35 = vpop.f32.mrb[1].mxu1 }
 0x1cf   :  { %354 = vst [vmem:[%s957_s4] sm:$0xff] %v275_v35 }
 0x1d1   :  { %v570_v36 = vpop.f32.mrb[2].mxu1 }
 0x1d2   :  { %357 = vst [vmem:[%s957_s4 + $0x18] sm:$0xff] %v570_v36  ;;  %v285_v37 = vpop.f32.mrb[3].mxu1 }
 0x1d3   :  { %356 = vst [vmem:[%s957_s4 + $0x10] sm:$0xff] %v285_v37 }
 0x1d5   :  { %v573_v38 = vpop.f32.mrb[4].mxu1 }
 0x1d6   :  { %359 = vst [vmem:[%s957_s4 + $0x28] sm:$0xff] %v573_v38  ;;  %v295_v39 = vpop.f32.mrb[5].mxu1 }
 0x1d7   :  { %358 = vst [vmem:[%s957_s4 + $0x20] sm:$0xff] %v295_v39 }
 0x1d9   :  { %v576_v40 = vpop.f32.mrb[6].mxu1 }
 0x1da   :  { %361 = vst [vmem:[%s957_s4 + $0x38] sm:$0xff] %v576_v40  ;;  %v305_v41 = vpop.f32.mrb[7].mxu1 }
 0x1db   :  { %360 = vst [vmem:[%s957_s4 + $0x30] sm:$0xff] %v305_v41 }
 0x1dd   :  { %v579_v42 = vpop.f32.mrb[8].mxu1 }
 0x1de   :  { %363 = vst [vmem:[%s957_s4 + $0x48] sm:$0xff] %v579_v42  ;;  %v315_v43 = vpop.f32.mrb[9].mxu1 }
 0x1df   :  { %362 = vst [vmem:[%s957_s4 + $0x40] sm:$0xff] %v315_v43 }
 0x1e1   :  { %v582_v44 = vpop.f32.mrb[10].mxu1 }
 0x1e2   :  { %365 = vst [vmem:[%s957_s4 + $0x58] sm:$0xff] %v582_v44  ;;  %v325_v45 = vpop.f32.mrb[11].mxu1 }
 0x1e3   :  { %364 = vst [vmem:[%s957_s4 + $0x50] sm:$0xff] %v325_v45 }
 0x1e5   :  { %v585_v46 = vpop.f32.mrb[12].mxu1 }
 0x1e6   :  { %367 = vst [vmem:[%s957_s4 + $0x68] sm:$0xff] %v585_v46  ;;  %v335_v47 = vpop.f32.mrb[13].mxu1 }
 0x1e7   :  { %366 = vst [vmem:[%s957_s4 + $0x60] sm:$0xff] %v335_v47 }
 0x1e9   :  { %v588_v48 = vpop.f32.mrb[14].mxu1 }
 0x1ea   :  { %369 = vst [vmem:[%s957_s4 + $0x78] sm:$0xff] %v588_v48  ;;  %v345_v49 = vpop.f32.mrb[15].mxu1 }
 0x1eb   :  { %368 = vst [vmem:[%s957_s4 + $0x70] sm:$0xff] %v345_v49 }

// kernel: gat_link_pred.5
= control target key start
LH: loop header
LB: loop body
LE: loop exit
PB: predicated region body
PF: predicated region fallthrough
CT: control target
= control target key end

     0   :  { %v3003_v0 = vmov 64   ;;  %v3004_v17 = vmov 65   ;;  %v4465_v18 = vmov 66   ;;  %v4467_v19 = vmov 67   ;;  %s4459_s2 = inlined_call_operand.vmem [shape: f32[128,128], index: 2, kind: input, shape index: {}]   ;;  %s4460_s3 = inlined_call_operand.vmem [shape: s8[128,128], index: 3, kind: input, shape index: {}]   ;;  %s4461_s1 = inlined_call_operand.vmem [shape: f32[8,128], index: 1, kind: input, shape index: {}]   ;;  %s4462_s0 = inlined_call_operand.vmem [shape: f32[128,128], index: 0, kind: input, shape index: {}]   ;;  %s4463_s4 = inlined_call_operand.vmem [shape: f32[1,128], index: 4, kind: input, shape index: {}]   ;;  %s4464_s5 = inlined_call_operand.vmem [shape: f32[128,128], index: 5, kind: output, shape index: {}]  }
   0x1   :  { %2723 = vset.pattern.permute.xlu0 %v3003_v0  ;;  %2724 = vset.pattern.permute.xlu1 %v3003_v0  ;;  %v3041_v1 = vld [vmem:[%s4459_s2] sm:$0xff]  ;;  %v3046_v2 = vld [vmem:[%s4459_s2 + $0x10] sm:$0xff]  ;;  %v3053_v3 = vld [vmem:[%s4459_s2 + $0x8] sm:$0xff] }
   0x2   :  { %109 = vperm.xlu0 %2723, %v3041_v1   ;;  %119 = vperm.xlu1 %2724, %v3046_v2   ;;  %v3058_v4 = vld [vmem:[%s4459_s2 + $0x18] sm:$0xff]  ;;  %v3065_v5 = vld [vmem:[%s4459_s2 + $0x20] sm:$0xff]  ;;  %v3070_v6 = vld [vmem:[%s4459_s2 + $0x28] sm:$0xff] }
   0x3   :  { %v3077_v7 = vld [vmem:[%s4459_s2 + $0x30] sm:$0xff]  ;;  %v3082_v8 = vld [vmem:[%s4459_s2 + $0x38] sm:$0xff]  ;;  %v3089_v9 = vld [vmem:[%s4459_s2 + $0x40] sm:$0xff] }
   0x4   :  { %v3094_v10 = vld [vmem:[%s4459_s2 + $0x48] sm:$0xff]  ;;  %v3101_v11 = vld [vmem:[%s4459_s2 + $0x50] sm:$0xff]  ;;  %v3106_v12 = vld [vmem:[%s4459_s2 + $0x58] sm:$0xff] }
   0x5   :  { %v3113_v13 = vld [vmem:[%s4459_s2 + $0x60] sm:$0xff]  ;;  %v3118_v14 = vld [vmem:[%s4459_s2 + $0x68] sm:$0xff]  ;;  %v3125_v15 = vld [vmem:[%s4459_s2 + $0x70] sm:$0xff] }
   0x6   :  { %114 = vperm.xlu0 %2723, %v3053_v3   ;;  %124 = vperm.xlu1 %2724, %v3058_v4   ;;  %v3130_v16 = vld [vmem:[%s4459_s2 + $0x78] sm:$0xff]  ;;  %v20_v20 = vld [vmem:[%s4460_s3] sm:$0xff]  ;;  %v21_v21 = vld [vmem:[%s4460_s3 + $0x8] sm:$0xff] }
   0x7   :  { %v24_v22 = vunpack.c.0.s8 %v20_v20  ;;  %v25_v23 = vunpack.c.1.s8 %v20_v20  ;;  %v26_v24 = vunpack.c.2.s8 %v20_v20  ;;  %v28_v25 = vunpack.c.0.s8 %v21_v21  ;;  %v3161_v31 = vld [vmem:[%s4461_s1] ss:$0 sm:$0xff]  ;;  %v3168_v43 = vld [vmem:[%s4460_s3 + $0x10] sm:$0xff] }
   0x8   :  { %v27_v26 = vunpack.c.3.s8 %v20_v20  ;;  %v30_v33 = vunpack.c.2.s8 %v21_v21  ;;  %v29_v34 = vunpack.c.1.s8 %v21_v21  ;;  %v31_v47 = vunpack.c.3.s8 %v21_v21 }
   0x9   :  { %v40_v27 = vcvt.s32.f32 %v24_v22  ;;  %v41_v28 = vcvt.s32.f32 %v25_v23  ;;  %v42_v29 = vcvt.s32.f32 %v26_v24  ;;  %v44_v30 = vcvt.s32.f32 %v28_v25  ;;  %v335_v22 = vld [vmem:[%s4462_s0] sm:$0xff]  ;;  %v336_v23 = vld [vmem:[%s4462_s0 + $0x8] sm:$0xff] }
   0xa   :  { %129 = vperm.xlu0 %2723, %v3065_v5   ;;  %134 = vperm.xlu1 %2724, %v3070_v6   ;;  %v43_v32 = vcvt.s32.f32 %v27_v26  ;;  %v46_v45 = vcvt.s32.f32 %v30_v33  ;;  %v45_v46 = vcvt.s32.f32 %v29_v34  ;;  %v32_v56 = vunpack.c.0.s8 %v3168_v43 }
   0xb   :  { %v2217_v35 = vadd.f32 -1.0, %v40_v27  ;;  %v2218_v38 = vadd.f32 -1.0, %v41_v28  ;;  %v2219_v39 = vadd.f32 -1.0, %v42_v29  ;;  %v2221_v40 = vadd.f32 -1.0, %v44_v30 }
   0xc   :  { %v2220_v44 = vadd.f32 -1.0, %v43_v32  ;;  %v2223_v62 = vadd.f32 -1.0, %v46_v45  ;;  %v2222_v63 = vadd.f32 -1.0, %v45_v46  ;;  %v47_v0 = vcvt.s32.f32 %v31_v47  ;;  %v338_v45 = vld [vmem:[%s4462_s0 + $0x18] sm:$0xff] }
   0xd   :  { %v3170_v50 = vmul.f32 1e+30, %v2217_v35  ;;  %v3172_v53 = vmul.f32 1e+30, %v2218_v38  ;;  %v3174_v54 = vmul.f32 1e+30, %v2219_v39  ;;  %v48_v27 = vcvt.s32.f32 %v32_v56 }
   0xe   :  { %139 = vperm.xlu0 %2723, %v3077_v7   ;;  %144 = vperm.xlu1 %2724, %v3082_v8   ;;  %v3176_v55 = vmul.f32 1e+30, %v2221_v40  ;;  %v3181_v61 = vmul.f32 1e+30, %v2220_v44  ;;  %v33_v28 = vunpack.c.1.s8 %v3168_v43  ;;  %v3196_v29 = vpack.c.bf16 %v336_v23, %v335_v22  ;;  %v3209_v39 = vld [vmem:[%s4460_s3 + $0x18] sm:$0xff]  ;;  %v337_v44 = vld [vmem:[%s4462_s0 + $0x10] sm:$0xff] }
   0xf   :  { %4500 = vst [vmem:[#allocation2_spill] sm:$0xff] %v3170_v50  ;;  %v3201_v35 = vmul.f32 1e+30, %v2223_v62  ;;  %v34_v38 = vunpack.c.2.s8 %v3168_v43  ;;  %v339_v22 = vld [vmem:[%s4462_s0 + $0x20] sm:$0xff]  ;;  %v340_v23 = vld [vmem:[%s4462_s0 + $0x28] sm:$0xff] }
  0x10   :  { %2591 = vmatprep.subr.bf16.mxu0 %v3196_v29  ;;  %2623 = vmatprep.subr.bf16.mxu1 %v3196_v29 }
  0x11   :  { %2593 = vmatpush3.bf16.msra.mxu0 %v3196_v29  ;;  %2625 = vmatpush3.bf16.msra.mxu1 %v3196_v29 }
  0x12   :  { %149 = vperm.xlu0 %2723, %v3089_v9   ;;  %154 = vperm.xlu1 %2724, %v3094_v10  }
  0x16   :  { %159 = vperm.xlu0 %2723, %v3101_v11   ;;  %164 = vperm.xlu1 %2724, %v3106_v12  }
  0x1a   :  { %169 = vperm.xlu0 %2723, %v3113_v13   ;;  %174 = vperm.xlu1 %2724, %v3118_v14  }
  0x1e   :  { %179 = vperm.xlu0 %2723, %v3125_v15   ;;  %184 = vperm.xlu1 %2724, %v3130_v16  }
  0x22   :  { %2725 = vset.pattern.permute.xlu0 %v3004_v17  ;;  %2726 = vset.pattern.permute.xlu1 %v3004_v17 }
  0x23   :  { %645 = vperm.xlu0 %2725, %v3041_v1   ;;  %649 = vperm.xlu1 %2726, %v3053_v3  }
  0x27   :  { %657 = vperm.xlu0 %2725, %v3058_v4   ;;  %653 = vperm.xlu1 %2726, %v3046_v2  }
  0x2b   :  { %665 = vperm.xlu0 %2725, %v3070_v6   ;;  %661 = vperm.xlu1 %2726, %v3065_v5  }
  0x2f   :  { %673 = vperm.xlu0 %2725, %v3082_v8   ;;  %669 = vperm.xlu1 %2726, %v3077_v7  }
  0x33   :  { %681 = vperm.xlu0 %2725, %v3094_v10   ;;  %677 = vperm.xlu1 %2726, %v3089_v9  }
  0x37   :  { %689 = vperm.xlu0 %2725, %v3106_v12   ;;  %685 = vperm.xlu1 %2726, %v3101_v11  }
  0x3b   :  { %697 = vperm.xlu0 %2725, %v3118_v14   ;;  %693 = vperm.xlu1 %2726, %v3113_v13  }
  0x3f   :  { %705 = vperm.xlu0 %2725, %v3130_v16   ;;  %701 = vperm.xlu1 %2726, %v3125_v15  }
  0x43   :  { %2727 = vset.pattern.permute.xlu1 %v4465_v18  ;;  %2732 = vset.pattern.permute.xlu0 %v4467_v19 }
  0x81   :  { %v110_v36 = vpop.permute.xlu0 %109  ;;  %v120_v37 = vpop.permute.xlu1 %119 }
  0x82   :  { %v191_v41 = vadd.f32 %v3161_v31, %v110_v36  ;;  %v193_v42 = vadd.f32 %v3161_v31, %v120_v37  ;;  %v3203_v36 = vmul.f32 1e+30, %v2222_v63  ;;  %v2224_v37 = vadd.f32 -1.0, %v47_v0 }
  0x83   :  { %v50_v63 = vcvt.s32.f32 %v34_v38  ;;  %v36_v0 = vunpack.c.0.s8 %v3209_v39  ;;  %v37_v38 = vunpack.c.1.s8 %v3209_v39 }
  0x84   :  { %v207_v48 = vmul.f32 0.2, %v191_v41  ;;  %v209_v49 = vmul.f32 0.2, %v193_v42  ;;  %v3234_v62 = vmul.f32 1e+30, %v2224_v37 }
  0x85   :  { %v115_v51 = vpop.permute.xlu0 %114  ;;  %v125_v52 = vpop.permute.xlu1 %124 }
  0x86   :  { %v192_v57 = vadd.f32 %v3161_v31, %v115_v51  ;;  %v194_v58 = vadd.f32 %v3161_v31, %v125_v52  ;;  %v223_v59 = vmax.f32 %v191_v41, %v207_v48  ;;  %v225_v60 = vmax.f32 %v193_v42, %v209_v49  ;;  %4502 = vst [vmem:[#allocation4_spill] sm:$0xff] %v3234_v62 }
  0x87   :  { %v49_v49 = vcvt.s32.f32 %v33_v28  ;;  %v35_v51 = vunpack.c.3.s8 %v3168_v43  ;;  %v3228_v52 = vpack.c.bf16 %v338_v45, %v337_v44  ;;  %v2227_v44 = vadd.f32 -1.0, %v50_v63 }
  0x88   :  { %v208_v17 = vmul.f32 0.2, %v192_v57  ;;  %v210_v20 = vmul.f32 0.2, %v194_v58  ;;  %v3184_v21 = vadd.f32 %v223_v59, %v3170_v50  ;;  %v3193_v26 = vadd.f32 %v225_v60, %v3174_v54 }
  0x89   :  { %v130_v24 = vpop.permute.xlu0 %129  ;;  %v135_v25 = vpop.permute.xlu1 %134  ;;  %4501 = vst [vmem:[#allocation3_spill] sm:$0xff] %v3228_v52  ;;  %v2225_v59 = vadd.f32 -1.0, %v48_v27  ;;  %2595 = vmatprep.subr.bf16.mxu0 %v3228_v52  ;;  %2627 = vmatprep.subr.bf16.mxu1 %v3228_v52  ;;  %v2226_v28 = vadd.f32 -1.0, %v49_v49  ;;  %v52_v45 = vcvt.s32.f32 %v36_v0 }
  0x8a   :  { %v195_v30 = vadd.f32 %v3161_v31, %v130_v24  ;;  %v196_v32 = vadd.f32 %v3161_v31, %v135_v25  ;;  %255 = vmax.xlane.f32.xlu0 %v3184_v21  ;;  %v224_v33 = vmax.f32 %v192_v57, %v208_v17  ;;  %v226_v34 = vmax.f32 %v194_v58, %v210_v20 }
  0x8b   :  { %2597 = vmatpush3.bf16.msra.mxu0 %v3228_v52  ;;  %2629 = vmatpush3.bf16.msra.mxu1 %v3228_v52  ;;  %v3279_v63 = vmul.f32 1e+30, %v2226_v28  ;;  %v39_v28 = vunpack.c.3.s8 %v3209_v39 }
  0x8c   :  { %v211_v40 = vmul.f32 0.2, %v195_v30  ;;  %v212_v41 = vmul.f32 0.2, %v196_v32  ;;  %v3214_v42 = vadd.f32 %v224_v33, %v3172_v53  ;;  %v3225_v48 = vadd.f32 %v226_v34, %v3181_v61 }
  0x8d   :  { %v140_v46 = vpop.permute.xlu0 %139  ;;  %v145_v47 = vpop.permute.xlu1 %144 }
  0x8e   :  { %v197_v56 = vadd.f32 %v3161_v31, %v140_v46  ;;  %v198_v57 = vadd.f32 %v3161_v31, %v145_v47  ;;  %257 = vmax.xlane.f32.xlu1 %v3214_v42  ;;  %259 = vmax.xlane.f32.xlu0 %v3193_v26  ;;  %v227_v58 = vmax.f32 %v195_v30, %v211_v40  ;;  %v51_v30 = vcvt.s32.f32 %v35_v51 }
  0x8f   :  { %v228_v60 = vmax.f32 %v196_v32, %v212_v41  ;;  %v3253_v32 = vpack.c.bf16 %v340_v23, %v339_v22  ;;  %v3260_v40 = vmul.f32 1e+30, %v2225_v59  ;;  %v38_v51 = vunpack.c.2.s8 %v3209_v39 }
  0x90   :  { %v213_v43 = vmul.f32 0.2, %v197_v56  ;;  %v214_v17 = vmul.f32 0.2, %v198_v57  ;;  %v3240_v20 = vadd.f32 %v227_v58, %v3176_v55  ;;  %v2228_v0 = vadd.f32 -1.0, %v51_v30 }
  0x91   :  { %v150_v24 = vpop.permute.xlu0 %149  ;;  %v155_v25 = vpop.permute.xlu1 %154  ;;  %v3251_v27 = vadd.f32 %v228_v60, %v3203_v36  ;;  %4503 = vst [vmem:[#allocation5_spill] sm:$0xff] %v3253_v32  ;;  %2599 = vmatprep.subr.bf16.mxu0 %v3253_v32  ;;  %2631 = vmatprep.subr.bf16.mxu1 %v3253_v32 }
  0x92   :  { %v199_v33 = vadd.f32 %v3161_v31, %v150_v24  ;;  %v200_v34 = vadd.f32 %v3161_v31, %v155_v25  ;;  %263 = vmax.xlane.f32.xlu1 %v3240_v20  ;;  %261 = vmax.xlane.f32.xlu0 %v3225_v48  ;;  %v229_v37 = vmax.f32 %v197_v56, %v213_v43  ;;  %v341_v56 = vld [vmem:[%s4462_s0 + $0x30] sm:$0xff]  ;;  %v53_v24 = vcvt.s32.f32 %v37_v38 }
  0x93   :  { %v230_v41 = vmax.f32 %v198_v57, %v214_v17  ;;  %2601 = vmatpush3.bf16.msra.mxu0 %v3253_v32  ;;  %v342_v57 = vld [vmem:[%s4462_s0 + $0x38] sm:$0xff]  ;;  %2633 = vmatpush3.bf16.msra.mxu1 %v3253_v32  ;;  %v3287_v25 = vmul.f32 1e+30, %v2227_v44  ;;  %v3300_v39 = vmul.f32 1e+30, %v2228_v0  ;;  %v343_v44 = vld [vmem:[%s4462_s0 + $0x40] sm:$0xff] }
  0x94   :  { %v215_v46 = vmul.f32 0.2, %v199_v33  ;;  %v216_v47 = vmul.f32 0.2, %v200_v34  ;;  %v3265_v49 = vadd.f32 %v229_v37, %v3201_v35  ;;  %v3281_v43 = vpack.c.bf16 %v342_v57, %v341_v56 }
  0x95   :  { %v160_v58 = vpop.permute.xlu0 %159  ;;  %v165_v59 = vpop.permute.xlu1 %164  ;;  %v3277_v60 = vadd.f32 %v230_v41, %v3234_v62  ;;  %4505 = vst [vmem:[#allocation7_spill] sm:$0xff] %v3287_v25  ;;  %v2229_v41 = vadd.f32 -1.0, %v52_v45  ;;  %v344_v45 = vld [vmem:[%s4462_s0 + $0x48] sm:$0xff] }
  0x96   :  { %4504 = vst [vmem:[#allocation6_spill] sm:$0xff] %v3281_v43  ;;  %v201_v17 = vadd.f32 %v3161_v31, %v160_v58  ;;  %v202_v22 = vadd.f32 %v3161_v31, %v165_v59  ;;  %267 = vmax.xlane.f32.xlu1 %v3265_v49  ;;  %265 = vmax.xlane.f32.xlu0 %v3251_v27  ;;  %v54_v58 = vcvt.s32.f32 %v38_v51  ;;  %v2230_v59 = vadd.f32 -1.0, %v53_v24 }
  0x97   :  { %v231_v23 = vmax.f32 %v199_v33, %v215_v46  ;;  %v232_v37 = vmax.f32 %v200_v34, %v216_v47  ;;  %2603 = vmatprep.subr.bf16.mxu0 %v3281_v43  ;;  %2635 = vmatprep.subr.bf16.mxu1 %v3281_v43  ;;  %v3312_v0 = vmul.f32 1e+30, %v2229_v41  ;;  %v3314_v18 = vpack.c.bf16 %v344_v45, %v343_v44 }
  0x98   :  { %v217_v30 = vmul.f32 0.2, %v201_v17  ;;  %v218_v56 = vmul.f32 0.2, %v202_v22  ;;  %2605 = vmatpush3.bf16.msra.mxu0 %v3281_v43  ;;  %2637 = vmatpush3.bf16.msra.mxu1 %v3281_v43 }
  0x99   :  { %v3293_v57 = vadd.f32 %v231_v23, %v3260_v40  ;;  %v170_v33 = vpop.permute.xlu0 %169  ;;  %v175_v38 = vpop.permute.xlu1 %174  ;;  %v3298_v34 = vadd.f32 %v232_v37, %v3279_v63  ;;  %4506 = vst [vmem:[#allocation8_spill] sm:$0xff] %v3312_v0  ;;  %v55_v37 = vcvt.s32.f32 %v39_v28  ;;  %2607 = vmatprep.subr.bf16.mxu0 %v3314_v18  ;;  %2639 = vmatprep.subr.bf16.mxu1 %v3314_v18 }
  0x9a   :  { %v203_v46 = vadd.f32 %v3161_v31, %v170_v33  ;;  %v204_v47 = vadd.f32 %v3161_v31, %v175_v38  ;;  %269 = vmax.xlane.f32.xlu0 %v3277_v60  ;;  %v233_v51 = vmax.f32 %v201_v17, %v217_v30  ;;  %v234_v23 = vmax.f32 %v202_v22, %v218_v56  ;;  %v345_v17 = vld [vmem:[%s4462_s0 + $0x50] sm:$0xff]  ;;  %v346_v22 = vld [vmem:[%s4462_s0 + $0x58] sm:$0xff]  ;;  %v3339_v56 = vld [vmem:[%s4461_s1 + $0x1] ss:$0 sm:$0xff] }
  0x9b   :  { %271 = vmax.xlane.f32.xlu1 %v3293_v57  ;;  %v2231_v33 = vadd.f32 -1.0, %v54_v58  ;;  %v3334_v30 = vmul.f32 1e+30, %v2230_v59  ;;  %v2232_v44 = vadd.f32 -1.0, %v55_v37  ;;  %v3342_v45 = vpack.c.bf16 %v346_v22, %v345_v17 }
  0x9c   :  { %v219_v19 = vmul.f32 0.2, %v203_v46  ;;  %v220_v62 = vmul.f32 0.2, %v204_v47  ;;  %v3317_v43 = vadd.f32 %v233_v51, %v3287_v25  ;;  %v3320_v52 = vadd.f32 %v234_v23, %v3300_v39  ;;  %2609 = vmatpush3.bf16.msra.mxu0 %v3314_v18  ;;  %2641 = vmatpush3.bf16.msra.mxu1 %v3314_v18 }
  0x9d   :  { %v180_v32 = vpop.permute.xlu0 %179  ;;  %v185_v38 = vpop.permute.xlu1 %184  ;;  %4507 = vst [vmem:[#allocation9_spill] sm:$0xff] %v3342_v45  ;;  %2611 = vmatprep.subr.bf16.mxu0 %v3342_v45  ;;  %2643 = vmatprep.subr.bf16.mxu1 %v3342_v45 }
  0x9e   :  { %v205_v24 = vadd.f32 %v3161_v31, %v180_v32  ;;  %v206_v41 = vadd.f32 %v3161_v31, %v185_v38  ;;  %273 = vmax.xlane.f32.xlu0 %v3298_v34  ;;  %v235_v28 = vmax.f32 %v203_v46, %v219_v19  ;;  %v236_v58 = vmax.f32 %v204_v47, %v220_v62  ;;  %v347_v62 = vld [vmem:[%s4462_s0 + $0x60] sm:$0xff]  ;;  %v348_v46 = vld [vmem:[%s4462_s0 + $0x68] sm:$0xff] }
  0x9f   :  { %275 = vmax.xlane.f32.xlu1 %v3317_v43  ;;  %v3348_v19 = vmul.f32 1e+30, %v2231_v33  ;;  %v3363_v33 = vpack.c.bf16 %v348_v46, %v347_v62  ;;  %v350_v62 = vld [vmem:[%s4462_s0 + $0x78] sm:$0xff] }
  0xa0   :  { %v221_v31 = vmul.f32 0.2, %v205_v24  ;;  %v222_v32 = vmul.f32 0.2, %v206_v41  ;;  %v3346_v51 = vadd.f32 %v235_v28, %v3312_v0  ;;  %v3361_v37 = vadd.f32 %v236_v58, %v3334_v30  ;;  %2613 = vmatpush3.bf16.msra.mxu0 %v3342_v45  ;;  %2645 = vmatpush3.bf16.msra.mxu1 %v3342_v45 }
  0xa1   :  { %4508 = vst [vmem:[#allocation10_spill] sm:$0xff] %v3348_v19  ;;  %v3372_v28 = vmul.f32 1e+30, %v2232_v44  ;;  %2615 = vmatprep.subr.bf16.mxu0 %v3363_v33  ;;  %2647 = vmatprep.subr.bf16.mxu1 %v3363_v33 }
  0xa2   :  { %v646_v47 = vpop.permute.xlu0 %645  ;;  %277 = vmax.xlane.f32.xlu0 %v3320_v52  ;;  %v650_v59 = vpop.permute.xlu1 %649  ;;  %v237_v23 = vmax.f32 %v205_v24, %v221_v31  ;;  %v238_v0 = vmax.f32 %v206_v41, %v222_v32  ;;  %v349_v31 = vld [vmem:[%s4462_s0 + $0x70] sm:$0xff] }
  0xa3   :  { %279 = vmax.xlane.f32.xlu1 %v3346_v51  ;;  %v712_v38 = vadd.f32 %v3339_v56, %v646_v47  ;;  %v713_v17 = vadd.f32 %v3339_v56, %v650_v59  ;;  %v3384_v44 = vpack.c.bf16 %v350_v62, %v349_v31 }
  0xa4   :  { %v3370_v22 = vadd.f32 %v237_v23, %v3348_v19  ;;  %2617 = vmatpush3.bf16.msra.mxu0 %v3363_v33  ;;  %v3390_v19 = vadd.f32 %v238_v0, %v3372_v28  ;;  %2649 = vmatpush3.bf16.msra.mxu1 %v3363_v33 }
  0xa5   :  { %v728_v24 = vmul.f32 0.2, %v712_v38  ;;  %v729_v58 = vmul.f32 0.2, %v713_v17  ;;  %2619 = vmatprep.subr.bf16.mxu0 %v3384_v44  ;;  %2651 = vmatprep.subr.bf16.mxu1 %v3384_v44 }
  0xa6   :  { %v658_v46 = vpop.permute.xlu0 %657  ;;  %281 = vmax.xlane.f32.xlu0 %v3361_v37  ;;  %v654_v41 = vpop.permute.xlu1 %653 }
  0xa7   :  { %283 = vmax.xlane.f32.xlu1 %v3370_v22  ;;  %v715_v32 = vadd.f32 %v3339_v56, %v658_v46  ;;  %v714_v47 = vadd.f32 %v3339_v56, %v654_v41  ;;  %v744_v59 = vmax.f32 %v712_v38, %v728_v24  ;;  %v745_v23 = vmax.f32 %v713_v17, %v729_v58 }
  0xa8   :  { %2621 = vmatpush3.bf16.msra.mxu0 %v3384_v44  ;;  %2653 = vmatpush3.bf16.msra.mxu1 %v3384_v44 }
  0xa9   :  { %v731_v25 = vmul.f32 0.2, %v715_v32  ;;  %v730_v45 = vmul.f32 0.2, %v714_v47  ;;  %v3395_v31 = vadd.f32 %v744_v59, %v3170_v50  ;;  %v3400_v17 = vadd.f32 %v745_v23, %v3172_v53  ;;  %2655 = vmatprep.subr.bf16.mxu0 %v3196_v29  ;;  %2687 = vmatprep.subr.bf16.mxu1 %v3196_v29 }
  0xaa   :  { %v666_v62 = vpop.permute.xlu0 %665  ;;  %285 = vmax.xlane.f32.xlu0 %v3390_v19  ;;  %v662_v38 = vpop.permute.xlu1 %661 }
  0xab   :  { %v717_v0 = vadd.f32 %v3339_v56, %v666_v62  ;;  %v716_v24 = vadd.f32 %v3339_v56, %v662_v38  ;;  %776 = vmax.xlane.f32.xlu1 %v3395_v31  ;;  %v747_v58 = vmax.f32 %v715_v32, %v731_v25  ;;  %v746_v46 = vmax.f32 %v714_v47, %v730_v45 }
  0xac   :  { %v4509_v62 = vmov 67   ;;  %v4510_v38 = vmov 66  }
  0xad   :  { %v733_v41 = vmul.f32 0.2, %v717_v0  ;;  %v732_v59 = vmul.f32 0.2, %v716_v24  ;;  %v3408_v50 = vadd.f32 %v747_v58, %v3181_v61  ;;  %v3414_v23 = vadd.f32 %v746_v46, %v3174_v54 }
  0xae   :  { %778 = vmax.xlane.f32.xlu0 %v3400_v17 }
  0xaf   :  { %782 = vmax.xlane.f32.xlu1 %v3408_v50  ;;  %v749_v25 = vmax.f32 %v717_v0, %v733_v41  ;;  %v748_v45 = vmax.f32 %v716_v24, %v732_v59 }
  0xb1   :  { %v3418_v32 = vadd.f32 %v749_v25, %v3203_v36  ;;  %v3422_v47 = vadd.f32 %v748_v45, %v3176_v55 }
  0xb2   :  { %780 = vmax.xlane.f32.xlu0 %v3414_v23 }
  0xb3   :  { %786 = vmax.xlane.f32.xlu1 %v3418_v32 }
  0xb6   :  { %784 = vmax.xlane.f32.xlu0 %v3422_v47 }
  0xc4   :  { %1154 = vperm.xlu1 %2727, %v3053_v3  }
  0xc8   :  { %2728 = vset.pattern.permute.xlu1 %v4509_v62 }
  0xc9   :  { %1655 = vperm.xlu1 %2728, %v3041_v1  }
  0xcc   :  { %1671 = vperm.xlu0 %2732, %v3065_v5  }
  0xcd   :  { %1659 = vperm.xlu1 %2728, %v3053_v3  }
  0xd0   :  { %1687 = vperm.xlu0 %2732, %v3089_v9  }
  0xd1   :  { %2729 = vset.pattern.permute.xlu1 %v4510_v38 }
  0xd2   :  { %1158 = vperm.xlu1 %2729, %v3046_v2  }
  0xd4   :  { %1703 = vperm.xlu0 %2732, %v3113_v13  }
  0xd6   :  { %1162 = vperm.xlu1 %2729, %v3058_v4  }
  0xd8   :  { %2741 = vset.pattern.permute.xlu0 %v4510_v38 }
  0xd9   :  { %1150 = vperm.xlu0 %2741, %v3041_v1   ;;  %v3456_v1 = vpop.permute.xlu0 %673 }
  0xda   :  { %2730 = vset.pattern.permute.xlu1 %v4509_v62 }
  0xdb   :  { %1663 = vperm.xlu1 %2730, %v3046_v2   ;;  %v670_v2 = vpop.permute.xlu1 %669 }
  0xdd   :  { %1166 = vperm.xlu0 %2741, %v3065_v5   ;;  %v682_v3 = vpop.permute.xlu0 %681 }
  0xdf   :  { %1667 = vperm.xlu1 %2730, %v3058_v4   ;;  %v718_v4 = vadd.f32 %v3339_v56, %v670_v2  ;;  %v678_v5 = vpop.permute.xlu1 %677 }
  0xe1   :  { %1178 = vperm.xlu0 %2741, %v3082_v8  }
  0xe3   :  { %2731 = vset.pattern.permute.xlu1 %v4510_v38  ;;  %v3468_v24 = vpop.permute.xlu1 %685 }
  0xe4   :  { %1170 = vperm.xlu1 %2731, %v3070_v6  }
  0xe5   :  { %1182 = vperm.xlu0 %2741, %v3089_v9   ;;  %v721_v9 = vadd.f32 %v3339_v56, %v682_v3 }
  0xe7   :  { %v737_v58 = vmul.f32 0.2, %v721_v9  ;;  %v3477_v25 = vpop.permute.xlu1 %693 }
  0xe8   :  { %2733 = vset.pattern.permute.xlu1 %v4509_v62 }
  0xe9   :  { %1675 = vperm.xlu1 %2733, %v3070_v6   ;;  %1194 = vperm.xlu0 %2741, %v3106_v12   ;;  %v734_v6 = vmul.f32 0.2, %v718_v4 }
  0xeb   :  { %v750_v0 = vmax.f32 %v718_v4, %v734_v6 }
  0xed   :  { %2734 = vset.pattern.permute.xlu1 %v4510_v38  ;;  %1198 = vperm.xlu0 %2741, %v3113_v13   ;;  %v3473_v41 = vadd.f32 %v750_v0, %v3201_v35 }
  0xee   :  { %1174 = vperm.xlu1 %2734, %v3077_v7  }
  0xf1   :  { %1210 = vperm.xlu0 %2741, %v3130_v16  }
  0xf2   :  { %2735 = vset.pattern.permute.xlu1 %v4509_v62 }
  0xf3   :  { %1679 = vperm.xlu1 %2735, %v3077_v7   ;;  %v720_v7 = vadd.f32 %v3339_v56, %v678_v5 }
  0xf5   :  { %v736_v13 = vmul.f32 0.2, %v720_v7 }
  0xf7   :  { %1683 = vperm.xlu1 %2735, %v3082_v8   ;;  %v690_v8 = vpop.permute.xlu0 %689  ;;  %v752_v59 = vmax.f32 %v720_v7, %v736_v13 }
  0xf8   :  { %v723_v46 = vadd.f32 %v3339_v56, %v690_v8  ;;  %v3490_v8 = vpop.permute.xlu1 %701 }
  0xf9   :  { %v3481_v3 = vadd.f32 %v752_v59, %v3260_v40 }
  0xfa   :  { %v739_v45 = vmul.f32 0.2, %v723_v46 }
  0xfb   :  { %2736 = vset.pattern.permute.xlu1 %v4510_v38 }
  0xfc   :  { %1186 = vperm.xlu1 %2736, %v3094_v10   ;;  %v755_v7 = vmax.f32 %v723_v46, %v739_v45 }
 0x100   :  { %2737 = vset.pattern.permute.xlu1 %v4509_v62 }
 0x101   :  { %1691 = vperm.xlu1 %2737, %v3094_v10   ;;  %v698_v10 = vpop.permute.xlu0 %697 }
 0x102   :  { %v725_v2 = vadd.f32 %v3339_v56, %v698_v10 }
 0x104   :  { %v741_v5 = vmul.f32 0.2, %v725_v2 }
 0x105   :  { %2738 = vset.pattern.permute.xlu1 %v4510_v38  ;;  %v706_v4 = vpop.permute.xlu0 %705 }
 0x106   :  { %1190 = vperm.xlu1 %2738, %v3101_v11   ;;  %v757_v59 = vmax.f32 %v725_v2, %v741_v5 }
 0x10a   :  { %2739 = vset.pattern.permute.xlu1 %v4509_v62 }
 0x10b   :  { %1695 = vperm.xlu1 %2739, %v3101_v11   ;;  %v753_v11 = vmax.f32 %v721_v9, %v737_v58  ;;  %v3497_v58 = vadd.f32 %v755_v7, %v3300_v39 }
 0x10d   :  { %v3488_v6 = vadd.f32 %v753_v11, %v3279_v63 }
 0x10f   :  { %1699 = vperm.xlu1 %2739, %v3106_v12   ;;  %v727_v12 = vadd.f32 %v3339_v56, %v706_v4 }
 0x110   :  { %788 = vmax.xlane.f32.xlu0 %v3473_v41 }
 0x111   :  { %v743_v9 = vmul.f32 0.2, %v727_v12 }
 0x113   :  { %2740 = vset.pattern.permute.xlu1 %v4510_v38  ;;  %v759_v7 = vmax.f32 %v727_v12, %v743_v9 }
 0x114   :  { %1202 = vperm.xlu1 %2740, %v3118_v14   ;;  %792 = vmax.xlane.f32.xlu0 %v3481_v3 }
 0x117   :  { %v256_v13 = vpop.xlane.xlu0 %255 }
 0x118   :  { %v287_v0 = vsub.f32 %v3184_v21, %v256_v13  ;;  %2742 = vset.pattern.permute.xlu1 %v4509_v62  ;;  %794 = vmax.xlane.f32.xlu0 %v3488_v6 }
 0x119   :  { %1707 = vperm.xlu1 %2742, %v3118_v14   ;;  %v3505_v14 = vadd.f32 %v757_v59, %v3334_v30 }
 0x11a   :  { %v303_v10 = vmul.f32 1.442695, %v287_v0 }
 0x11b   :  { %v258_v11 = vpop.xlane.xlu1 %257  ;;  %v260_v4 = vpop.xlane.xlu0 %259 }
 0x11c   :  { %v288_v46 = vsub.f32 %v3214_v42, %v258_v11  ;;  %v289_v45 = vsub.f32 %v3193_v26, %v260_v4  ;;  %798 = vmax.xlane.f32.xlu0 %v3497_v58  ;;  %2747 = vpow2.f32 %v303_v10  ;;  %v3512_v10 = vadd.f32 %v759_v7, %v3372_v28 }
 0x11d   :  { %2743 = vset.pattern.permute.xlu1 %v4510_v38 }
 0x11e   :  { %v305_v21 = vmul.f32 1.442695, %v288_v46  ;;  %v307_v13 = vmul.f32 1.442695, %v289_v45  ;;  %1206 = vperm.xlu1 %2743, %v3125_v15  }
 0x11f   :  { %v264_v2 = vpop.xlane.xlu1 %263  ;;  %v262_v5 = vpop.xlane.xlu0 %261 }
 0x120   :  { %2749 = vpow2.f32 %v305_v21  ;;  %v291_v42 = vsub.f32 %v3240_v20, %v264_v2  ;;  %v290_v26 = vsub.f32 %v3225_v48, %v262_v5  ;;  %802 = vmax.xlane.f32.xlu0 %v3505_v14 }
 0x121   :  { %2751 = vpow2.f32 %v307_v13 }
 0x122   :  { %v311_v0 = vmul.f32 1.442695, %v291_v42  ;;  %v309_v38 = vmul.f32 1.442695, %v290_v26  ;;  %2744 = vset.pattern.permute.xlu1 %v4509_v62 }
 0x123   :  { %1711 = vperm.xlu1 %2744, %v3125_v15   ;;  %v268_v12 = vpop.xlane.xlu1 %267  ;;  %v266_v9 = vpop.xlane.xlu0 %265 }
 0x124   :  { %2753 = vpow2.f32 %v311_v0  ;;  %v293_v59 = vsub.f32 %v3265_v49, %v268_v12  ;;  %v292_v20 = vsub.f32 %v3251_v27, %v266_v9  ;;  %806 = vmax.xlane.f32.xlu0 %v3512_v10 }
 0x125   :  { %2755 = vpow2.f32 %v309_v38 }
 0x126   :  { %v2748_v48 = vpop.eup %2747  ;;  %v315_v11 = vmul.f32 1.442695, %v293_v59  ;;  %v313_v4 = vmul.f32 1.442695, %v292_v20 }
 0x127   :  { %1715 = vperm.xlu1 %2744, %v3130_v16   ;;  %2398 = vmatprep.mubr.f32.mxu0 %v2748_v48  ;;  %v270_v46 = vpop.xlane.xlu0 %269  ;;  %v4512_v48 = vld [vmem:[#allocation5_spill] sm:$0xff] }
 0x128   :  { %v272_v62 = vpop.xlane.xlu1 %271  ;;  %2757 = vpow2.f32 %v315_v11  ;;  %v294_v45 = vsub.f32 %v3277_v60, %v270_v46 }
 0x129   :  { %v295_v15 = vsub.f32 %v3293_v57, %v272_v62  ;;  %2759 = vpow2.f32 %v313_v4  ;;  %v4511_v57 = vld [vmem:[#allocation3_spill] sm:$0xff] }
 0x12a   :  { %v2750_v49 = vpop.eup %2749  ;;  %v317_v27 = vmul.f32 1.442695, %v294_v45 }
 0x12b   :  { %v319_v21 = vmul.f32 1.442695, %v295_v15  ;;  %v2752_v13 = vpop.eup %2751  ;;  %v274_v2 = vpop.xlane.xlu0 %273  ;;  %2399 = vmatmul.mubr.f32.vlgmr.msra.gmra.mrb[0].mxu0 %v2750_v49  ;;  %v4513_v49 = vld [vmem:[#allocation6_spill] sm:$0xff] }
 0x12c   :  { %v276_v7 = vpop.xlane.xlu1 %275  ;;  %v296_v16 = vsub.f32 %v3298_v34, %v274_v2  ;;  %2401 = vmatprep.mubr.f32.mxu0 %v2752_v13  ;;  %2657 = vmatpush3.bf16.msra.mxu0 %v3196_v29 }
 0x12d   :  { %2761 = vpow2.f32 %v319_v21  ;;  %v297_v5 = vsub.f32 %v3317_v43, %v276_v7  ;;  %2659 = vmatprep.subr.bf16.mxu0 %v4511_v57 }
 0x12e   :  { %2763 = vpow2.f32 %v317_v27  ;;  %v2754_v60 = vpop.eup %2753  ;;  %v321_v26 = vmul.f32 1.442695, %v296_v16 }
 0x12f   :  { %v323_v42 = vmul.f32 1.442695, %v297_v5  ;;  %v2756_v0 = vpop.eup %2755  ;;  %v278_v12 = vpop.xlane.xlu0 %277 }
 0x130   :  { %v280_v38 = vpop.xlane.xlu1 %279  ;;  %v298_v59 = vsub.f32 %v3320_v52, %v278_v12  ;;  %2402 = vmatmul.mubr.f32.gmra.mrb[2].mxu0 %v2756_v0  ;;  %v4514_v12 = vld [vmem:[#allocation9_spill] sm:$0xff] }
 0x131   :  { %2765 = vpow2.f32 %v323_v42  ;;  %v299_v9 = vsub.f32 %v3346_v51, %v280_v38  ;;  %2404 = vmatprep.mubr.f32.mxu0 %v2754_v60  ;;  %2661 = vmatpush3.bf16.msra.mxu0 %v4511_v57  ;;  %v719_v42 = vadd.f32 %v3339_v56, %v3456_v1  ;;  %v722_v1 = vadd.f32 %v3339_v56, %v3468_v24 }
 0x132   :  { %2767 = vpow2.f32 %v321_v26  ;;  %v2758_v43 = vpop.eup %2757  ;;  %v325_v20 = vmul.f32 1.442695, %v298_v59  ;;  %2663 = vmatprep.subr.bf16.mxu0 %v4512_v48 }
 0x133   :  { %v327_v34 = vmul.f32 1.442695, %v299_v9  ;;  %v2760_v11 = vpop.eup %2759  ;;  %v282_v62 = vpop.xlane.xlu0 %281 }
 0x134   :  { %v284_v4 = vpop.xlane.xlu1 %283  ;;  %v300_v51 = vsub.f32 %v3361_v37, %v282_v62  ;;  %2405 = vmatmul.mubr.f32.gmra.mrb[4].mxu0 %v2760_v11  ;;  %v3551_v62 = vld [vmem:[%s4461_s1 + $0x2] ss:$0 sm:$0xff] }
 0x135   :  { %2769 = vpow2.f32 %v327_v34  ;;  %v301_v46 = vsub.f32 %v3370_v22, %v284_v4  ;;  %2407 = vmatprep.mubr.f32.mxu0 %v2758_v43  ;;  %2665 = vmatpush3.bf16.msra.mxu0 %v4512_v48  ;;  %v735_v43 = vmul.f32 0.2, %v719_v42 }
 0x136   :  { %2771 = vpow2.f32 %v325_v20  ;;  %v329_v45 = vmul.f32 1.442695, %v300_v51  ;;  %2667 = vmatprep.subr.bf16.mxu0 %v4513_v49 }
 0x137   :  { %v2762_v52 = vpop.eup %2761  ;;  %v331_v15 = vmul.f32 1.442695, %v301_v46  ;;  %v286_v27 = vpop.xlane.xlu0 %285 }
 0x138   :  { %v2764_v21 = vpop.eup %2763  ;;  %v302_v13 = vsub.f32 %v3390_v19, %v286_v27  ;;  %v777_v7 = vpop.xlane.xlu1 %776 }
 0x139   :  { %2773 = vpow2.f32 %v331_v15  ;;  %2408 = vmatmul.mubr.f32.gmra.mrb[6].mxu0 %v2764_v21  ;;  %v808_v37 = vsub.f32 %v3395_v31, %v777_v7  ;;  %v724_v15 = vadd.f32 %v3339_v56, %v3477_v25 }
 0x13a   :  { %2775 = vpow2.f32 %v329_v45  ;;  %2410 = vmatprep.mubr.f32.mxu0 %v2762_v52  ;;  %2669 = vmatpush3.bf16.msra.mxu0 %v4513_v49  ;;  %v333_v2 = vmul.f32 1.442695, %v302_v13  ;;  %v751_v52 = vmax.f32 %v719_v42, %v735_v43 }
 0x13b   :  { %v2766_v22 = vpop.eup %2765  ;;  %2671 = vmatprep.subr.bf16.mxu0 %v3314_v18  ;;  %v824_v16 = vmul.f32 1.442695, %v808_v37  ;;  %v779_v60 = vpop.xlane.xlu0 %778 }
 0x13c   :  { %v2768_v5 = vpop.eup %2767  ;;  %2777 = vpow2.f32 %v333_v2  ;;  %v809_v19 = vsub.f32 %v3400_v17, %v779_v60  ;;  %v783_v26 = vpop.xlane.xlu1 %782  ;;  %v4515_v2 = vld [vmem:[#allocation4_spill] sm:$0xff] }
 0x13d   :  { %2411 = vmatmul.mubr.f32.gmra.mrb[8].mxu0 %v2768_v5  ;;  %v811_v31 = vsub.f32 %v3408_v50, %v783_v26  ;;  %2779 = vpow2.f32 %v824_v16  ;;  %v3561_v25 = vadd.f32 %v751_v52, %v4515_v2  ;;  %v740_v5 = vmul.f32 0.2, %v724_v15  ;;  %v4518_v52 = vld [vmem:[#allocation10_spill] sm:$0xff] }
 0x13e   :  { %2413 = vmatprep.mubr.f32.mxu0 %v2766_v22  ;;  %2673 = vmatpush3.bf16.msra.mxu0 %v3314_v18  ;;  %v826_v38 = vmul.f32 1.442695, %v809_v19  ;;  %v726_v16 = vadd.f32 %v3339_v56, %v3490_v8 }
 0x13f   :  { %v2770_v0 = vpop.eup %2769  ;;  %2675 = vmatprep.subr.bf16.mxu0 %v4514_v12  ;;  %v781_v59 = vpop.xlane.xlu0 %780  ;;  %v830_v50 = vmul.f32 1.442695, %v811_v31  ;;  %v3575_v31 = vld [vmem:[%s4461_s1 + $0x3] ss:$0 sm:$0xff]  ;;  %v756_v56 = vmax.f32 %v724_v15, %v740_v5 }
 0x140   :  { %v2772_v9 = vpop.eup %2771  ;;  %2781 = vpow2.f32 %v826_v38  ;;  %v810_v17 = vsub.f32 %v3414_v23, %v781_v59  ;;  %v787_v34 = vpop.xlane.xlu1 %786  ;;  %v738_v23 = vmul.f32 0.2, %v722_v1  ;;  %v742_v8 = vmul.f32 0.2, %v726_v16 }
 0x141   :  { %2414 = vmatmul.mubr.f32.gmra.mrb[10].mxu0 %v2772_v9  ;;  %v813_v20 = vsub.f32 %v3418_v32, %v787_v34  ;;  %v4516_v9 = vld [vmem:[#allocation7_spill] sm:$0xff] }
 0x142   :  { %2416 = vmatprep.mubr.f32.mxu0 %v2770_v0  ;;  %2677 = vmatpush3.bf16.msra.mxu0 %v4514_v12  ;;  %v828_v4 = vmul.f32 1.442695, %v810_v17 }
 0x143   :  { %v2774_v11 = vpop.eup %2773  ;;  %2679 = vmatprep.subr.bf16.mxu0 %v3363_v33  ;;  %v785_v46 = vpop.xlane.xlu0 %784  ;;  %v834_v45 = vmul.f32 1.442695, %v813_v20  ;;  %v4517_v20 = vld [vmem:[#allocation8_spill] sm:$0xff] }
 0x144   :  { %v2776_v24 = vpop.eup %2775  ;;  %2783 = vpow2.f32 %v828_v4  ;;  %v812_v51 = vsub.f32 %v3422_v47, %v785_v46  ;;  %v1155_v32 = vpop.permute.xlu1 %1154  ;;  %v754_v47 = vmax.f32 %v722_v1, %v738_v23 }
 0x145   :  { %2417 = vmatmul.mubr.f32.gmra.mrb[12].mxu0 %v2776_v24  ;;  %2785 = vpow2.f32 %v830_v50  ;;  %v1218_v21 = vadd.f32 %v3551_v62, %v1155_v32 }
 0x146   :  { %2419 = vmatprep.mubr.f32.mxu0 %v2774_v11  ;;  %2681 = vmatpush3.bf16.msra.mxu0 %v3363_v33  ;;  %v2778_v27 = vpop.eup %2777  ;;  %v832_v13 = vmul.f32 1.442695, %v812_v51  ;;  %v3581_v59 = vadd.f32 %v754_v47, %v4516_v9  ;;  %v3588_v11 = vadd.f32 %v756_v56, %v4517_v20 }
 0x147   :  { %2683 = vmatprep.subr.bf16.mxu0 %v3384_v44  ;;  %v2780_v7 = vpop.eup %2779  ;;  %v1234_v37 = vmul.f32 0.2, %v1218_v21 }
 0x148   :  { %2787 = vpow2.f32 %v832_v13  ;;  %2454 = vmatprep.mubr.f32.mxu1 %v2780_v7  ;;  %v1656_v22 = vpop.permute.xlu1 %1655 }
 0x149   :  { %2420 = vmatmul.mubr.f32.gmra.mrb[14].mxu0 %v2778_v27  ;;  %2789 = vpow2.f32 %v834_v45  ;;  %v1250_v60 = vmax.f32 %v1218_v21, %v1234_v37 }
 0x14a   :  { %2685 = vmatpush3.bf16.msra.mxu0 %v3384_v44  ;;  %v2782_v42 = vpop.eup %2781 }
 0x14b   :  { %790 = vmax.xlane.f32.xlu1 %v3561_v25  ;;  %2455 = vmatmul.mubr.f32.vlgmr.msra.gmra.mrb[0].mxu1 %v2782_v42  ;;  %v3567_v19 = vpop.permute.xlu0 %1671  ;;  %v3570_v26 = vadd.f32 %v1250_v60, %v3172_v53 }
 0x14c   :  { %v1660_v0 = vpop.permute.xlu1 %1659  ;;  %2689 = vmatpush3.bf16.msra.mxu1 %v3196_v29  ;;  %v758_v29 = vmax.f32 %v726_v16, %v742_v8  ;;  %v4519_v8 = vld [vmem:[#allocation2_spill] sm:$0xff] }
 0x14d   :  { %v1723_v38 = vadd.f32 %v3575_v31, %v1660_v0  ;;  %1283 = vmax.xlane.f32.xlu0 %v3570_v26  ;;  %2691 = vmatprep.subr.bf16.mxu1 %v4511_v57 }
 0x14e   :  { %v2784_v43 = vpop.eup %2783  ;;  %v3600_v15 = vadd.f32 %v758_v29, %v4518_v52 }
 0x14f   :  { %v2786_v1 = vpop.eup %2785  ;;  %v1739_v17 = vmul.f32 0.2, %v1723_v38  ;;  %796 = vmax.xlane.f32.xlu1 %v3581_v59  ;;  %2457 = vmatprep.mubr.f32.mxu1 %v2784_v43  ;;  %v3585_v34 = vpop.permute.xlu0 %1687 }
 0x150   :  { %2458 = vmatmul.mubr.f32.gmra.mrb[2].mxu1 %v2786_v1 }
 0x151   :  { %v1159_v50 = vpop.permute.xlu1 %1158  ;;  %v1755_v4 = vmax.f32 %v1723_v38, %v1739_v17  ;;  %2693 = vmatpush3.bf16.msra.mxu1 %v4511_v57  ;;  %v1722_v57 = vadd.f32 %v3575_v31, %v1656_v22 }
 0x152   :  { %v2788_v24 = vpop.eup %2787  ;;  %2695 = vmatprep.subr.bf16.mxu1 %v4512_v48 }
 0x153   :  { %v2790_v46 = vpop.eup %2789  ;;  %800 = vmax.xlane.f32.xlu1 %v3588_v11  ;;  %2460 = vmatprep.mubr.f32.mxu1 %v2788_v24  ;;  %v3593_v23 = vpop.permute.xlu0 %1703  ;;  %v3596_v51 = vadd.f32 %v1755_v4, %v3172_v53  ;;  %v1738_v13 = vmul.f32 0.2, %v1722_v57 }
 0x154   :  { %2461 = vmatmul.mubr.f32.gmra.mrb[4].mxu1 %v2790_v46 }
 0x155   :  { %v1163_v32 = vpop.permute.xlu1 %1162  ;;  %1788 = vmax.xlane.f32.xlu0 %v3596_v51  ;;  %2697 = vmatpush3.bf16.msra.mxu1 %v4512_v48  ;;  %v1219_v48 = vadd.f32 %v3551_v62, %v1159_v50  ;;  %v1754_v16 = vmax.f32 %v1722_v57, %v1738_v13 }
 0x156   :  { %v1220_v45 = vadd.f32 %v3551_v62, %v1163_v32  ;;  %2699 = vmatprep.subr.bf16.mxu1 %v4513_v49 }
 0x157   :  { %804 = vmax.xlane.f32.xlu1 %v3600_v15  ;;  %v3627_v50 = vadd.f32 %v1754_v16, %v4519_v8 }
 0x158   :  { %v1236_v21 = vmul.f32 0.2, %v1220_v45  ;;  %v1151_v53 = vpop.permute.xlu0 %1150 }
 0x159   :  { %v1217_v27 = vadd.f32 %v3551_v62, %v1151_v53  ;;  %2701 = vmatpush3.bf16.msra.mxu1 %v4513_v49  ;;  %v1235_v49 = vmul.f32 0.2, %v1219_v48 }
 0x15a   :  { %v1664_v7 = vpop.permute.xlu1 %1663  ;;  %v1252_v37 = vmax.f32 %v1220_v45, %v1236_v21  ;;  %2703 = vmatprep.subr.bf16.mxu1 %v3314_v18  ;;  %v1726_v21 = vadd.f32 %v3575_v31, %v3567_v19 }
 0x15b   :  { %v1233_v47 = vmul.f32 0.2, %v1217_v27  ;;  %v1724_v0 = vadd.f32 %v3575_v31, %v1664_v7 }
 0x15c   :  { %v3612_v22 = vadd.f32 %v1252_v37, %v3181_v61  ;;  %v1167_v42 = vpop.permute.xlu0 %1166  ;;  %v1742_v19 = vmul.f32 0.2, %v1726_v21 }
 0x15d   :  { %v1249_v5 = vmax.f32 %v1217_v27, %v1233_v47  ;;  %2705 = vmatpush3.bf16.msra.mxu1 %v3314_v18  ;;  %v1221_v1 = vadd.f32 %v3551_v62, %v1167_v42  ;;  %v1251_v18 = vmax.f32 %v1219_v48, %v1235_v49  ;;  %v1740_v17 = vmul.f32 0.2, %v1724_v0 }
 0x15e   :  { %v1668_v60 = vpop.permute.xlu1 %1667  ;;  %1287 = vmax.xlane.f32.xlu0 %v3612_v22  ;;  %2707 = vmatprep.subr.bf16.mxu1 %v4514_v12 }
 0x15f   :  { %v1725_v56 = vadd.f32 %v3575_v31, %v1668_v60  ;;  %v3620_v38 = vadd.f32 %v1249_v5, %v4519_v8  ;;  %v1237_v32 = vmul.f32 0.2, %v1221_v1  ;;  %v1756_v53 = vmax.f32 %v1724_v0, %v1740_v17 }
 0x160   :  { %v1179_v24 = vpop.permute.xlu0 %1178  ;;  %v3641_v27 = vadd.f32 %v1251_v18, %v3174_v54  ;;  %v1758_v0 = vmax.f32 %v1726_v21, %v1742_v19 }
 0x161   :  { %v1741_v43 = vmul.f32 0.2, %v1725_v56  ;;  %1281 = vmax.xlane.f32.xlu1 %v3620_v38  ;;  %2709 = vmatpush3.bf16.msra.mxu1 %v4514_v12  ;;  %v1224_v57 = vadd.f32 %v3551_v62, %v1179_v24  ;;  %v1253_v37 = vmax.f32 %v1221_v1, %v1237_v32  ;;  %v3650_v5 = vadd.f32 %v1756_v53, %v3174_v54 }
 0x162   :  { %2711 = vmatprep.subr.bf16.mxu1 %v3363_v33  ;;  %v1730_v24 = vadd.f32 %v3575_v31, %v3585_v34 }
 0x163   :  { %v1171_v29 = vpop.permute.xlu1 %1170  ;;  %v1757_v4 = vmax.f32 %v1725_v56, %v1741_v43  ;;  %v1240_v48 = vmul.f32 0.2, %v1224_v57  ;;  %v3655_v49 = vadd.f32 %v1253_v37, %v3176_v55 }
 0x164   :  { %v1222_v46 = vadd.f32 %v3551_v62, %v1171_v29  ;;  %v1183_v43 = vpop.permute.xlu0 %1182 }
 0x165   :  { %1786 = vmax.xlane.f32.xlu1 %v3627_v50  ;;  %v3633_v45 = vadd.f32 %v1757_v4, %v3181_v61  ;;  %2713 = vmatpush3.bf16.msra.mxu1 %v3363_v33  ;;  %v1256_v16 = vmax.f32 %v1224_v57, %v1240_v48  ;;  %v1225_v18 = vadd.f32 %v3551_v62, %v1183_v43 }
 0x166   :  { %v1238_v12 = vmul.f32 0.2, %v1222_v46  ;;  %2715 = vmatprep.subr.bf16.mxu1 %v3384_v44  ;;  %v3669_v4 = vadd.f32 %v1758_v0, %v3176_v55  ;;  %v1746_v55 = vmul.f32 0.2, %v1730_v24 }
 0x167   :  { %1792 = vmax.xlane.f32.xlu0 %v3633_v45  ;;  %v3664_v54 = vadd.f32 %v1256_v16, %v4515_v2  ;;  %v1241_v32 = vmul.f32 0.2, %v1225_v18 }
 0x168   :  { %v1676_v13 = vpop.permute.xlu1 %1675  ;;  %v1254_v7 = vmax.f32 %v1222_v46, %v1238_v12  ;;  %v1195_v19 = vpop.permute.xlu0 %1194  ;;  %v1762_v16 = vmax.f32 %v1730_v24, %v1746_v55 }
 0x169   :  { %v1727_v61 = vadd.f32 %v3575_v31, %v1676_v13  ;;  %1285 = vmax.xlane.f32.xlu1 %v3641_v27  ;;  %2717 = vmatpush3.bf16.msra.mxu1 %v3384_v44  ;;  %v1257_v13 = vmax.f32 %v1225_v18, %v1241_v32 }
 0x16a   :  { %v3647_v33 = vadd.f32 %v1254_v7, %v3203_v36 }
 0x16b   :  { %v1743_v47 = vmul.f32 0.2, %v1727_v61 }
 0x16c   :  { %1291 = vmax.xlane.f32.xlu0 %v3647_v33 }
 0x16d   :  { %v1759_v60 = vmax.f32 %v1727_v61, %v1743_v47  ;;  %v1175_v42 = vpop.permute.xlu1 %1174  ;;  %1790 = vmax.xlane.f32.xlu1 %v3650_v5 }
 0x16e   :  { %v1223_v44 = vadd.f32 %v3551_v62, %v1175_v42  ;;  %v3691_v42 = vadd.f32 %v1257_v13, %v3260_v40  ;;  %v3007_v13 = vmov 127  }
 0x16f   :  { %v3659_v56 = vadd.f32 %v1759_v60, %v3203_v36  ;;  %v1228_v60 = vadd.f32 %v3551_v62, %v1195_v19  ;;  %2745 = vset.pattern.permute.xlu0 %v3007_v13  ;;  %2746 = vset.pattern.permute.xlu1 %v3007_v13 }
 0x170   :  { %v1239_v8 = vmul.f32 0.2, %v1223_v44 }
 0x171   :  { %1796 = vmax.xlane.f32.xlu0 %v3659_v56  ;;  %1289 = vmax.xlane.f32.xlu1 %v3655_v49 }
 0x172   :  { %v1680_v1 = vpop.permute.xlu1 %1679  ;;  %v1255_v17 = vmax.f32 %v1223_v44, %v1239_v8 }
 0x173   :  { %v1728_v29 = vadd.f32 %v3575_v31, %v1680_v1  ;;  %v3699_v1 = vadd.f32 %v1762_v16, %v3260_v40 }
 0x174   :  { %v3677_v21 = vadd.f32 %v1255_v17, %v3201_v35 }
 0x175   :  { %v1744_v36 = vmul.f32 0.2, %v1728_v29  ;;  %1794 = vmax.xlane.f32.xlu1 %v3669_v4  ;;  %1295 = vmax.xlane.f32.xlu0 %v3664_v54 }
 0x176   :  { %v1684_v46 = vpop.permute.xlu1 %1683 }
 0x177   :  { %v1760_v57 = vmax.f32 %v1728_v29, %v1744_v36  ;;  %v1729_v12 = vadd.f32 %v3575_v31, %v1684_v46  ;;  %v1199_v46 = vpop.permute.xlu0 %1198 }
 0x179   :  { %v1745_v53 = vmul.f32 0.2, %v1729_v12  ;;  %1293 = vmax.xlane.f32.xlu1 %v3677_v21  ;;  %v3681_v48 = vadd.f32 %v1760_v57, %v3201_v35  ;;  %v1229_v57 = vadd.f32 %v3551_v62, %v1199_v46 }
 0x17b   :  { %v1761_v7 = vmax.f32 %v1729_v12, %v1745_v53  ;;  %v1187_v37 = vpop.permute.xlu1 %1186 }
 0x17c   :  { %v1226_v34 = vadd.f32 %v3551_v62, %v1187_v37  ;;  %v1245_v37 = vmul.f32 0.2, %v1229_v57 }
 0x17d   :  { %1798 = vmax.xlane.f32.xlu1 %v3681_v48  ;;  %v3686_v61 = vadd.f32 %v1761_v7, %v4515_v2  ;;  %v1244_v2 = vmul.f32 0.2, %v1228_v60 }
 0x17e   :  { %v1242_v47 = vmul.f32 0.2, %v1226_v34 }
 0x17f   :  { %1800 = vmax.xlane.f32.xlu0 %v3686_v61  ;;  %v1260_v36 = vmax.f32 %v1228_v60, %v1244_v2 }
 0x180   :  { %v1258_v44 = vmax.f32 %v1226_v34, %v1242_v47  ;;  %v1692_v35 = vpop.permute.xlu1 %1691 }
 0x181   :  { %v1731_v0 = vadd.f32 %v3575_v31, %v1692_v35  ;;  %1297 = vmax.xlane.f32.xlu1 %v3691_v42  ;;  %v3711_v55 = vadd.f32 %v1260_v36, %v3300_v39 }
 0x182   :  { %v3696_v8 = vadd.f32 %v1258_v44, %v3279_v63  ;;  %v1261_v44 = vmax.f32 %v1229_v57, %v1245_v37 }
 0x183   :  { %v1747_v43 = vmul.f32 0.2, %v1731_v0 }
 0x184   :  { %1299 = vmax.xlane.f32.xlu0 %v3696_v8  ;;  %v3730_v36 = vadd.f32 %v1261_v44, %v4517_v20 }
 0x185   :  { %v1763_v18 = vmax.f32 %v1731_v0, %v1747_v43  ;;  %v1191_v17 = vpop.permute.xlu1 %1190  ;;  %1802 = vmax.xlane.f32.xlu1 %v3699_v1 }
 0x186   :  { %v1227_v29 = vadd.f32 %v3551_v62, %v1191_v17 }
 0x187   :  { %v3705_v24 = vadd.f32 %v1763_v18, %v3279_v63  ;;  %v1734_v63 = vadd.f32 %v3575_v31, %v3593_v23  ;;  %v1211_v23 = vpop.permute.xlu0 %1210 }
 0x188   :  { %v1243_v32 = vmul.f32 0.2, %v1227_v29 }
 0x189   :  { %1804 = vmax.xlane.f32.xlu0 %v3705_v24  ;;  %v1750_v60 = vmul.f32 0.2, %v1734_v63 }
 0x18a   :  { %v1259_v40 = vmax.f32 %v1227_v29, %v1243_v32  ;;  %v1696_v12 = vpop.permute.xlu1 %1695  ;;  %v1232_v32 = vadd.f32 %v3551_v62, %v1211_v23 }
 0x18b   :  { %v1732_v53 = vadd.f32 %v3575_v31, %v1696_v12  ;;  %v1766_v17 = vmax.f32 %v1734_v63, %v1750_v60 }
 0x18c   :  { %v3714_v7 = vadd.f32 %v1259_v40, %v4516_v9 }
 0x18d   :  { %v1748_v34 = vmul.f32 0.2, %v1732_v53  ;;  %1303 = vmax.xlane.f32.xlu0 %v3711_v55  ;;  %v3737_v12 = vadd.f32 %v1766_v17, %v4517_v20 }
 0x18e   :  { %v1700_v19 = vpop.permute.xlu1 %1699  ;;  %1301 = vmax.xlane.f32.xlu1 %v3714_v7 }
 0x18f   :  { %v1764_v47 = vmax.f32 %v1732_v53, %v1748_v34  ;;  %v1733_v16 = vadd.f32 %v3575_v31, %v1700_v19  ;;  %v1248_v53 = vmul.f32 0.2, %v1232_v32 }
 0x191   :  { %v1749_v35 = vmul.f32 0.2, %v1733_v16  ;;  %v3722_v0 = vadd.f32 %v1764_v47, %v4516_v9 }
 0x193   :  { %v1765_v2 = vmax.f32 %v1733_v16, %v1749_v35  ;;  %v1203_v43 = vpop.permute.xlu1 %1202  ;;  %1806 = vmax.xlane.f32.xlu1 %v3722_v0  ;;  %v1264_v16 = vmax.f32 %v1232_v32, %v1248_v53 }
 0x194   :  { %v1230_v18 = vadd.f32 %v3551_v62, %v1203_v43 }
 0x195   :  { %v3727_v29 = vadd.f32 %v1765_v2, %v3300_v39  ;;  %v3752_v23 = vadd.f32 %v1264_v16, %v3372_v28 }
 0x196   :  { %v1246_v46 = vmul.f32 0.2, %v1230_v18 }
 0x197   :  { %1808 = vmax.xlane.f32.xlu0 %v3727_v29  ;;  %1305 = vmax.xlane.f32.xlu1 %v3730_v36 }
 0x198   :  { %v1262_v9 = vmax.f32 %v1230_v18, %v1246_v46  ;;  %v1708_v57 = vpop.permute.xlu1 %1707 }
 0x199   :  { %v1735_v40 = vadd.f32 %v3575_v31, %v1708_v57 }
 0x19a   :  { %v3740_v39 = vadd.f32 %v1262_v9, %v3334_v30 }
 0x19b   :  { %v1751_v13 = vmul.f32 0.2, %v1735_v40  ;;  %1810 = vmax.xlane.f32.xlu1 %v3737_v12 }
 0x19c   :  { %1307 = vmax.xlane.f32.xlu0 %v3740_v39 }
 0x19d   :  { %v1767_v63 = vmax.f32 %v1735_v40, %v1751_v13  ;;  %v1207_v37 = vpop.permute.xlu1 %1206  ;;  %v789_v34 = vpop.xlane.xlu0 %788 }
 0x19e   :  { %v1231_v19 = vadd.f32 %v3551_v62, %v1207_v37  ;;  %v814_v47 = vsub.f32 %v3473_v41, %v789_v34 }
 0x19f   :  { %v3747_v20 = vadd.f32 %v1767_v63, %v3334_v30 }
 0x1a0   :  { %v1247_v60 = vmul.f32 0.2, %v1231_v19  ;;  %v836_v44 = vmul.f32 1.442695, %v814_v47 }
 0x1a1   :  { %1812 = vmax.xlane.f32.xlu0 %v3747_v20  ;;  %v793_v53 = vpop.xlane.xlu0 %792 }
 0x1a2   :  { %v1263_v35 = vmax.f32 %v1231_v19, %v1247_v60  ;;  %2791 = vpow2.f32 %v836_v44  ;;  %v1712_v2 = vpop.permute.xlu1 %1711  ;;  %v816_v63 = vsub.f32 %v3481_v3, %v793_v53 }
 0x1a3   :  { %v1736_v43 = vadd.f32 %v3575_v31, %v1712_v2 }
 0x1a4   :  { %v3755_v62 = vadd.f32 %v1263_v35, %v4518_v52  ;;  %v840_v19 = vmul.f32 1.442695, %v816_v63 }
 0x1a5   :  { %v1752_v41 = vmul.f32 0.2, %v1736_v43  ;;  %1311 = vmax.xlane.f32.xlu0 %v3752_v23  ;;  %v795_v13 = vpop.xlane.xlu0 %794 }
 0x1a6   :  { %v1716_v30 = vpop.permute.xlu1 %1715  ;;  %1309 = vmax.xlane.f32.xlu1 %v3755_v62 }
 0x1a7   :  { %v1768_v18 = vmax.f32 %v1736_v43, %v1752_v41  ;;  %v1737_v17 = vadd.f32 %v3575_v31, %v1716_v30  ;;  %v817_v31 = vsub.f32 %v3488_v6, %v795_v13 }
 0x1a9   :  { %v1753_v46 = vmul.f32 0.2, %v1737_v17  ;;  %v3761_v32 = vadd.f32 %v1768_v18, %v4518_v52  ;;  %v799_v37 = vpop.xlane.xlu0 %798  ;;  %v842_v16 = vmul.f32 1.442695, %v817_v31 }
 0x1aa   :  { %v819_v60 = vsub.f32 %v3497_v58, %v799_v37 }
 0x1ab   :  { %v1769_v9 = vmax.f32 %v1737_v17, %v1753_v46  ;;  %1814 = vmax.xlane.f32.xlu1 %v3761_v32 }
 0x1ac   :  { %v2792_v57 = vpop.eup %2791  ;;  %v846_v3 = vmul.f32 1.442695, %v819_v60 }
 0x1ad   :  { %2463 = vmatprep.mubr.f32.mxu1 %v2792_v57  ;;  %v3765_v40 = vadd.f32 %v1769_v9, %v3372_v28  ;;  %v803_v44 = vpop.xlane.xlu0 %802 }
 0x1ae   :  { %v821_v43 = vsub.f32 %v3505_v14, %v803_v44 }
 0x1af   :  { %1816 = vmax.xlane.f32.xlu0 %v3765_v40 }
 0x1b0   :  { %v850_v18 = vmul.f32 1.442695, %v821_v43 }
 0x1b1   :  { %v807_v41 = vpop.xlane.xlu0 %806 }
 0x1b2   :  { %v823_v17 = vsub.f32 %v3512_v10, %v807_v41 }
 0x1b4   :  { %v854_v14 = vmul.f32 1.442695, %v823_v17 }
 0x1d8   :  { %v791_v34 = vpop.xlane.xlu1 %790 }
 0x1d9   :  { %v815_v52 = vsub.f32 %v3561_v25, %v791_v34 }
 0x1da   :  { %v1284_v53 = vpop.xlane.xlu0 %1283 }
 0x1db   :  { %v838_v47 = vmul.f32 1.442695, %v815_v52  ;;  %v1314_v63 = vsub.f32 %v3570_v26, %v1284_v53 }
 0x1dc   :  { %v797_v28 = vpop.xlane.xlu1 %796 }
 0x1dd   :  { %2793 = vpow2.f32 %v838_v47  ;;  %v818_v35 = vsub.f32 %v3581_v59, %v797_v28  ;;  %v1331_v52 = vmul.f32 1.442695, %v1314_v63 }
 0x1de   :  { %2795 = vpow2.f32 %v840_v19 }
 0x1df   :  { %v844_v2 = vmul.f32 1.442695, %v818_v35  ;;  %2797 = vpow2.f32 %v842_v16 }
 0x1e0   :  { %v801_v6 = vpop.xlane.xlu1 %800 }
 0x1e1   :  { %2799 = vpow2.f32 %v844_v2  ;;  %v820_v25 = vsub.f32 %v3588_v11, %v801_v6 }
 0x1e2   :  { %2801 = vpow2.f32 %v846_v3  ;;  %v1789_v37 = vpop.xlane.xlu0 %1788 }
 0x1e3   :  { %v848_v30 = vmul.f32 1.442695, %v820_v25  ;;  %v1819_v19 = vsub.f32 %v3596_v51, %v1789_v37 }
 0x1e4   :  { %v805_v58 = vpop.xlane.xlu1 %804 }
 0x1e5   :  { %2803 = vpow2.f32 %v848_v30  ;;  %v822_v59 = vsub.f32 %v3600_v15, %v805_v58  ;;  %v1836_v35 = vmul.f32 1.442695, %v1819_v19 }
 0x1e6   :  { %2805 = vpow2.f32 %v850_v18 }
 0x1e7   :  { %v2794_v46 = vpop.eup %2793  ;;  %v852_v9 = vmul.f32 1.442695, %v822_v59 }
 0x1e8   :  { %v2796_v57 = vpop.eup %2795  ;;  %2464 = vmatmul.mubr.f32.gmra.mrb[6].mxu1 %v2794_v46 }
 0x1e9   :  { %2807 = vpow2.f32 %v852_v9  ;;  %2466 = vmatprep.mubr.f32.mxu1 %v2796_v57  ;;  %v2798_v11 = vpop.eup %2797 }
 0x1ea   :  { %2809 = vpow2.f32 %v854_v14 }
 0x1eb   :  { %v2800_v13 = vpop.eup %2799  ;;  %v1288_v47 = vpop.xlane.xlu0 %1287 }
 0x1ec   :  { %2467 = vmatmul.mubr.f32.gmra.mrb[8].mxu1 %v2798_v11  ;;  %v2802_v10 = vpop.eup %2801  ;;  %v1316_v2 = vsub.f32 %v3612_v22, %v1288_v47 }
 0x1ed   :  { %2469 = vmatprep.mubr.f32.mxu1 %v2800_v13 }
 0x1ee   :  { %v1282_v31 = vpop.xlane.xlu1 %1281  ;;  %v1335_v41 = vmul.f32 1.442695, %v1316_v2 }
 0x1ef   :  { %v2804_v15 = vpop.eup %2803  ;;  %v1313_v34 = vsub.f32 %v3620_v38, %v1282_v31 }
 0x1f0   :  { %2470 = vmatmul.mubr.f32.gmra.mrb[10].mxu1 %v2802_v10  ;;  %v2806_v60 = vpop.eup %2805 }
 0x1f1   :  { %v1329_v16 = vmul.f32 1.442695, %v1313_v34  ;;  %2472 = vmatprep.mubr.f32.mxu1 %v2804_v15 }
 0x1f2   :  { %v1787_v44 = vpop.xlane.xlu1 %1786 }
 0x1f3   :  { %v2808_v28 = vpop.eup %2807  ;;  %2811 = vpow2.f32 %v1329_v16  ;;  %v1818_v26 = vsub.f32 %v3627_v50, %v1787_v44 }
 0x1f4   :  { %2813 = vpow2.f32 %v1331_v52  ;;  %v1793_v3 = vpop.xlane.xlu0 %1792  ;;  %2473 = vmatmul.mubr.f32.gmra.mrb[12].mxu1 %v2806_v60  ;;  %v2810_v6 = vpop.eup %2809 }
 0x1f5   :  { %v1834_v38 = vmul.f32 1.442695, %v1818_v26  ;;  %2475 = vmatprep.mubr.f32.mxu1 %v2808_v28  ;;  %v1821_v51 = vsub.f32 %v3633_v45, %v1793_v3 }
 0x1f6   :  { %v1286_v43 = vpop.xlane.xlu1 %1285 }
 0x1f7   :  { %2815 = vpow2.f32 %v1834_v38  ;;  %v1315_v25 = vsub.f32 %v3641_v27, %v1286_v43  ;;  %v1840_v18 = vmul.f32 1.442695, %v1821_v51 }
 0x1f8   :  { %2817 = vpow2.f32 %v1836_v35  ;;  %2476 = vmatmul.mubr.f32.gmra.mrb[14].mxu1 %v2810_v6 }
 0x1f9   :  { %v1333_v30 = vmul.f32 1.442695, %v1315_v25  ;;  %v1292_v50 = vpop.xlane.xlu0 %1291 }
 0x1fa   :  { %v1791_v58 = vpop.xlane.xlu1 %1790  ;;  %v1318_v17 = vsub.f32 %v3647_v33, %v1292_v50 }
 0x1fb   :  { %2819 = vpow2.f32 %v1333_v30  ;;  %v1820_v22 = vsub.f32 %v3650_v5, %v1791_v58 }
 0x1fc   :  { %2821 = vpow2.f32 %v1335_v41  ;;  %v1339_v14 = vmul.f32 1.442695, %v1318_v17 }
 0x1fd   :  { %v2812_v59 = vpop.eup %2811  ;;  %v1838_v45 = vmul.f32 1.442695, %v1820_v22  ;;  %2823 = vpow2.f32 %v1840_v18 }
 0x1fe   :  { %v2814_v46 = vpop.eup %2813  ;;  %v1290_v9 = vpop.xlane.xlu1 %1289  ;;  %2510 = vmatprep.mubr.f32.mxu0 %v2812_v59 }
 0x1ff   :  { %v1797_v57 = vpop.xlane.xlu0 %1796  ;;  %2825 = vpow2.f32 %v1838_v45  ;;  %v1317_v27 = vsub.f32 %v3655_v49, %v1290_v9  ;;  %v3787_v53 = vpop.f32.mrb[0].mxu0  ;;  %2511 = vmatmul.mubr.f32.vlgmr.msra.gmra.mrb[16].mxu0 %v2814_v46 }
 0x200   :  { %v1823_v11 = vsub.f32 %v3659_v56, %v1797_v57  ;;  %2827 = vrcp.f32 %v3787_v53  ;;  %v3791_v5 = vpop.f32.mrb[1].mxu0 }
 0x201   :  { %v2816_v33 = vpop.eup %2815  ;;  %v1337_v13 = vmul.f32 1.442695, %v1317_v27  ;;  %2829 = vrcp.f32 %v3791_v5 }
 0x202   :  { %v2818_v63 = vpop.eup %2817  ;;  %v1795_v37 = vpop.xlane.xlu1 %1794  ;;  %2566 = vmatprep.mubr.f32.mxu1 %v2816_v33  ;;  %v1844_v56 = vmul.f32 1.442695, %v1823_v11 }
 0x203   :  { %v1296_v10 = vpop.xlane.xlu0 %1295  ;;  %2831 = vpow2.f32 %v1337_v13  ;;  %v1822_v49 = vsub.f32 %v3669_v4, %v1795_v37  ;;  %v3795_v31 = vpop.f32.mrb[2].mxu0  ;;  %2567 = vmatmul.mubr.f32.vlgmr.msra.gmra.mrb[16].mxu1 %v2818_v63 }
 0x204   :  { %2833 = vpow2.f32 %v1339_v14  ;;  %v1320_v15 = vsub.f32 %v3664_v54, %v1296_v10  ;;  %v3798_v34 = vpop.f32.mrb[3].mxu0 }
 0x205   :  { %v2820_v52 = vpop.eup %2819  ;;  %v1842_v19 = vmul.f32 1.442695, %v1822_v49 }
 0x206   :  { %v2822_v47 = vpop.eup %2821  ;;  %v1294_v16 = vpop.xlane.xlu1 %1293  ;;  %2513 = vmatprep.mubr.f32.mxu0 %v2820_v52  ;;  %v1343_v28 = vmul.f32 1.442695, %v1320_v15 }
 0x207   :  { %2835 = vpow2.f32 %v1842_v19  ;;  %v1319_v60 = vsub.f32 %v3677_v21, %v1294_v16  ;;  %v3801_v44 = vpop.f32.mrb[4].mxu0  ;;  %2514 = vmatmul.mubr.f32.gmra.mrb[18].mxu0 %v2822_v47  ;;  %v2824_v4 = vpop.eup %2823 }
 0x208   :  { %2837 = vpow2.f32 %v1844_v56  ;;  %v3803_v26 = vpop.f32.mrb[5].mxu0 }
 0x209   :  { %v2826_v35 = vpop.eup %2825  ;;  %v1341_v54 = vmul.f32 1.442695, %v1319_v60 }
 0x20a   :  { %v2828_v2 = vpop.eup %2827  ;;  %v1799_v3 = vpop.xlane.xlu1 %1798  ;;  %2569 = vmatprep.mubr.f32.mxu1 %v2826_v35 }
 0x20b   :  { %v2830_v38 = vpop.eup %2829  ;;  %2839 = vpow2.f32 %v1341_v54  ;;  %v1824_v51 = vsub.f32 %v3681_v48, %v1799_v3  ;;  %535 = vperm.xlu0 %2745, %v2828_v2   ;;  %2570 = vmatmul.mubr.f32.gmra.mrb[18].mxu1 %v2824_v4 }
 0x20c   :  { %v3806_v43 = vpop.f32.mrb[6].mxu0  ;;  %2841 = vpow2.f32 %v1343_v28  ;;  %530 = vperm.xlu1 %2746, %v2830_v38   ;;  %v1801_v6 = vpop.xlane.xlu0 %1800 }
 0x20d   :  { %v3808_v21 = vpop.f32.mrb[7].mxu0  ;;  %v2832_v25 = vpop.eup %2831  ;;  %v1846_v41 = vmul.f32 1.442695, %v1824_v51  ;;  %v1825_v30 = vsub.f32 %v3686_v61, %v1801_v6 }
 0x20e   :  { %v2834_v50 = vpop.eup %2833  ;;  %v1298_v18 = vpop.xlane.xlu1 %1297  ;;  %2516 = vmatprep.mubr.f32.mxu0 %v2832_v25 }
 0x20f   :  { %2843 = vpow2.f32 %v1846_v41  ;;  %v1848_v58 = vmul.f32 1.442695, %v1825_v30  ;;  %v1321_v48 = vsub.f32 %v3691_v42, %v1298_v18  ;;  %2517 = vmatmul.mubr.f32.gmra.mrb[20].mxu0 %v2834_v50 }
 0x210   :  { %v3812_v22 = vpop.f32.mrb[8].mxu0 }
 0x211   :  { %v3814_v17 = vpop.f32.mrb[9].mxu0  ;;  %v2836_v59 = vpop.eup %2835  ;;  %2845 = vpow2.f32 %v1848_v58  ;;  %v1345_v45 = vmul.f32 1.442695, %v1321_v48 }
 0x212   :  { %v1300_v46 = vpop.xlane.xlu0 %1299  ;;  %v2838_v9 = vpop.eup %2837  ;;  %2572 = vmatprep.mubr.f32.mxu1 %v2836_v59 }
 0x213   :  { %v1322_v57 = vsub.f32 %v3696_v8, %v1300_v46  ;;  %v1803_v61 = vpop.xlane.xlu1 %1802  ;;  %2847 = vpow2.f32 %v1345_v45  ;;  %2573 = vmatmul.mubr.f32.gmra.mrb[20].mxu1 %v2838_v9 }
 0x214   :  { %v1826_v27 = vsub.f32 %v3699_v1, %v1803_v61  ;;  %v3818_v14 = vpop.f32.mrb[10].mxu0 }
 0x215   :  { %v1347_v42 = vmul.f32 1.442695, %v1322_v57  ;;  %v3820_v11 = vpop.f32.mrb[11].mxu0  ;;  %v2840_v33 = vpop.eup %2839 }
 0x216   :  { %v1850_v13 = vmul.f32 1.442695, %v1826_v27  ;;  %v2842_v63 = vpop.eup %2841  ;;  %v1805_v37 = vpop.xlane.xlu0 %1804  ;;  %2519 = vmatprep.mubr.f32.mxu0 %v2840_v33 }
 0x217   :  { %2849 = vpow2.f32 %v1347_v42  ;;  %v1827_v8 = vsub.f32 %v3705_v24, %v1805_v37  ;;  %2520 = vmatmul.mubr.f32.gmra.mrb[22].mxu0 %v2842_v63 }
 0x218   :  { %2851 = vpow2.f32 %v1850_v13  ;;  %v3823_v10 = vpop.f32.mrb[12].mxu0 }
 0x219   :  { %v3825_v49 = vpop.f32.mrb[13].mxu0  ;;  %v2844_v1 = vpop.eup %2843  ;;  %v1852_v56 = vmul.f32 1.442695, %v1827_v8 }
 0x21a   :  { %v1304_v15 = vpop.xlane.xlu0 %1303  ;;  %2575 = vmatprep.mubr.f32.mxu1 %v2844_v1 }
 0x21b   :  { %v2846_v52 = vpop.eup %2845  ;;  %2853 = vpow2.f32 %v1852_v56  ;;  %v1324_v19 = vsub.f32 %v3711_v55, %v1304_v15  ;;  %v1302_v16 = vpop.xlane.xlu1 %1301 }
 0x21c   :  { %v3828_v47 = vpop.f32.mrb[14].mxu0  ;;  %v1323_v60 = vsub.f32 %v3714_v7, %v1302_v16  ;;  %2576 = vmatmul.mubr.f32.gmra.mrb[22].mxu1 %v2846_v52 }
 0x21d   :  { %v3831_v4 = vpop.f32.mrb[15].mxu0  ;;  %v2848_v24 = vpop.eup %2847  ;;  %v1351_v28 = vmul.f32 1.442695, %v1324_v19 }
 0x21e   :  { %v1349_v35 = vmul.f32 1.442695, %v1323_v60  ;;  %v3833_v54 = vpop.f32.mrb[0].mxu1  ;;  %2522 = vmatprep.mubr.f32.mxu0 %v2848_v24 }
 0x21f   :  { %2855 = vpow2.f32 %v1351_v28  ;;  %v3835_v2 = vpop.f32.mrb[1].mxu1 }
 0x220   :  { %2857 = vpow2.f32 %v1349_v35  ;;  %v1807_v55 = vpop.xlane.xlu1 %1806 }
 0x221   :  { %v2850_v3 = vpop.eup %2849  ;;  %2859 = vrcp.f32 %v3833_v54  ;;  %v1828_v7 = vsub.f32 %v3722_v0, %v1807_v55 }
 0x222   :  { %v2852_v38 = vpop.eup %2851  ;;  %2523 = vmatmul.mubr.f32.gmra.mrb[24].mxu0 %v2850_v3  ;;  %2861 = vrcp.f32 %v3835_v2 }
 0x223   :  { %2578 = vmatprep.mubr.f32.mxu1 %v2852_v38  ;;  %v1854_v51 = vmul.f32 1.442695, %v1828_v7  ;;  %v3840_v6 = vpop.f32.mrb[2].mxu1  ;;  %2863 = vrcp.f32 %v3820_v11 }
 0x224   :  { %v1306_v25 = vpop.xlane.xlu1 %1305  ;;  %v1809_v41 = vpop.xlane.xlu0 %1808 }
 0x225   :  { %v2854_v30 = vpop.eup %2853  ;;  %2865 = vpow2.f32 %v1854_v51  ;;  %v1325_v50 = vsub.f32 %v3730_v36, %v1306_v25  ;;  %v1829_v18 = vsub.f32 %v3727_v29, %v1809_v41  ;;  %v3845_v58 = vpop.f32.mrb[3].mxu1 }
 0x226   :  { %2867 = vrcp.f32 %v3795_v31  ;;  %2579 = vmatmul.mubr.f32.gmra.mrb[24].mxu1 %v2854_v30 }
 0x227   :  { %v1353_v0 = vmul.f32 1.442695, %v1325_v50  ;;  %v1856_v48 = vmul.f32 1.442695, %v1829_v18  ;;  %v3848_v59 = vpop.f32.mrb[4].mxu1  ;;  %2869 = vrcp.f32 %v3840_v6 }
 0x228   :  { %v1811_v45 = vpop.xlane.xlu1 %1810  ;;  %v3851_v46 = vpop.f32.mrb[5].mxu1 }
 0x229   :  { %v2856_v9 = vpop.eup %2855  ;;  %2871 = vpow2.f32 %v1353_v0  ;;  %v1830_v36 = vsub.f32 %v3737_v12, %v1811_v45  ;;  %v1308_v57 = vpop.xlane.xlu0 %1307 }
 0x22a   :  { %v2858_v29 = vpop.eup %2857  ;;  %2873 = vpow2.f32 %v1856_v48  ;;  %v1326_v61 = vsub.f32 %v3740_v39, %v1308_v57 }
 0x22b   :  { %v2860_v27 = vpop.eup %2859  ;;  %v1858_v42 = vmul.f32 1.442695, %v1830_v36  ;;  %2525 = vmatprep.mubr.f32.mxu0 %v2858_v29  ;;  %2875 = vrcp.f32 %v3798_v34 }
 0x22c   :  { %v2862_v33 = vpop.eup %2861  ;;  %v1355_v13 = vmul.f32 1.442695, %v1326_v61  ;;  %1040 = vperm.xlu0 %2745, %v2860_v27   ;;  %2526 = vmatmul.mubr.f32.gmra.mrb[26].mxu0 %v2856_v9  ;;  %v88_v61 = vlaneseq }
 0x22d   :  { %2877 = vpow2.f32 %v1858_v42  ;;  %1035 = vperm.xlu1 %2746, %v2862_v33   ;;  %v2864_v63 = vpop.eup %2863 }
 0x22e   :  { %2879 = vpow2.f32 %v1355_v13  ;;  %v1813_v37 = vpop.xlane.xlu0 %1812  ;;  %v3868_v27 = vand.u32 127, %v88_v61 }
 0x22f   :  { %v2866_v12 = vpop.eup %2865  ;;  %v1831_v8 = vsub.f32 %v3747_v20, %v1813_v37  ;;  %2881 = vrcp.f32 %v3845_v58 }
 0x230   :  { %v2868_v1 = vpop.eup %2867  ;;  %580 = vperm.xlu0 %2745, %v2864_v63   ;;  %2581 = vmatprep.mubr.f32.mxu1 %v2866_v12  ;;  %vm1129_vm0 = vcmp.ge.s32.totalorder %v3868_v27, 8  ;;  %vm1130_vm1 = vcmp.lt.s32.totalorder %v3868_v27, 16  ;;  %vm625_vm2 = vcmp.lt.s32.totalorder %v3868_v27, 8  ;;  %vm1634_vm4 = vcmp.ge.s32.totalorder %v3868_v27, 16 }
 0x231   :  { %v1860_v39 = vmul.f32 1.442695, %v1831_v8  ;;  %545 = vperm.xlu1 %2746, %v2868_v1   ;;  %v2870_v56 = vpop.eup %2869  ;;  %vm3874_vm3 = vmand %vm1129_vm0, %vm1130_vm1  ;;  %vm1635_vm5 = vcmp.lt.s32.totalorder %v3868_v27, 24  ;;  %vm2139_vm7 = vcmp.ge.s32.totalorder %v3868_v27, 24  ;;  %vm2140_vm8 = vcmp.lt.s32.totalorder %v3868_v27, 32 }
 0x232   :  { %v1312_v15 = vpop.xlane.xlu0 %1311  ;;  %vm4169_vm6 = vmand %vm1634_vm4, %vm1635_vm5 }
 0x233   :  { %v2872_v52 = vpop.eup %2871  ;;  %2883 = vpow2.f32 %v1860_v39  ;;  %v1328_v19 = vsub.f32 %v3752_v23, %v1312_v15  ;;  %v1310_v16 = vpop.xlane.xlu1 %1309  ;;  %vm4186_vm9 = vmand %vm2139_vm7, %vm2140_vm8 }
 0x234   :  { %v2874_v60 = vpop.eup %2873  ;;  %v1327_v24 = vsub.f32 %v3755_v62, %v1310_v16  ;;  %2528 = vmatprep.mubr.f32.mxu0 %v2872_v52  ;;  %2885 = vrcp.f32 %v3801_v44 }
 0x235   :  { %v1359_v28 = vmul.f32 1.442695, %v1328_v19  ;;  %1050 = vperm.xlu1 %2746, %v2870_v56   ;;  %2582 = vmatmul.mubr.f32.gmra.mrb[26].mxu1 %v2874_v60  ;;  %v2876_v20 = vpop.eup %2875 }
 0x236   :  { %v1357_v35 = vmul.f32 1.442695, %v1327_v24 }
 0x237   :  { %v2878_v3 = vpop.eup %2877 }
 0x238   :  { %v2880_v55 = vpop.eup %2879  ;;  %2887 = vpow2.f32 %v1357_v35  ;;  %v1815_v38 = vpop.xlane.xlu1 %1814  ;;  %2584 = vmatprep.mubr.f32.mxu1 %v2878_v3 }
 0x239   :  { %2889 = vpow2.f32 %v1359_v28  ;;  %540 = vperm.xlu1 %2746, %v2876_v20   ;;  %v1832_v23 = vsub.f32 %v3761_v32, %v1815_v38  ;;  %2529 = vmatmul.mubr.f32.gmra.mrb[28].mxu0 %v2880_v55  ;;  %v2882_v7 = vpop.eup %2881 }
 0x23a   :  { %2891 = vrcp.f32 %v3848_v59 }
 0x23b   :  { %v1862_v62 = vmul.f32 1.442695, %v1832_v23 }
 0x23c   :  { %v1817_v51 = vpop.xlane.xlu0 %1816 }
 0x23d   :  { %v2884_v25 = vpop.eup %2883  ;;  %2893 = vpow2.f32 %v1862_v62  ;;  %1045 = vperm.xlu1 %2746, %v2882_v7   ;;  %v1833_v41 = vsub.f32 %v3765_v40, %v1817_v51 }
 0x23e   :  { %2895 = vrcp.f32 %v3803_v26  ;;  %2585 = vmatmul.mubr.f32.gmra.mrb[28].mxu1 %v2884_v25  ;;  %v2886_v50 = vpop.eup %2885 }
 0x23f   :  { %v1864_v30 = vmul.f32 1.442695, %v1833_v41 }
 0x241   :  { %2897 = vpow2.f32 %v1864_v30  ;;  %555 = vperm.xlu1 %2746, %v2886_v50  }
 0x242   :  { %v2888_v18 = vpop.eup %2887  ;;  %2899 = vrcp.f32 %v3851_v46 }
 0x243   :  { %v2890_v32 = vpop.eup %2889  ;;  %2531 = vmatprep.mubr.f32.mxu0 %v2888_v18  ;;  %2901 = vrcp.f32 %v3806_v43 }
 0x244   :  { %v2892_v0 = vpop.eup %2891  ;;  %2532 = vmatmul.mubr.f32.gmra.mrb[30].mxu0 %v2890_v32 }
 0x245   :  { %1060 = vperm.xlu1 %2746, %v2892_v0  }
 0x247   :  { %v2894_v48 = vpop.eup %2893 }
 0x248   :  { %v2896_v45 = vpop.eup %2895  ;;  %2587 = vmatprep.mubr.f32.mxu1 %v2894_v48 }
 0x249   :  { %550 = vperm.xlu1 %2746, %v2896_v45  }
 0x24b   :  { %v2898_v40 = vpop.eup %2897 }
 0x24c   :  { %v2900_v9 = vpop.eup %2899  ;;  %2588 = vmatmul.mubr.f32.gmra.mrb[30].mxu1 %v2898_v40 }
 0x24d   :  { %1055 = vperm.xlu1 %2746, %v2900_v9   ;;  %v2902_v36 = vpop.eup %2901 }
 0x251   :  { %565 = vperm.xlu1 %2746, %v2902_v36  }
 0x28a   :  { %v536_v42 = vpop.permute.xlu0 %535 }
 0x28b   :  { %v531_v57 = vpop.permute.xlu1 %530  ;;  %v609_v33 = vmul.f32 %v3787_v53, %v536_v42 }
 0x28c   :  { %v608_v29 = vmul.f32 %v531_v57, %v3791_v5 }
 0x28d   :  { %v3883_v12 = vsel %vm625_vm2, %v609_v33, 0.0 }
 0x28e   :  { %v3890_v53 = vsel %vm625_vm2, %v608_v29, 0.0 }
 0x2ab   :  { %v1041_v63 = vpop.permute.xlu0 %1040 }
 0x2ac   :  { %v3879_v37 = vmul.f32 %v3833_v54, %v1041_v63  ;;  %v1036_v5 = vpop.permute.xlu1 %1035 }
 0x2ad   :  { %v3886_v8 = vmul.f32 %v1036_v5, %v3835_v2 }
 0x2b0   :  { %v546_v39 = vpop.permute.xlu1 %545 }
 0x2b1   :  { %v611_v56 = vmul.f32 %v3795_v31, %v546_v39 }
 0x2b3   :  { %v3906_v52 = vsel %vm625_vm2, %v611_v56, 0.0 }
 0x2b4   :  { %v1051_v15 = vpop.permute.xlu1 %1050 }
 0x2b5   :  { %v3902_v2 = vmul.f32 %v3840_v6, %v1051_v15 }
 0x2b8   :  { %v541_v16 = vpop.permute.xlu1 %540 }
 0x2b9   :  { %v610_v60 = vmul.f32 %v541_v16, %v3798_v34 }
 0x2bb   :  { %v3913_v24 = vpop.f32.mrb[6].mxu1  ;;  %v3923_v20 = vsel %vm625_vm2, %v610_v60, 0.0 }
 0x2bc   :  { %v1046_v28 = vpop.permute.xlu1 %1045  ;;  %2903 = vrcp.f32 %v3913_v24  ;;  %v3916_v31 = vpop.f32.mrb[7].mxu1 }
 0x2bd   :  { %v3919_v6 = vmul.f32 %v1046_v28, %v3845_v58  ;;  %2905 = vrcp.f32 %v3808_v21 }
 0x2be   :  { %2907 = vrcp.f32 %v3916_v31 }
 0x2bf   :  { %v3929_v34 = vpop.f32.mrb[8].mxu1 }
 0x2c0   :  { %v556_v3 = vpop.permute.xlu1 %555  ;;  %v3932_v55 = vpop.f32.mrb[9].mxu1 }
 0x2c1   :  { %v613_v38 = vmul.f32 %v3801_v44, %v556_v3 }
 0x2c3   :  { %v3935_v58 = vpop.f32.mrb[10].mxu1  ;;  %v3946_v25 = vsel %vm625_vm2, %v613_v38, 0.0 }
 0x2c4   :  { %v1061_v23 = vpop.permute.xlu1 %1060  ;;  %v3938_v62 = vpop.f32.mrb[11].mxu1 }
 0x2c5   :  { %v3941_v7 = vmul.f32 %v3848_v59, %v1061_v23  ;;  %2909 = vrcp.f32 %v3938_v62 }
 0x2c6   :  { %v2904_v51 = vpop.eup %2903  ;;  %2911 = vrcp.f32 %v3812_v22 }
 0x2c7   :  { %v3952_v41 = vpop.f32.mrb[12].mxu1  ;;  %1070 = vperm.xlu1 %2746, %v2904_v51   ;;  %2913 = vrcp.f32 %v3825_v49  ;;  %v2906_v50 = vpop.eup %2905 }
 0x2c8   :  { %v551_v30 = vpop.permute.xlu1 %550  ;;  %v3955_v59 = vpop.f32.mrb[13].mxu1  ;;  %2915 = vrcp.f32 %v3929_v34 }
 0x2c9   :  { %v612_v18 = vmul.f32 %v551_v30, %v3803_v26  ;;  %2917 = vrcp.f32 %v3955_v59  ;;  %v2908_v40 = vpop.eup %2907 }
 0x2ca   :  { %2919 = vrcp.f32 %v3814_v17 }
 0x2cb   :  { %v3959_v32 = vpop.f32.mrb[14].mxu1  ;;  %560 = vperm.xlu1 %2746, %v2906_v50   ;;  %v3970_v9 = vsel %vm625_vm2, %v612_v18, 0.0  ;;  %2921 = vrcp.f32 %v3831_v4 }
 0x2cc   :  { %v1056_v0 = vpop.permute.xlu1 %1055  ;;  %v3962_v48 = vpop.f32.mrb[15].mxu1  ;;  %2923 = vrcp.f32 %v3932_v55 }
 0x2cd   :  { %v3966_v45 = vmul.f32 %v1056_v0, %v3851_v46  ;;  %2925 = vrcp.f32 %v3962_v48 }
 0x2ce   :  { %2927 = vrcp.f32 %v3818_v14 }
 0x2cf   :  { %v2910_v36 = vpop.eup %2909  ;;  %1065 = vperm.xlu1 %2746, %v2908_v40  }
 0x2d0   :  { %1085 = vperm.xlu0 %2745, %v2910_v36   ;;  %v2912_v57 = vpop.eup %2911 }
 0x2d1   :  { %v2914_v29 = vpop.eup %2913 }
 0x2d2   :  { %v3978_v46 = vpop.f32.mrb[16].mxu0  ;;  %v2916_v42 = vpop.eup %2915 }
 0x2d3   :  { %575 = vperm.xlu1 %2746, %v2912_v57   ;;  %v3980_v61 = vpop.f32.mrb[17].mxu0  ;;  %v2918_v63 = vpop.eup %2917 }
 0x2d4   :  { %590 = vperm.xlu0 %2745, %v2914_v29   ;;  %2929 = vrcp.f32 %v3980_v61  ;;  %v2920_v39 = vpop.eup %2919 }
 0x2d5   :  { %v2922_v15 = vpop.eup %2921  ;;  %2931 = vrcp.f32 %v3935_v58 }
 0x2d6   :  { %v3984_v33 = vpop.f32.mrb[16].mxu1  ;;  %v2924_v60 = vpop.eup %2923 }
 0x2d7   :  { %v3986_v5 = vpop.f32.mrb[17].mxu1  ;;  %1080 = vperm.xlu1 %2746, %v2916_v42   ;;  %v2926_v3 = vpop.eup %2925 }
 0x2d8   :  { %1095 = vperm.xlu0 %2745, %v2918_v63   ;;  %2933 = vrcp.f32 %v3986_v5  ;;  %v2928_v23 = vpop.eup %2927 }
 0x2d9   :  { %2935 = vrcp.f32 %v3823_v10 }
 0x2da   :  { %v3990_v56 = vpop.f32.mrb[18].mxu0 }
 0x2db   :  { %570 = vperm.xlu1 %2746, %v2920_v39   ;;  %v3992_v16 = vpop.f32.mrb[19].mxu0 }
 0x2dc   :  { %600 = vperm.xlu0 %2745, %v2922_v15   ;;  %2937 = vrcp.f32 %v3992_v16 }
 0x2dd   :  { %2939 = vrcp.f32 %v3952_v41 }
 0x2de   :  { %v3996_v28 = vpop.f32.mrb[18].mxu1  ;;  %v2930_v30 = vpop.eup %2929 }
 0x2df   :  { %v3998_v38 = vpop.f32.mrb[19].mxu1  ;;  %1075 = vperm.xlu1 %2746, %v2924_v60   ;;  %v2932_v18 = vpop.eup %2931 }
 0x2e0   :  { %1105 = vperm.xlu0 %2745, %v2926_v3   ;;  %2941 = vrcp.f32 %v3998_v38 }
 0x2e1   :  { %2943 = vrcp.f32 %v3828_v47 }
 0x2e2   :  { %v4002_v51 = vpop.f32.mrb[20].mxu0  ;;  %v2934_v40 = vpop.eup %2933 }
 0x2e3   :  { %585 = vperm.xlu1 %2746, %v2928_v23   ;;  %v4004_v50 = vpop.f32.mrb[21].mxu0  ;;  %v2936_v57 = vpop.eup %2935 }
 0x2e4   :  { %1540 = vperm.xlu0 %2745, %v2930_v30   ;;  %2945 = vrcp.f32 %v4004_v50 }
 0x2e5   :  { %2947 = vrcp.f32 %v3959_v32 }
 0x2e6   :  { %v4008_v0 = vpop.f32.mrb[20].mxu1  ;;  %v2938_v42 = vpop.eup %2937 }
 0x2e7   :  { %4522 = vst [vmem:[#allocation3_spill] sm:$0xff] %v4008_v0  ;;  %v4010_v36 = vpop.f32.mrb[21].mxu1  ;;  %1090 = vperm.xlu1 %2746, %v2932_v18   ;;  %v2940_v39 = vpop.eup %2939 }
 0x2e8   :  { %2045 = vperm.xlu0 %2745, %v2934_v40   ;;  %2949 = vrcp.f32 %v4010_v36 }
 0x2e9   :  { %2951 = vrcp.f32 %v3978_v46 }
 0x2ea   :  { %v4014_v29 = vpop.f32.mrb[22].mxu0  ;;  %v2942_v15 = vpop.eup %2941 }
 0x2eb   :  { %4523 = vst [vmem:[#allocation5_spill] sm:$0xff] %v4014_v29  ;;  %595 = vperm.xlu1 %2746, %v2936_v57   ;;  %v4016_v63 = vpop.f32.mrb[23].mxu0  ;;  %v2944_v23 = vpop.eup %2943 }
 0x2ec   :  { %1550 = vperm.xlu0 %2745, %v2938_v42   ;;  %2953 = vrcp.f32 %v4016_v63 }
 0x2ed   :  { %2955 = vrcp.f32 %v3984_v33 }
 0x2ee   :  { %v2946_v30 = vpop.eup %2945 }
 0x2ef   :  { %v4020_v60 = vpop.f32.mrb[22].mxu1  ;;  %1100 = vperm.xlu1 %2746, %v2940_v39   ;;  %v2948_v57 = vpop.eup %2947 }
 0x2f0   :  { %4524 = vst [vmem:[#allocation6_spill] sm:$0xff] %v4020_v60  ;;  %v4023_v3 = vpop.f32.mrb[23].mxu1  ;;  %2055 = vperm.xlu0 %2745, %v2942_v15  }
 0x2f1   :  { %2957 = vrcp.f32 %v4023_v3 }
 0x2f2   :  { %v2950_v42 = vpop.eup %2949  ;;  %2959 = vrcp.f32 %v3990_v56 }
 0x2f3   :  { %605 = vperm.xlu1 %2746, %v2944_v23   ;;  %v2952_v15 = vpop.eup %2951 }
 0x2f4   :  { %1560 = vperm.xlu0 %2745, %v2946_v30  }
 0x2f5   :  { %v4027_v18 = vpop.f32.mrb[24].mxu0 }
 0x2f6   :  { %4525 = vst [vmem:[#allocation9_spill] sm:$0xff] %v4027_v18  ;;  %v4030_v40 = vpop.f32.mrb[25].mxu0  ;;  %v2954_v44 = vpop.eup %2953 }
 0x2f7   :  { %1110 = vperm.xlu1 %2746, %v2948_v57   ;;  %2961 = vrcp.f32 %v4030_v40  ;;  %v2956_v30 = vpop.eup %2955 }
 0x2f8   :  { %2065 = vperm.xlu0 %2745, %v2950_v42   ;;  %2963 = vrcp.f32 %v3996_v28 }
 0x2f9   :  { %v4034_v39 = vpop.f32.mrb[24].mxu1 }
 0x2fa   :  { %4526 = vst [vmem:[#allocation4_spill] sm:$0xff] %v4034_v39  ;;  %v4036_v23 = vpop.f32.mrb[25].mxu1 }
 0x2fb   :  { %1545 = vperm.xlu1 %2746, %v2952_v15   ;;  %2965 = vrcp.f32 %v4036_v23  ;;  %v2958_v19 = vpop.eup %2957 }
 0x2fc   :  { %1570 = vperm.xlu0 %2745, %v2954_v44   ;;  %2967 = vrcp.f32 %v4002_v51  ;;  %v2960_v1 = vpop.eup %2959 }
 0x2ff   :  { %2050 = vperm.xlu1 %2746, %v2956_v30   ;;  %v4040_v57 = vpop.f32.mrb[26].mxu0 }
 0x300   :  { %4527 = vst [vmem:[#allocation7_spill] sm:$0xff] %v4040_v57  ;;  %v4043_v42 = vpop.f32.mrb[27].mxu0  ;;  %2075 = vperm.xlu0 %2745, %v2958_v19  }
 0x301   :  { %2969 = vrcp.f32 %v4043_v42  ;;  %v2962_v26 = vpop.eup %2961 }
 0x302   :  { %2971 = vrcp.f32 %v4008_v0  ;;  %v2964_v44 = vpop.eup %2963 }
 0x303   :  { %1555 = vperm.xlu1 %2746, %v2960_v1   ;;  %2973 = vrcp.f32 %v4014_v29 }
 0x304   :  { %1580 = vperm.xlu0 %2745, %v2962_v26  }
 0x305   :  { %v2966_v15 = vpop.eup %2965 }
 0x306   :  { %v2968_v54 = vpop.eup %2967 }
 0x307   :  { %2060 = vperm.xlu1 %2746, %v2964_v44  }
 0x308   :  { %v4048_v30 = vpop.f32.mrb[26].mxu1  ;;  %2085 = vperm.xlu0 %2745, %v2966_v15  }
 0x309   :  { %v4050_v35 = vpop.f32.mrb[27].mxu1 }
 0x30a   :  { %2975 = vrcp.f32 %v4050_v35 }
 0x30b   :  { %v2970_v19 = vpop.eup %2969  ;;  %1565 = vperm.xlu1 %2746, %v2968_v54   ;;  %2977 = vrcp.f32 %v4020_v60 }
 0x30c   :  { %v4054_v1 = vpop.f32.mrb[28].mxu0  ;;  %1590 = vperm.xlu0 %2745, %v2970_v19   ;;  %v2972_v44 = vpop.eup %2971 }
 0x30d   :  { %4528 = vst [vmem:[#allocation8_spill] sm:$0xff] %v4054_v1  ;;  %v4056_v26 = vpop.f32.mrb[29].mxu0  ;;  %v2974_v29 = vpop.eup %2973 }
 0x30e   :  { %4529 = vst [vmem:[#allocation10_spill] sm:$0xff] %v4056_v26  ;;  %2979 = vrcp.f32 %v4056_v26 }
 0x30f   :  { %2070 = vperm.xlu1 %2746, %v2972_v44   ;;  %2981 = vrcp.f32 %v4027_v18 }
 0x311   :  { %v4060_v15 = vpop.f32.mrb[28].mxu1 }
 0x312   :  { %4530 = vst [vmem:[#allocation2_spill] sm:$0xff] %v4060_v15  ;;  %v4062_v0 = vpop.f32.mrb[29].mxu1 }
 0x313   :  { %4531 = vst [vmem:[#allocation11_spill] sm:$0xff] %v4062_v0  ;;  %2983 = vrcp.f32 %v4062_v0  ;;  %1575 = vperm.xlu1 %2746, %v2974_v29  }
 0x314   :  { %v2976_v54 = vpop.eup %2975  ;;  %2985 = vrcp.f32 %v4034_v39 }
 0x315   :  { %2095 = vperm.xlu0 %2745, %v2976_v54   ;;  %v2978_v19 = vpop.eup %2977  ;;  %2987 = vrcp.f32 %v4040_v57 }
 0x317   :  { %2080 = vperm.xlu1 %2746, %v2978_v19   ;;  %v4066_v60 = vpop.f32.mrb[30].mxu0 }
 0x318   :  { %4532 = vst [vmem:[#allocation12_spill] sm:$0xff] %v4066_v60  ;;  %v2980_v26 = vpop.eup %2979  ;;  %v4069_v44 = vpop.f32.mrb[31].mxu0 }
 0x319   :  { %2989 = vrcp.f32 %v4069_v44  ;;  %1600 = vperm.xlu0 %2745, %v2980_v26   ;;  %v2982_v18 = vpop.eup %2981 }
 0x31a   :  { %2991 = vrcp.f32 %v4048_v30 }
 0x31b   :  { %1585 = vperm.xlu1 %2746, %v2982_v18   ;;  %2993 = vrcp.f32 %v4054_v1 }
 0x31d   :  { %v2984_v29 = vpop.eup %2983 }
 0x31e   :  { %v2986_v0 = vpop.eup %2985  ;;  %2105 = vperm.xlu0 %2745, %v2984_v29  }
 0x31f   :  { %v4073_v54 = vpop.f32.mrb[30].mxu1  ;;  %2090 = vperm.xlu1 %2746, %v2986_v0   ;;  %v2988_v57 = vpop.eup %2987 }
 0x320   :  { %4533 = vst [vmem:[#allocation13_spill] sm:$0xff] %v4073_v54  ;;  %v4076_v19 = vpop.f32.mrb[31].mxu1 }
 0x321   :  { %4534 = vst [vmem:[#allocation14_spill] sm:$0xff] %v4076_v19  ;;  %2995 = vrcp.f32 %v4076_v19 }
 0x322   :  { %2997 = vrcp.f32 %v4060_v15 }
 0x323   :  { %v2990_v39 = vpop.eup %2989  ;;  %1595 = vperm.xlu1 %2746, %v2988_v57   ;;  %2999 = vrcp.f32 %v4066_v60  ;;  %v566_v57 = vpop.permute.xlu1 %565 }
 0x324   :  { %1610 = vperm.xlu0 %2745, %v2990_v39   ;;  %v2992_v18 = vpop.eup %2991  ;;  %3001 = vrcp.f32 %v4073_v54  ;;  %v615_v15 = vmul.f32 %v3806_v43, %v566_v57 }
 0x325   :  { %v2994_v26 = vpop.eup %2993 }
 0x326   :  { %v4088_v60 = vsel %vm625_vm2, %v615_v15, 0.0 }
 0x327   :  { %2100 = vperm.xlu1 %2746, %v2992_v18  }
 0x32b   :  { %v2996_v29 = vpop.eup %2995  ;;  %1605 = vperm.xlu1 %2746, %v2994_v26  }
 0x32c   :  { %2115 = vperm.xlu0 %2745, %v2996_v29   ;;  %v2998_v0 = vpop.eup %2997  ;;  %v581_v29 = vpop.permute.xlu0 %580 }
 0x32d   :  { %v3000_v1 = vpop.eup %2999 }
 0x32e   :  { %v3002_v19 = vpop.eup %3001 }
 0x32f   :  { %2110 = vperm.xlu1 %2746, %v2998_v0   ;;  %v618_v0 = vmul.f32 %v581_v29, %v3820_v11 }
 0x331   :  { %v4108_v26 = vsel %vm625_vm2, %v618_v0, 0.0 }
 0x333   :  { %1615 = vperm.xlu1 %2746, %v3000_v1  }
 0x337   :  { %2120 = vperm.xlu1 %2746, %v3002_v19  }
 0x346   :  { %v1071_v39 = vpop.permute.xlu1 %1070 }
 0x347   :  { %v4084_v18 = vmul.f32 %v3913_v24, %v1071_v39 }
 0x34a   :  { %v561_v1 = vpop.permute.xlu1 %560 }
 0x34b   :  { %v614_v19 = vmul.f32 %v561_v1, %v3808_v21 }
 0x34d   :  { %v4101_v15 = vsel %vm625_vm2, %v614_v19, 0.0 }
 0x34e   :  { %v1066_v43 = vpop.permute.xlu1 %1065 }
 0x34f   :  { %v4097_v57 = vmul.f32 %v1066_v43, %v3916_v31  ;;  %v1086_v24 = vpop.permute.xlu0 %1085 }
 0x350   :  { %v4104_v39 = vmul.f32 %v1086_v24, %v3938_v62 }
 0x352   :  { %v576_v31 = vpop.permute.xlu1 %575 }
 0x353   :  { %v617_v29 = vmul.f32 %v3812_v22, %v576_v31  ;;  %v591_v1 = vpop.permute.xlu0 %590 }
 0x354   :  { %v620_v62 = vmul.f32 %v591_v1, %v3825_v49 }
 0x355   :  { %v4125_v24 = vsel %vm625_vm2, %v617_v29, 0.0 }
 0x356   :  { %v1081_v19 = vpop.permute.xlu1 %1080  ;;  %v4132_v11 = vsel %vm625_vm2, %v620_v62, 0.0 }
 0x357   :  { %v4121_v0 = vmul.f32 %v3929_v34, %v1081_v19  ;;  %v1096_v43 = vpop.permute.xlu0 %1095 }
 0x358   :  { %v4128_v21 = vmul.f32 %v1096_v43, %v3955_v59 }
 0x35a   :  { %v571_v34 = vpop.permute.xlu1 %570 }
 0x35b   :  { %v601_v31 = vpop.permute.xlu0 %600  ;;  %v616_v29 = vmul.f32 %v571_v34, %v3814_v17 }
 0x35c   :  { %v622_v59 = vmul.f32 %v601_v31, %v3831_v4 }
 0x35d   :  { %v4149_v43 = vsel %vm625_vm2, %v616_v29, 0.0 }
 0x35e   :  { %v1076_v1 = vpop.permute.xlu1 %1075  ;;  %v4158_v17 = vsel %vm625_vm2, %v622_v59, 0.0 }
 0x35f   :  { %v4145_v62 = vmul.f32 %v1076_v1, %v3932_v55  ;;  %v1106_v19 = vpop.permute.xlu0 %1105  ;;  %v4537_v1 = vsel %vm3874_vm3, %v3886_v8, %v3890_v53  ;;  %v4197_v8 = vld [vmem:[%s4463_s4] ss:$0 sm:$0xff] }
 0x360   :  { %v4152_v22 = vmul.f32 %v1106_v19, %v3962_v48 }
 0x362   :  { %v586_v48 = vpop.permute.xlu1 %585 }
 0x363   :  { %v619_v34 = vmul.f32 %v3818_v14, %v586_v48  ;;  %v1541_v29 = vpop.permute.xlu0 %1540 }
 0x364   :  { %v1618_v59 = vmul.f32 %v1541_v29, %v3980_v61 }
 0x365   :  { %v4192_v29 = vsel %vm625_vm2, %v619_v34, 0.0 }
 0x366   :  { %v1637_v19 = vsel %vm4169_vm6, %v1618_v59, %v4537_v1  ;;  %v1091_v14 = vpop.permute.xlu1 %1090 }
 0x367   :  { %v4184_v48 = vmul.f32 %v3935_v58, %v1091_v14  ;;  %v2046_v61 = vpop.permute.xlu0 %2045 }
 0x368   :  { %v2123_v53 = vmul.f32 %v2046_v61, %v3986_v5  ;;  %v4540_v5 = vsel %vm3874_vm3, %v3919_v6, %v3923_v20 }
 0x36a   :  { %v2142_v59 = vsel %vm4186_vm9, %v2123_v53, %v1637_v19  ;;  %v596_v1 = vpop.permute.xlu1 %595 }
 0x36b   :  { %v2165_v14 = vadd.f32 %v4197_v8, %v2142_v59  ;;  %v621_v34 = vmul.f32 %v3823_v10, %v596_v1  ;;  %v1551_v49 = vpop.permute.xlu0 %1550 }
 0x36c   :  { %v1620_v4 = vmul.f32 %v1551_v49, %v3992_v16 }
 0x36d   :  { %v2181_v54 = vmax.f32 %v2165_v14, 0.0  ;;  %v4224_v16 = vsel %vm625_vm2, %v621_v34, 0.0 }
 0x36e   :  { %v1639_v61 = vsel %vm4169_vm6, %v1620_v4, %v4540_v5  ;;  %v1101_v58 = vpop.permute.xlu1 %1100 }
 0x36f   :  { %2197 = vst [vmem:[%s4464_s5] sm:$0xff] %v2181_v54  ;;  %v4220_v19 = vmul.f32 %v3952_v41, %v1101_v58  ;;  %v2056_v10 = vpop.permute.xlu0 %2055 }
 0x370   :  { %v2125_v49 = vmul.f32 %v2056_v10, %v3998_v38  ;;  %v4541_v38 = vsel %vm3874_vm3, %v3966_v45, %v3970_v9 }
 0x371   :  { %v1145_v6 = vsel %vm3874_vm3, %v4220_v19, %v4224_v16 }
 0x372   :  { %v2144_v20 = vsel %vm4186_vm9, %v2125_v49, %v1639_v61  ;;  %v606_v4 = vpop.permute.xlu1 %605 }
 0x373   :  { %v2167_v54 = vadd.f32 %v4197_v8, %v2144_v20  ;;  %v623_v41 = vmul.f32 %v3828_v47, %v606_v4  ;;  %v1561_v53 = vpop.permute.xlu0 %1560 }
 0x374   :  { %v1622_v58 = vmul.f32 %v1561_v53, %v4004_v50 }
 0x375   :  { %v2183_v59 = vmax.f32 %v2167_v54, 0.0  ;;  %v4251_v50 = vsel %vm625_vm2, %v623_v41, 0.0  ;;  %v4543_v54 = vsel %vm3874_vm3, %v4097_v57, %v4101_v15 }
 0x376   :  { %v1641_v1 = vsel %vm4169_vm6, %v1622_v58, %v4541_v38  ;;  %v1111_v14 = vpop.permute.xlu1 %1110 }
 0x377   :  { %2199 = vst [vmem:[%s4464_s5 + $0x10] sm:$0xff] %v2183_v59  ;;  %v4247_v34 = vmul.f32 %v3959_v32, %v1111_v14  ;;  %v2066_v47 = vpop.permute.xlu0 %2065 }
 0x378   :  { %v2127_v5 = vmul.f32 %v2066_v47, %v4010_v36  ;;  %v4542_v36 = vsel %vm3874_vm3, %v3879_v37, %v3883_v12 }
 0x379   :  { %v1147_v45 = vsel %vm3874_vm3, %v4247_v34, %v4251_v50 }
 0x37a   :  { %v2146_v9 = vsel %vm4186_vm9, %v2127_v5, %v1641_v1  ;;  %v1546_v61 = vpop.permute.xlu1 %1545 }
 0x37b   :  { %v2169_v10 = vadd.f32 %v4197_v8, %v2146_v9  ;;  %v1619_v32 = vmul.f32 %v3978_v46, %v1546_v61  ;;  %v1571_v49 = vpop.permute.xlu0 %1570 }
 0x37c   :  { %v1624_v27 = vmul.f32 %v1571_v49, %v4016_v63 }
 0x37d   :  { %v2185_v20 = vmax.f32 %v2169_v10, 0.0  ;;  %v1638_v4 = vsel %vm4169_vm6, %v1619_v32, %v4542_v36 }
 0x37e   :  { %v1643_v46 = vsel %vm4169_vm6, %v1624_v27, %v4543_v54  ;;  %v2051_v41 = vpop.permute.xlu1 %2050 }
 0x37f   :  { %2201 = vst [vmem:[%s4464_s5 + $0x20] sm:$0xff] %v2185_v20  ;;  %v2124_v63 = vmul.f32 %v3984_v33, %v2051_v41  ;;  %v2076_v53 = vpop.permute.xlu0 %2075 }
 0x380   :  { %v2129_v37 = vmul.f32 %v2076_v53, %v4023_v3  ;;  %v4544_v3 = vsel %vm3874_vm3, %v3902_v2, %v3906_v52 }
 0x381   :  { %v2143_v12 = vsel %vm4186_vm9, %v2124_v63, %v1638_v4 }
 0x382   :  { %v2166_v58 = vadd.f32 %v4197_v8, %v2143_v12  ;;  %v2148_v57 = vsel %vm4186_vm9, %v2129_v37, %v1643_v46  ;;  %v1556_v15 = vpop.permute.xlu1 %1555  ;;  %v4549_v37 = vld [vmem:[#allocation5_spill] sm:$0xff] }
 0x383   :  { %v2171_v59 = vadd.f32 %v4197_v8, %v2148_v57  ;;  %v1621_v38 = vmul.f32 %v3990_v56, %v1556_v15  ;;  %v1581_v1 = vpop.permute.xlu0 %1580  ;;  %v4545_v56 = vsel %vm3874_vm3, %v4145_v62, %v4149_v43 }
 0x384   :  { %v2182_v14 = vmax.f32 %v2166_v58, 0.0  ;;  %v1626_v33 = vmul.f32 %v1581_v1, %v4030_v40  ;;  %v4551_v1 = vld [vmem:[#allocation6_spill] sm:$0xff] }
 0x385   :  { %v2187_v47 = vmax.f32 %v2171_v59, 0.0  ;;  %v1640_v5 = vsel %vm4169_vm6, %v1621_v38, %v4544_v3 }
 0x386   :  { %2198 = vst [vmem:[%s4464_s5 + $0x8] sm:$0xff] %v2182_v14  ;;  %v1645_v40 = vsel %vm4169_vm6, %v1626_v33, %v4545_v56  ;;  %v2061_v9 = vpop.permute.xlu1 %2060 }
 0x387   :  { %2203 = vst [vmem:[%s4464_s5 + $0x30] sm:$0xff] %v2187_v47  ;;  %v2126_v2 = vmul.f32 %v3996_v28, %v2061_v9  ;;  %v2086_v52 = vpop.permute.xlu0 %2085 }
 0x388   :  { %v2131_v61 = vmul.f32 %v2086_v52, %v4036_v23  ;;  %v4546_v23 = vsel %vm3874_vm3, %v3941_v7, %v3946_v25  ;;  %v4548_v7 = vld [vmem:[#allocation3_spill] sm:$0xff] }
 0x389   :  { %v2145_v10 = vsel %vm4186_vm9, %v2126_v2, %v1640_v5  ;;  %v4554_v2 = vld [vmem:[#allocation9_spill] sm:$0xff] }
 0x38a   :  { %v2168_v32 = vadd.f32 %v4197_v8, %v2145_v10  ;;  %v2150_v62 = vsel %vm4186_vm9, %v2131_v61, %v1645_v40  ;;  %v1566_v43 = vpop.permute.xlu1 %1565  ;;  %v4553_v40 = vsel %vm3874_vm3, %v4128_v21, %v4132_v11  ;;  %v4555_v10 = vsel %vm3874_vm3, %v4121_v0, %v4125_v24  ;;  %v4556_v21 = vld [vmem:[#allocation11_spill] sm:$0xff] }
 0x38b   :  { %v2173_v49 = vadd.f32 %v4197_v8, %v2150_v62  ;;  %v1623_v27 = vmul.f32 %v4002_v51, %v1566_v43  ;;  %v1591_v20 = vpop.permute.xlu0 %1590  ;;  %v4547_v51 = vsel %vm3874_vm3, %v4104_v39, %v4108_v26  ;;  %v4550_v39 = vsel %vm3874_vm3, %v4084_v18, %v4088_v60  ;;  %v4552_v18 = vld [vmem:[#allocation10_spill] sm:$0xff] }
 0x38c   :  { %v2184_v36 = vmax.f32 %v2168_v32, 0.0  ;;  %v1628_v28 = vmul.f32 %v1591_v20, %v4043_v42 }
 0x38d   :  { %v2189_v4 = vmax.f32 %v2173_v49, 0.0  ;;  %v1642_v54 = vsel %vm4169_vm6, %v1623_v27, %v4546_v23  ;;  %v4557_v49 = vld [vmem:[#allocation4_spill] sm:$0xff]  ;;  %v4558_v23 = vld [vmem:[#allocation7_spill] sm:$0xff] }
 0x38e   :  { %2200 = vst [vmem:[%s4464_s5 + $0x18] sm:$0xff] %v2184_v36  ;;  %v1647_v42 = vsel %vm4169_vm6, %v1628_v28, %v4547_v51  ;;  %v2071_v46 = vpop.permute.xlu1 %2070 }
 0x38f   :  { %2205 = vst [vmem:[%s4464_s5 + $0x40] sm:$0xff] %v2189_v4  ;;  %v2128_v25 = vmul.f32 %v4548_v7, %v2071_v46  ;;  %v4559_v7 = vsel %vm3874_vm3, %v4184_v48, %v4192_v29 }
 0x391   :  { %v2147_v41 = vsel %vm4186_vm9, %v2128_v25, %v1642_v54 }
 0x392   :  { %v2170_v63 = vadd.f32 %v4197_v8, %v2147_v41  ;;  %v1576_v53 = vpop.permute.xlu1 %1575 }
 0x393   :  { %v1625_v12 = vmul.f32 %v4549_v37, %v1576_v53 }
 0x394   :  { %v2186_v58 = vmax.f32 %v2170_v63, 0.0  ;;  %v2096_v26 = vpop.permute.xlu0 %2095 }
 0x395   :  { %v1644_v57 = vsel %vm4169_vm6, %v1625_v12, %v4550_v39  ;;  %v2133_v15 = vmul.f32 %v2096_v26, %v4050_v35  ;;  %v4561_v12 = vld [vmem:[#allocation8_spill] sm:$0xff] }
 0x396   :  { %2202 = vst [vmem:[%s4464_s5 + $0x28] sm:$0xff] %v2186_v58  ;;  %v2081_v59 = vpop.permute.xlu1 %2080 }
 0x397   :  { %v2152_v38 = vsel %vm4186_vm9, %v2133_v15, %v1647_v42  ;;  %v2130_v14 = vmul.f32 %v4551_v1, %v2081_v59 }
 0x398   :  { %v2175_v33 = vadd.f32 %v4197_v8, %v2152_v38  ;;  %v1601_v47 = vpop.permute.xlu0 %1600  ;;  %v4563_v38 = vld [vmem:[#allocation2_spill] sm:$0xff] }
 0x399   :  { %v2149_v60 = vsel %vm4186_vm9, %v2130_v14, %v1644_v57  ;;  %v1630_v3 = vmul.f32 %v1601_v47, %v4552_v18  ;;  %v4562_v57 = vld [vmem:[#allocation14_spill] sm:$0xff] }
 0x39a   :  { %v2191_v5 = vmax.f32 %v2175_v33, 0.0  ;;  %v2172_v35 = vadd.f32 %v4197_v8, %v2149_v60  ;;  %v1586_v56 = vpop.permute.xlu1 %1585 }
 0x39b   :  { %v1649_v9 = vsel %vm4169_vm6, %v1630_v3, %v4553_v40  ;;  %v1627_v52 = vmul.f32 %v4554_v2, %v1586_v56 }
 0x39c   :  { %2207 = vst [vmem:[%s4464_s5 + $0x50] sm:$0xff] %v2191_v5  ;;  %v2188_v61 = vmax.f32 %v2172_v35, 0.0  ;;  %v4565_v5 = vld [vmem:[#allocation13_spill] sm:$0xff] }
 0x39d   :  { %v1646_v32 = vsel %vm4169_vm6, %v1627_v52, %v4555_v10  ;;  %v2106_v62 = vpop.permute.xlu0 %2105 }
 0x39e   :  { %2204 = vst [vmem:[%s4464_s5 + $0x38] sm:$0xff] %v2188_v61  ;;  %v2135_v11 = vmul.f32 %v2106_v62, %v4556_v21  ;;  %v2091_v43 = vpop.permute.xlu1 %2090 }
 0x39f   :  { %v2132_v27 = vmul.f32 %v4557_v49, %v2091_v43 }
 0x3a0   :  { %v2154_v20 = vsel %vm4186_vm9, %v2135_v11, %v1649_v9 }
 0x3a1   :  { %v2177_v36 = vadd.f32 %v4197_v8, %v2154_v20  ;;  %v2151_v0 = vsel %vm4186_vm9, %v2132_v27, %v1646_v32 }
 0x3a2   :  { %v2174_v24 = vadd.f32 %v4197_v8, %v2151_v0  ;;  %v1596_v28 = vpop.permute.xlu1 %1595 }
 0x3a3   :  { %v2193_v4 = vmax.f32 %v2177_v36, 0.0  ;;  %v1629_v54 = vmul.f32 %v4558_v23, %v1596_v28  ;;  %v1611_v51 = vpop.permute.xlu0 %1610 }
 0x3a4   :  { %v2190_v42 = vmax.f32 %v2174_v24, 0.0  ;;  %v1632_v46 = vmul.f32 %v1611_v51, %v4069_v44  ;;  %v4560_v44 = vsel %vm3874_vm3, %v4152_v22, %v4158_v17 }
 0x3a5   :  { %2209 = vst [vmem:[%s4464_s5 + $0x60] sm:$0xff] %v2193_v4  ;;  %v1648_v25 = vsel %vm4169_vm6, %v1629_v54, %v4559_v7 }
 0x3a6   :  { %2206 = vst [vmem:[%s4464_s5 + $0x48] sm:$0xff] %v2190_v42  ;;  %v1651_v41 = vsel %vm4169_vm6, %v1632_v46, %v4560_v44  ;;  %v2101_v63 = vpop.permute.xlu1 %2100 }
 0x3a7   :  { %v2134_v53 = vmul.f32 %v4048_v30, %v2101_v63 }
 0x3a9   :  { %v2153_v48 = vsel %vm4186_vm9, %v2134_v53, %v1648_v25 }
 0x3aa   :  { %v2176_v29 = vadd.f32 %v4197_v8, %v2153_v48  ;;  %v1606_v37 = vpop.permute.xlu1 %1605 }
 0x3ab   :  { %v1631_v58 = vmul.f32 %v4561_v12, %v1606_v37  ;;  %v2116_v26 = vpop.permute.xlu0 %2115 }
 0x3ac   :  { %v2192_v39 = vmax.f32 %v2176_v29, 0.0  ;;  %v2137_v15 = vmul.f32 %v2116_v26, %v4562_v57 }
 0x3ad   :  { %v1650_v30 = vsel %vm4169_vm6, %v1631_v58, %v1145_v6  ;;  %v4564_v6 = vld [vmem:[#allocation12_spill] sm:$0xff] }
 0x3ae   :  { %2208 = vst [vmem:[%s4464_s5 + $0x58] sm:$0xff] %v2192_v39  ;;  %v2156_v22 = vsel %vm4186_vm9, %v2137_v15, %v1651_v41  ;;  %v2111_v17 = vpop.permute.xlu1 %2110 }
 0x3af   :  { %v2179_v59 = vadd.f32 %v4197_v8, %v2156_v22  ;;  %v2136_v1 = vmul.f32 %v4563_v38, %v2111_v17 }
 0x3b1   :  { %v2195_v14 = vmax.f32 %v2179_v59, 0.0  ;;  %v2155_v33 = vsel %vm4186_vm9, %v2136_v1, %v1650_v30 }
 0x3b2   :  { %v2178_v19 = vadd.f32 %v4197_v8, %v2155_v33  ;;  %v1616_v16 = vpop.permute.xlu1 %1615 }
 0x3b3   :  { %2211 = vst [vmem:[%s4464_s5 + $0x70] sm:$0xff] %v2195_v14  ;;  %v1633_v47 = vmul.f32 %v4564_v6, %v1616_v16 }
 0x3b4   :  { %v2194_v60 = vmax.f32 %v2178_v19, 0.0 }
 0x3b5   :  { %v1652_v18 = vsel %vm4169_vm6, %v1633_v47, %v1147_v45 }
 0x3b6   :  { %2210 = vst [vmem:[%s4464_s5 + $0x68] sm:$0xff] %v2194_v60  ;;  %v2121_v3 = vpop.permute.xlu1 %2120 }
 0x3b7   :  { %v2138_v35 = vmul.f32 %v4565_v5, %v2121_v3 }
 0x3b9   :  { %v2157_v56 = vsel %vm4186_vm9, %v2138_v35, %v1652_v18 }
 0x3ba   :  { %v2180_v40 = vadd.f32 %v4197_v8, %v2157_v56 }
 0x3bc   :  { %v2196_v9 = vmax.f32 %v2180_v40, 0.0 }
 0x3be   :  { %2212 = vst [vmem:[%s4464_s5 + $0x78] sm:$0xff] %v2196_v9 }

// kernel: gat_link_pred.7
= control target key start
LH: loop header
LB: loop body
LE: loop exit
PB: predicated region body
PF: predicated region fallthrough
CT: control target
= control target key end

     0   :  { %v910_v0 = vmov 64   ;;  %s1325_s2 = inlined_call_operand.vmem [shape: f32[128,128], index: 2, kind: input, shape index: {}]   ;;  %s1326_s0 = inlined_call_operand.vmem [shape: f32[128,128], index: 0, kind: input, shape index: {}]   ;;  %s1327_s3 = inlined_call_operand.vmem [shape: s8[128,128], index: 3, kind: input, shape index: {}]   ;;  %s1328_s1 = inlined_call_operand.vmem [shape: f32[8,128], index: 1, kind: input, shape index: {}]   ;;  %s1329_s4 = inlined_call_operand.vmem [shape: f32[1,128], index: 4, kind: input, shape index: {}]   ;;  %s1330_s5 = inlined_call_operand.vmem [shape: f32[128,128], index: 5, kind: output, shape index: {}]  }
   0x1   :  { %843 = vset.pattern.permute.xlu1 %v910_v0  ;;  %842 = vset.pattern.permute.xlu0 %v910_v0  ;;  %v92_v1 = vld [vmem:[%s1325_s2 + $0x8] sm:$0xff]  ;;  %v91_v2 = vld [vmem:[%s1325_s2] sm:$0xff]  ;;  %v101_v5 = vld [vmem:[%s1325_s2 + $0x50] sm:$0xff] }
   0x2   :  { %114 = vperm.xlu1 %843, %v92_v1   ;;  %109 = vperm.xlu0 %842, %v91_v2   ;;  %v100_v3 = vld [vmem:[%s1325_s2 + $0x48] sm:$0xff]  ;;  %v99_v4 = vld [vmem:[%s1325_s2 + $0x40] sm:$0xff]  ;;  %v93_v6 = vld [vmem:[%s1325_s2 + $0x10] sm:$0xff] }
   0x3   :  { %v102_v7 = vld [vmem:[%s1325_s2 + $0x58] sm:$0xff]  ;;  %v103_v9 = vld [vmem:[%s1325_s2 + $0x60] sm:$0xff]  ;;  %v104_v11 = vld [vmem:[%s1325_s2 + $0x68] sm:$0xff] }
   0x4   :  { %v94_v8 = vld [vmem:[%s1325_s2 + $0x18] sm:$0xff]  ;;  %v95_v10 = vld [vmem:[%s1325_s2 + $0x20] sm:$0xff]  ;;  %v96_v12 = vld [vmem:[%s1325_s2 + $0x28] sm:$0xff] }
   0x5   :  { %v105_v13 = vld [vmem:[%s1325_s2 + $0x70] sm:$0xff]  ;;  %v106_v15 = vld [vmem:[%s1325_s2 + $0x78] sm:$0xff]  ;;  %v335_v17 = vld [vmem:[%s1326_s0] sm:$0xff] }
   0x6   :  { %154 = vperm.xlu1 %843, %v100_v3   ;;  %149 = vperm.xlu0 %842, %v99_v4   ;;  %v97_v14 = vld [vmem:[%s1325_s2 + $0x30] sm:$0xff]  ;;  %v98_v16 = vld [vmem:[%s1325_s2 + $0x38] sm:$0xff]  ;;  %v336_v18 = vld [vmem:[%s1326_s0 + $0x8] sm:$0xff] }
   0x7   :  { %v337_v19 = vld [vmem:[%s1326_s0 + $0x10] sm:$0xff]  ;;  %v792_v20 = vpack.c.bf16 %v336_v18, %v335_v17  ;;  %v338_v21 = vld [vmem:[%s1326_s0 + $0x18] sm:$0xff]  ;;  %v339_v23 = vld [vmem:[%s1326_s0 + $0x20] sm:$0xff] }
   0x8   :  { %v796_v22 = vpack.c.bf16 %v338_v21, %v337_v19  ;;  %v340_v24 = vld [vmem:[%s1326_s0 + $0x28] sm:$0xff]  ;;  %v20_v26 = vld [vmem:[%s1327_s3] sm:$0xff]  ;;  %v1014_v28 = vld [vmem:[%s1327_s3 + $0x10] sm:$0xff] }
   0x9   :  { %793 = vmatprep.subr.bf16.mxu0 %v792_v20  ;;  %824 = vmatprep.subr.bf16.mxu1 %v792_v20  ;;  %v800_v25 = vpack.c.bf16 %v340_v24, %v339_v23  ;;  %v24_v27 = vunpack.c.0.s8 %v20_v26  ;;  %v32_v30 = vunpack.c.0.s8 %v1014_v28  ;;  %v25_v31 = vunpack.c.1.s8 %v20_v26  ;;  %v1020_v32 = vld [vmem:[%s1328_s1] ss:$0 sm:$0xff]  ;;  %v1029_v49 = vld [vmem:[%s1327_s3 + $0x8] sm:$0xff]  ;;  %v1037_v61 = vld [vmem:[%s1327_s3 + $0x18] sm:$0xff] }
   0xa   :  { %159 = vperm.xlu1 %843, %v101_v5   ;;  %119 = vperm.xlu0 %842, %v93_v6   ;;  %v26_v33 = vunpack.c.2.s8 %v20_v26  ;;  %v33_v34 = vunpack.c.1.s8 %v1014_v28  ;;  %v34_v44 = vunpack.c.2.s8 %v1014_v28  ;;  %v27_v48 = vunpack.c.3.s8 %v20_v26 }
   0xb   :  { %795 = vmatpush3.bf16.msra.mxu0 %v792_v20  ;;  %832 = vmatpush3.bf16.msra.mxu1 %v792_v20  ;;  %v40_v29 = vcvt.s32.f32 %v24_v27  ;;  %v48_v36 = vcvt.s32.f32 %v32_v30  ;;  %v41_v39 = vcvt.s32.f32 %v25_v31  ;;  %v28_v60 = vunpack.c.0.s8 %v1029_v49 }
   0xc   :  { %797 = vmatprep.subr.bf16.mxu0 %v796_v22  ;;  %825 = vmatprep.subr.bf16.mxu1 %v796_v22  ;;  %v42_v42 = vcvt.s32.f32 %v26_v33  ;;  %v49_v43 = vcvt.s32.f32 %v33_v34  ;;  %v50_v59 = vcvt.s32.f32 %v34_v44  ;;  %v43_v1 = vcvt.s32.f32 %v27_v48 }
   0xd   :  { %v686_v35 = vadd.f32 -1.0, %v40_v29  ;;  %v694_v47 = vadd.f32 -1.0, %v48_v36  ;;  %v687_v53 = vadd.f32 -1.0, %v41_v39  ;;  %v37_v34 = vunpack.c.1.s8 %v1037_v61 }
   0xe   :  { %164 = vperm.xlu1 %843, %v102_v7   ;;  %124 = vperm.xlu0 %842, %v94_v8   ;;  %v688_v57 = vadd.f32 -1.0, %v42_v42  ;;  %v695_v58 = vadd.f32 -1.0, %v49_v43  ;;  %v35_v7 = vunpack.c.3.s8 %v1014_v28  ;;  %v689_v19 = vadd.f32 -1.0, %v43_v1 }
   0xf   :  { %799 = vmatpush3.bf16.msra.mxu0 %v796_v22  ;;  %833 = vmatpush3.bf16.msra.mxu1 %v796_v22  ;;  %v72_v46 = vmul.f32 1e+30, %v686_v35  ;;  %v80_v0 = vmul.f32 1e+30, %v694_v47  ;;  %v73_v6 = vmul.f32 1e+30, %v687_v53  ;;  %v38_v53 = vunpack.c.2.s8 %v1037_v61 }
  0x10   :  { %801 = vmatprep.subr.bf16.mxu0 %v800_v25  ;;  %826 = vmatprep.subr.bf16.mxu1 %v800_v25  ;;  %v74_v18 = vmul.f32 1e+30, %v688_v57  ;;  %v31_v57 = vunpack.c.3.s8 %v1029_v49 }
  0x12   :  { %169 = vperm.xlu1 %843, %v103_v9   ;;  %129 = vperm.xlu0 %842, %v95_v10  }
  0x13   :  { %803 = vmatpush3.bf16.msra.mxu0 %v800_v25  ;;  %834 = vmatpush3.bf16.msra.mxu1 %v800_v25  ;;  %v51_v25 = vcvt.s32.f32 %v35_v7 }
  0x15   :  { %v697_v44 = vadd.f32 -1.0, %v51_v25 }
  0x16   :  { %174 = vperm.xlu1 %843, %v104_v11   ;;  %134 = vperm.xlu0 %842, %v96_v12   ;;  %v36_v11 = vunpack.c.0.s8 %v1037_v61  ;;  %v81_v12 = vmul.f32 1e+30, %v695_v58 }
  0x17   :  { %v83_v1 = vmul.f32 1e+30, %v697_v44  ;;  %v346_v44 = vld [vmem:[%s1326_s0 + $0x58] sm:$0xff] }
  0x18   :  { %v52_v29 = vcvt.s32.f32 %v36_v11 }
  0x1a   :  { %179 = vperm.xlu1 %843, %v105_v13   ;;  %139 = vperm.xlu0 %842, %v97_v14   ;;  %v696_v13 = vadd.f32 -1.0, %v50_v59  ;;  %v44_v14 = vcvt.s32.f32 %v28_v60  ;;  %v698_v48 = vadd.f32 -1.0, %v52_v29 }
  0x1c   :  { %v82_v30 = vmul.f32 1e+30, %v696_v13  ;;  %v690_v31 = vadd.f32 -1.0, %v44_v14  ;;  %v47_v14 = vcvt.s32.f32 %v31_v57 }
  0x1e   :  { %184 = vperm.xlu1 %843, %v106_v15   ;;  %144 = vperm.xlu0 %842, %v98_v16   ;;  %v29_v15 = vunpack.c.1.s8 %v1029_v49 }
  0x20   :  { %v45_v33 = vcvt.s32.f32 %v29_v15 }
  0x81   :  { %v115_v37 = vpop.permute.xlu1 %114  ;;  %v110_v38 = vpop.permute.xlu0 %109 }
  0x82   :  { %v192_v40 = vadd.f32 %v1020_v32, %v115_v37  ;;  %v191_v41 = vadd.f32 %v1020_v32, %v110_v38  ;;  %v75_v37 = vmul.f32 1e+30, %v689_v19  ;;  %v30_v38 = vunpack.c.2.s8 %v1029_v49 }
  0x84   :  { %v207_v45 = vmul.f32 0.2, %v191_v41  ;;  %v208_v50 = vmul.f32 0.2, %v192_v40 }
  0x85   :  { %v155_v51 = vpop.permute.xlu1 %154  ;;  %v150_v52 = vpop.permute.xlu0 %149 }
  0x86   :  { %v223_v54 = vmax.f32 %v191_v41, %v207_v45  ;;  %v200_v55 = vadd.f32 %v1020_v32, %v155_v51  ;;  %v199_v56 = vadd.f32 %v1020_v32, %v150_v52  ;;  %v224_v2 = vmax.f32 %v192_v40, %v208_v50 }
  0x87   :  { %v76_v50 = vmul.f32 1e+30, %v690_v31  ;;  %v691_v51 = vadd.f32 -1.0, %v45_v33  ;;  %v53_v52 = vcvt.s32.f32 %v37_v34  ;;  %v693_v34 = vadd.f32 -1.0, %v47_v14 }
  0x88   :  { %v215_v62 = vmul.f32 0.2, %v199_v56  ;;  %v1039_v63 = vadd.f32 %v223_v54, %v72_v46  ;;  %v216_v3 = vmul.f32 0.2, %v200_v55  ;;  %v1049_v24 = vadd.f32 %v224_v2, %v73_v6  ;;  %v341_v2 = vld [vmem:[%s1326_s0 + $0x30] sm:$0xff] }
  0x89   :  { %v160_v4 = vpop.permute.xlu1 %159  ;;  %v120_v5 = vpop.permute.xlu0 %119  ;;  %v84_v6 = vmul.f32 1e+30, %v698_v48  ;;  %v77_v7 = vmul.f32 1e+30, %v691_v51 }
  0x8a   :  { %v231_v8 = vmax.f32 %v199_v56, %v215_v62  ;;  %v201_v9 = vadd.f32 %v1020_v32, %v160_v4  ;;  %v193_v10 = vadd.f32 %v1020_v32, %v120_v5  ;;  %255 = vmax.xlane.f32.xlu0 %v1039_v63  ;;  %v232_v20 = vmax.f32 %v200_v55, %v216_v3  ;;  %v342_v3 = vld [vmem:[%s1326_s0 + $0x38] sm:$0xff] }
  0x8b   :  { %v46_v56 = vcvt.s32.f32 %v30_v38 }
  0x8c   :  { %v209_v16 = vmul.f32 0.2, %v193_v10  ;;  %v1047_v17 = vadd.f32 %v231_v8, %v80_v0  ;;  %v217_v21 = vmul.f32 0.2, %v201_v9  ;;  %v1059_v43 = vadd.f32 %v232_v20, %v81_v12 }
  0x8d   :  { %v165_v22 = vpop.permute.xlu1 %164  ;;  %v125_v23 = vpop.permute.xlu0 %124  ;;  %v699_v8 = vadd.f32 -1.0, %v53_v52  ;;  %v692_v13 = vadd.f32 -1.0, %v46_v56  ;;  %v79_v52 = vmul.f32 1e+30, %v693_v34 }
  0x8e   :  { %v225_v26 = vmax.f32 %v193_v10, %v209_v16  ;;  %v202_v27 = vadd.f32 %v1020_v32, %v165_v22  ;;  %v194_v28 = vadd.f32 %v1020_v32, %v125_v23  ;;  %271 = vmax.xlane.f32.xlu1 %v1047_v17  ;;  %257 = vmax.xlane.f32.xlu0 %v1049_v24  ;;  %v343_v22 = vld [vmem:[%s1326_s0 + $0x40] sm:$0xff]  ;;  %v344_v23 = vld [vmem:[%s1326_s0 + $0x48] sm:$0xff] }
  0x8f   :  { %v233_v39 = vmax.f32 %v201_v9, %v217_v21  ;;  %v54_v9 = vcvt.s32.f32 %v38_v53  ;;  %v804_v10 = vpack.c.bf16 %v342_v3, %v341_v2  ;;  %v39_v21 = vunpack.c.3.s8 %v1037_v61 }
  0x90   :  { %v210_v35 = vmul.f32 0.2, %v194_v28  ;;  %v1056_v36 = vadd.f32 %v225_v26, %v74_v18  ;;  %v218_v40 = vmul.f32 0.2, %v202_v27  ;;  %v85_v61 = vmul.f32 1e+30, %v699_v8 }
  0x91   :  { %v170_v41 = vpop.permute.xlu1 %169  ;;  %v130_v42 = vpop.permute.xlu0 %129  ;;  %v1072_v0 = vadd.f32 %v233_v39, %v82_v30  ;;  %805 = vmatprep.subr.bf16.mxu0 %v804_v10  ;;  %827 = vmatprep.subr.bf16.mxu1 %v804_v10  ;;  %v808_v29 = vpack.c.bf16 %v344_v23, %v343_v22  ;;  %v78_v33 = vmul.f32 1e+30, %v692_v13 }
  0x92   :  { %v226_v45 = vmax.f32 %v194_v28, %v210_v35  ;;  %v1062_v46 = vadd.f32 %v1020_v32, %v170_v41  ;;  %v195_v47 = vadd.f32 %v1020_v32, %v130_v42  ;;  %259 = vmax.xlane.f32.xlu1 %v1056_v36  ;;  %273 = vmax.xlane.f32.xlu0 %v1059_v43  ;;  %v700_v28 = vadd.f32 -1.0, %v54_v9  ;;  %v345_v42 = vld [vmem:[%s1326_s0 + $0x50] sm:$0xff] }
  0x93   :  { %v234_v58 = vmax.f32 %v202_v27, %v218_v40  ;;  %807 = vmatpush3.bf16.msra.mxu0 %v804_v10  ;;  %835 = vmatpush3.bf16.msra.mxu1 %v804_v10  ;;  %v55_v41 = vcvt.s32.f32 %v39_v21  ;;  %v812_v48 = vpack.c.bf16 %v346_v44, %v345_v42 }
  0x94   :  { %v211_v54 = vmul.f32 0.2, %v195_v47  ;;  %v1068_v55 = vadd.f32 %v226_v45, %v75_v37  ;;  %v219_v59 = vmul.f32 0.2, %v1062_v46  ;;  %809 = vmatprep.subr.bf16.mxu0 %v808_v29  ;;  %828 = vmatprep.subr.bf16.mxu1 %v808_v29  ;;  %v86_v53 = vmul.f32 1e+30, %v700_v28 }
  0x95   :  { %v175_v60 = vpop.permute.xlu1 %174  ;;  %v135_v62 = vpop.permute.xlu0 %134  ;;  %v1087_v20 = vadd.f32 %v234_v58, %v83_v1  ;;  %v701_v58 = vadd.f32 -1.0, %v55_v41 }
  0x96   :  { %v227_v4 = vmax.f32 %v195_v47, %v211_v54  ;;  %v204_v5 = vadd.f32 %v1020_v32, %v175_v60  ;;  %v196_v49 = vadd.f32 %v1020_v32, %v135_v62  ;;  %261 = vmax.xlane.f32.xlu1 %v1068_v55  ;;  %275 = vmax.xlane.f32.xlu0 %v1072_v0 }
  0x97   :  { %v235_v15 = vmax.f32 %v1062_v46, %v219_v59  ;;  %811 = vmatpush3.bf16.msra.mxu0 %v808_v29  ;;  %836 = vmatpush3.bf16.msra.mxu1 %v808_v29  ;;  %v348_v59 = vld [vmem:[%s1326_s0 + $0x68] sm:$0xff] }
  0x98   :  { %v212_v11 = vmul.f32 0.2, %v196_v49  ;;  %v1084_v12 = vadd.f32 %v227_v4, %v76_v50  ;;  %v220_v16 = vmul.f32 0.2, %v204_v5  ;;  %813 = vmatprep.subr.bf16.mxu0 %v812_v48  ;;  %829 = vmatprep.subr.bf16.mxu1 %v812_v48  ;;  %v87_v4 = vmul.f32 1e+30, %v701_v58 }
  0x99   :  { %v180_v18 = vpop.permute.xlu1 %179  ;;  %v140_v19 = vpop.permute.xlu0 %139  ;;  %v1102_v40 = vadd.f32 %v235_v15, %v84_v6 }
  0x9a   :  { %v228_v25 = vmax.f32 %v196_v49, %v212_v11  ;;  %v205_v26 = vadd.f32 %v1020_v32, %v180_v18  ;;  %v197_v27 = vadd.f32 %v1020_v32, %v140_v19  ;;  %263 = vmax.xlane.f32.xlu1 %v1084_v12  ;;  %277 = vmax.xlane.f32.xlu0 %v1087_v20  ;;  %v350_v49 = vld [vmem:[%s1326_s0 + $0x78] sm:$0xff] }
  0x9b   :  { %v236_v35 = vmax.f32 %v204_v5, %v220_v16  ;;  %815 = vmatpush3.bf16.msra.mxu0 %v812_v48  ;;  %837 = vmatpush3.bf16.msra.mxu1 %v812_v48  ;;  %v349_v5 = vld [vmem:[%s1326_s0 + $0x70] sm:$0xff] }
  0x9c   :  { %v213_v30 = vmul.f32 0.2, %v197_v27  ;;  %v1100_v31 = vadd.f32 %v228_v25, %v77_v7  ;;  %v221_v37 = vmul.f32 0.2, %v205_v26  ;;  %v820_v6 = vpack.c.bf16 %v350_v49, %v349_v5 }
  0x9d   :  { %v185_v38 = vpop.permute.xlu1 %184  ;;  %v145_v39 = vpop.permute.xlu0 %144  ;;  %v1116_v57 = vadd.f32 %v236_v35, %v85_v61 }
  0x9e   :  { %v229_v45 = vmax.f32 %v197_v27, %v213_v30  ;;  %v206_v46 = vadd.f32 %v1020_v32, %v185_v38  ;;  %v198_v47 = vadd.f32 %v1020_v32, %v145_v39  ;;  %265 = vmax.xlane.f32.xlu1 %v1100_v31  ;;  %279 = vmax.xlane.f32.xlu0 %v1102_v40  ;;  %v347_v32 = vld [vmem:[%s1326_s0 + $0x60] sm:$0xff] }
  0x9f   :  { %v237_v54 = vmax.f32 %v205_v26, %v221_v37  ;;  %v816_v62 = vpack.c.bf16 %v348_v59, %v347_v32 }
  0xa0   :  { %v214_v50 = vmul.f32 0.2, %v198_v47  ;;  %v1114_v51 = vadd.f32 %v229_v45, %v78_v33  ;;  %v222_v56 = vmul.f32 0.2, %v206_v46 }
  0xa1   :  { %817 = vmatprep.subr.bf16.mxu0 %v816_v62  ;;  %v1128_v3 = vadd.f32 %v237_v54, %v86_v53  ;;  %830 = vmatprep.subr.bf16.mxu1 %v816_v62 }
  0xa2   :  { %v230_v60 = vmax.f32 %v198_v47, %v214_v50  ;;  %267 = vmax.xlane.f32.xlu1 %v1114_v51  ;;  %281 = vmax.xlane.f32.xlu0 %v1116_v57  ;;  %v238_v2 = vmax.f32 %v206_v46, %v222_v56 }
  0xa3   :  { %819 = vmatpush3.bf16.msra.mxu0 %v816_v62  ;;  %838 = vmatpush3.bf16.msra.mxu1 %v816_v62 }
  0xa4   :  { %v1126_v1 = vadd.f32 %v230_v60, %v79_v52  ;;  %821 = vmatprep.subr.bf16.mxu0 %v820_v6  ;;  %v1138_v7 = vadd.f32 %v238_v2, %v87_v4  ;;  %831 = vmatprep.subr.bf16.mxu1 %v820_v6 }
  0xa6   :  { %269 = vmax.xlane.f32.xlu1 %v1126_v1  ;;  %283 = vmax.xlane.f32.xlu0 %v1128_v3 }
  0xa7   :  { %823 = vmatpush3.bf16.msra.mxu0 %v820_v6  ;;  %839 = vmatpush3.bf16.msra.mxu1 %v820_v6 }
  0xaa   :  { %285 = vmax.xlane.f32.xlu0 %v1138_v7 }
 0x117   :  { %v256_v8 = vpop.xlane.xlu0 %255 }
 0x118   :  { %v287_v9 = vsub.f32 %v1039_v63, %v256_v8 }
 0x11a   :  { %v303_v10 = vmul.f32 1.442695, %v287_v9  ;;  %v911_v9 = vmov 127  }
 0x11b   :  { %v272_v11 = vpop.xlane.xlu1 %271  ;;  %v258_v14 = vpop.xlane.xlu0 %257  ;;  %844 = vset.pattern.permute.xlu0 %v911_v9  ;;  %845 = vset.pattern.permute.xlu1 %v911_v9 }
 0x11c   :  { %846 = vpow2.f32 %v303_v10  ;;  %v295_v13 = vsub.f32 %v1047_v17, %v272_v11  ;;  %v288_v15 = vsub.f32 %v1049_v24, %v258_v14 }
 0x11e   :  { %v319_v16 = vmul.f32 1.442695, %v295_v13  ;;  %v305_v18 = vmul.f32 1.442695, %v288_v15 }
 0x11f   :  { %v260_v19 = vpop.xlane.xlu1 %259  ;;  %v274_v22 = vpop.xlane.xlu0 %273 }
 0x120   :  { %848 = vpow2.f32 %v319_v16  ;;  %v289_v21 = vsub.f32 %v1056_v36, %v260_v19  ;;  %v296_v23 = vsub.f32 %v1059_v43, %v274_v22 }
 0x121   :  { %850 = vpow2.f32 %v305_v18 }
 0x122   :  { %v307_v25 = vmul.f32 1.442695, %v289_v21  ;;  %v321_v63 = vmul.f32 1.442695, %v296_v23 }
 0x123   :  { %v262_v26 = vpop.xlane.xlu1 %261  ;;  %v276_v17 = vpop.xlane.xlu0 %275 }
 0x124   :  { %852 = vpow2.f32 %v307_v25  ;;  %v290_v27 = vsub.f32 %v1068_v55, %v262_v26  ;;  %v297_v24 = vsub.f32 %v1072_v0, %v276_v17 }
 0x125   :  { %854 = vpow2.f32 %v321_v63 }
 0x126   :  { %v847_v61 = vpop.eup %846  ;;  %v309_v28 = vmul.f32 1.442695, %v290_v27  ;;  %v323_v29 = vmul.f32 1.442695, %v297_v24 }
 0x127   :  { %v264_v30 = vpop.xlane.xlu1 %263  ;;  %768 = vmatprep.mubr.f32.mxu0 %v847_v61  ;;  %v278_v33 = vpop.xlane.xlu0 %277 }
 0x128   :  { %856 = vpow2.f32 %v309_v28  ;;  %v291_v36 = vsub.f32 %v1084_v12, %v264_v30  ;;  %v298_v43 = vsub.f32 %v1087_v20, %v278_v33 }
 0x129   :  { %858 = vpow2.f32 %v323_v29 }
 0x12a   :  { %v849_v34 = vpop.eup %848  ;;  %v311_v35 = vmul.f32 1.442695, %v291_v36  ;;  %v325_v55 = vmul.f32 1.442695, %v298_v43 }
 0x12b   :  { %v851_v37 = vpop.eup %850  ;;  %780 = vmatprep.mubr.f32.mxu1 %v849_v34  ;;  %v266_v38 = vpop.xlane.xlu1 %265 }
 0x12c   :  { %860 = vpow2.f32 %v311_v35  ;;  %v292_v0 = vsub.f32 %v1100_v31, %v266_v38  ;;  %v280_v39 = vpop.xlane.xlu0 %279  ;;  %769 = vmatmul.mubr.f32.vlgmr.msra.gmra.mrb[0].mxu0 %v851_v37 }
 0x12d   :  { %862 = vpow2.f32 %v325_v55  ;;  %v299_v41 = vsub.f32 %v1102_v40, %v280_v39 }
 0x12e   :  { %v853_v42 = vpop.eup %852  ;;  %v313_v12 = vmul.f32 1.442695, %v292_v0 }
 0x12f   :  { %v855_v44 = vpop.eup %854  ;;  %v327_v45 = vmul.f32 1.442695, %v299_v41  ;;  %v268_v46 = vpop.xlane.xlu1 %267  ;;  %771 = vmatprep.mubr.f32.mxu0 %v853_v42  ;;  %v88_v41 = vlaneseq }
 0x130   :  { %864 = vpow2.f32 %v313_v12  ;;  %v293_v20 = vsub.f32 %v1114_v51, %v268_v46  ;;  %v282_v47 = vpop.xlane.xlu0 %281  ;;  %781 = vmatmul.mubr.f32.vlgmr.msra.gmra.mrb[0].mxu1 %v855_v44  ;;  %v1211_v44 = vld [vmem:[%s1329_s4] ss:$0 sm:$0xff] }
 0x131   :  { %866 = vpow2.f32 %v327_v45  ;;  %v300_v48 = vsub.f32 %v1116_v57, %v282_v47  ;;  %v1205_v42 = vand.u32 127, %v88_v41 }
 0x132   :  { %v857_v31 = vpop.eup %856  ;;  %v315_v50 = vmul.f32 1.442695, %v293_v20 }
 0x133   :  { %v859_v52 = vpop.eup %858  ;;  %v329_v53 = vmul.f32 1.442695, %v300_v48  ;;  %v270_v54 = vpop.xlane.xlu1 %269  ;;  %772 = vmatmul.mubr.f32.gmra.mrb[2].mxu0 %v857_v31  ;;  %vm625_vm0 = vcmp.lt.s32.totalorder %v1205_v42, 16 }
 0x134   :  { %868 = vpow2.f32 %v315_v50  ;;  %v294_v40 = vsub.f32 %v1126_v1, %v270_v54  ;;  %v284_v56 = vpop.xlane.xlu0 %283  ;;  %783 = vmatprep.mubr.f32.mxu1 %v859_v52 }
 0x135   :  { %870 = vpow2.f32 %v329_v53  ;;  %v301_v58 = vsub.f32 %v1128_v3, %v284_v56 }
 0x136   :  { %v861_v51 = vpop.eup %860  ;;  %v317_v32 = vmul.f32 1.442695, %v294_v40 }
 0x137   :  { %v863_v59 = vpop.eup %862  ;;  %v331_v60 = vmul.f32 1.442695, %v301_v58  ;;  %774 = vmatprep.mubr.f32.mxu0 %v861_v51 }
 0x138   :  { %872 = vpow2.f32 %v317_v32  ;;  %v286_v57 = vpop.xlane.xlu0 %285  ;;  %784 = vmatmul.mubr.f32.gmra.mrb[2].mxu1 %v863_v59 }
 0x139   :  { %874 = vpow2.f32 %v331_v60  ;;  %v302_v62 = vsub.f32 %v1138_v7, %v286_v57 }
 0x13a   :  { %v865_v2 = vpop.eup %864 }
 0x13b   :  { %v867_v4 = vpop.eup %866  ;;  %v333_v5 = vmul.f32 1.442695, %v302_v62  ;;  %775 = vmatmul.mubr.f32.gmra.mrb[4].mxu0 %v865_v2 }
 0x13c   :  { %786 = vmatprep.mubr.f32.mxu1 %v867_v4 }
 0x13d   :  { %876 = vpow2.f32 %v333_v5 }
 0x13e   :  { %v869_v1 = vpop.eup %868 }
 0x13f   :  { %v871_v49 = vpop.eup %870  ;;  %777 = vmatprep.mubr.f32.mxu0 %v869_v1 }
 0x140   :  { %787 = vmatmul.mubr.f32.gmra.mrb[4].mxu1 %v871_v49 }
 0x142   :  { %v873_v3 = vpop.eup %872 }
 0x143   :  { %v875_v6 = vpop.eup %874  ;;  %778 = vmatmul.mubr.f32.gmra.mrb[6].mxu0 %v873_v3 }
 0x144   :  { %789 = vmatprep.mubr.f32.mxu1 %v875_v6 }
 0x147   :  { %v877_v8 = vpop.eup %876 }
 0x148   :  { %790 = vmatmul.mubr.f32.gmra.mrb[6].mxu1 %v877_v8 }
 0x1ff   :  { %v1157_v7 = vpop.f32.mrb[0].mxu0 }
 0x200   :  { %878 = vrcp.f32 %v1157_v7  ;;  %v1160_v10 = vpop.f32.mrb[1].mxu0 }
 0x203   :  { %v1162_v11 = vpop.f32.mrb[0].mxu1 }
 0x204   :  { %880 = vrcp.f32 %v1162_v11  ;;  %v1165_v13 = vpop.f32.mrb[1].mxu1 }
 0x205   :  { %882 = vrcp.f32 %v1160_v10 }
 0x206   :  { %v1167_v14 = vpop.f32.mrb[2].mxu0  ;;  %884 = vrcp.f32 %v1165_v13 }
 0x207   :  { %v1169_v15 = vpop.f32.mrb[3].mxu0 }
 0x20a   :  { %v879_v16 = vpop.eup %878 }
 0x20b   :  { %v1172_v18 = vpop.f32.mrb[2].mxu1  ;;  %535 = vperm.xlu0 %844, %v879_v16  }
 0x20c   :  { %v1175_v19 = vpop.f32.mrb[3].mxu1 }
 0x20d   :  { %886 = vrcp.f32 %v1175_v19 }
 0x20e   :  { %v881_v21 = vpop.eup %880  ;;  %v1178_v22 = vpop.f32.mrb[4].mxu0  ;;  %888 = vrcp.f32 %v1167_v14 }
 0x20f   :  { %575 = vperm.xlu1 %845, %v881_v21   ;;  %v1180_v23 = vpop.f32.mrb[5].mxu0  ;;  %v883_v25 = vpop.eup %882  ;;  %890 = vrcp.f32 %v1172_v18 }
 0x210   :  { %v885_v27 = vpop.eup %884 }
 0x213   :  { %v1183_v63 = vpop.f32.mrb[4].mxu1  ;;  %530 = vperm.xlu1 %845, %v883_v25  }
 0x214   :  { %v1186_v26 = vpop.f32.mrb[5].mxu1 }
 0x215   :  { %892 = vrcp.f32 %v1186_v26 }
 0x216   :  { %v1189_v17 = vpop.f32.mrb[6].mxu0  ;;  %894 = vrcp.f32 %v1169_v15 }
 0x217   :  { %v887_v24 = vpop.eup %886  ;;  %570 = vperm.xlu1 %845, %v885_v27   ;;  %v1191_v61 = vpop.f32.mrb[7].mxu0  ;;  %896 = vrcp.f32 %v1178_v22 }
 0x218   :  { %580 = vperm.xlu0 %844, %v887_v24   ;;  %v889_v28 = vpop.eup %888 }
 0x219   :  { %v891_v36 = vpop.eup %890 }
 0x21b   :  { %v1194_v29 = vpop.f32.mrb[6].mxu1  ;;  %545 = vperm.xlu1 %845, %v889_v28  }
 0x21c   :  { %v1197_v30 = vpop.f32.mrb[7].mxu1 }
 0x21d   :  { %898 = vrcp.f32 %v1197_v30 }
 0x21e   :  { %900 = vrcp.f32 %v1183_v63 }
 0x21f   :  { %v893_v33 = vpop.eup %892  ;;  %585 = vperm.xlu1 %845, %v891_v36   ;;  %902 = vrcp.f32 %v1180_v23 }
 0x220   :  { %590 = vperm.xlu0 %844, %v893_v33   ;;  %v895_v43 = vpop.eup %894  ;;  %904 = vrcp.f32 %v1189_v17 }
 0x221   :  { %v897_v34 = vpop.eup %896  ;;  %906 = vrcp.f32 %v1191_v61 }
 0x222   :  { %908 = vrcp.f32 %v1194_v29 }
 0x223   :  { %540 = vperm.xlu1 %845, %v895_v43  }
 0x227   :  { %v899_v35 = vpop.eup %898  ;;  %555 = vperm.xlu1 %845, %v897_v34  }
 0x228   :  { %600 = vperm.xlu0 %844, %v899_v35   ;;  %v901_v37 = vpop.eup %900 }
 0x229   :  { %v903_v55 = vpop.eup %902 }
 0x22a   :  { %v905_v38 = vpop.eup %904 }
 0x22b   :  { %595 = vperm.xlu1 %845, %v901_v37   ;;  %v907_v0 = vpop.eup %906 }
 0x22c   :  { %v909_v39 = vpop.eup %908 }
 0x22f   :  { %550 = vperm.xlu1 %845, %v903_v55  }
 0x233   :  { %565 = vperm.xlu1 %845, %v905_v38  }
 0x237   :  { %560 = vperm.xlu1 %845, %v907_v0  }
 0x23b   :  { %605 = vperm.xlu1 %845, %v909_v39  }
 0x28a   :  { %v536_v12 = vpop.permute.xlu0 %535 }
 0x28b   :  { %v609_v45 = vmul.f32 %v1157_v7, %v536_v12 }
 0x28d   :  { %v628_v46 = vsel %vm625_vm0, %v609_v45, 0.0 }
 0x28e   :  { %v651_v20 = vadd.f32 %v1211_v44, %v628_v46  ;;  %v576_v47 = vpop.permute.xlu1 %575 }
 0x28f   :  { %v617_v48 = vmul.f32 %v1162_v11, %v576_v47 }
 0x290   :  { %667 = vst [vmem:[%s1330_s5 + $0x8] sm:$0xff] %v651_v20 }
 0x291   :  { %v636_v31 = vsel %vm625_vm0, %v617_v48, 0.0 }
 0x292   :  { %v659_v50 = vadd.f32 %v1211_v44, %v636_v31  ;;  %v531_v52 = vpop.permute.xlu1 %530 }
 0x293   :  { %v608_v53 = vmul.f32 %v531_v52, %v1160_v10 }
 0x294   :  { %675 = vst [vmem:[%s1330_s5 + $0x48] sm:$0xff] %v659_v50 }
 0x295   :  { %v627_v54 = vsel %vm625_vm0, %v608_v53, 0.0 }
 0x296   :  { %v650_v40 = vadd.f32 %v1211_v44, %v627_v54  ;;  %v571_v56 = vpop.permute.xlu1 %570 }
 0x297   :  { %v616_v58 = vmul.f32 %v571_v56, %v1165_v13  ;;  %v581_v51 = vpop.permute.xlu0 %580 }
 0x298   :  { %666 = vst [vmem:[%s1330_s5] sm:$0xff] %v650_v40  ;;  %v618_v32 = vmul.f32 %v581_v51, %v1175_v19 }
 0x299   :  { %v635_v59 = vsel %vm625_vm0, %v616_v58, 0.0 }
 0x29a   :  { %v658_v60 = vadd.f32 %v1211_v44, %v635_v59  ;;  %v637_v57 = vsel %vm625_vm0, %v618_v32, 0.0  ;;  %v546_v62 = vpop.permute.xlu1 %545 }
 0x29b   :  { %v660_v2 = vadd.f32 %v1211_v44, %v637_v57  ;;  %v611_v4 = vmul.f32 %v1167_v14, %v546_v62 }
 0x29c   :  { %674 = vst [vmem:[%s1330_s5 + $0x40] sm:$0xff] %v658_v60 }
 0x29d   :  { %676 = vst [vmem:[%s1330_s5 + $0x50] sm:$0xff] %v660_v2  ;;  %v630_v5 = vsel %vm625_vm0, %v611_v4, 0.0 }
 0x29e   :  { %v653_v1 = vadd.f32 %v1211_v44, %v630_v5  ;;  %v586_v49 = vpop.permute.xlu1 %585 }
 0x29f   :  { %v619_v3 = vmul.f32 %v1172_v18, %v586_v49  ;;  %v591_v6 = vpop.permute.xlu0 %590 }
 0x2a0   :  { %669 = vst [vmem:[%s1330_s5 + $0x18] sm:$0xff] %v653_v1  ;;  %v620_v8 = vmul.f32 %v591_v6, %v1186_v26 }
 0x2a1   :  { %v638_v9 = vsel %vm625_vm0, %v619_v3, 0.0 }
 0x2a2   :  { %v661_v7 = vadd.f32 %v1211_v44, %v638_v9  ;;  %v639_v10 = vsel %vm625_vm0, %v620_v8, 0.0  ;;  %v541_v11 = vpop.permute.xlu1 %540 }
 0x2a3   :  { %v662_v13 = vadd.f32 %v1211_v44, %v639_v10  ;;  %v610_v14 = vmul.f32 %v541_v11, %v1169_v15 }
 0x2a4   :  { %677 = vst [vmem:[%s1330_s5 + $0x58] sm:$0xff] %v661_v7 }
 0x2a5   :  { %678 = vst [vmem:[%s1330_s5 + $0x60] sm:$0xff] %v662_v13  ;;  %v629_v16 = vsel %vm625_vm0, %v610_v14, 0.0 }
 0x2a6   :  { %v652_v18 = vadd.f32 %v1211_v44, %v629_v16  ;;  %v556_v19 = vpop.permute.xlu1 %555 }
 0x2a7   :  { %v613_v21 = vmul.f32 %v1178_v22, %v556_v19  ;;  %v601_v25 = vpop.permute.xlu0 %600 }
 0x2a8   :  { %668 = vst [vmem:[%s1330_s5 + $0x10] sm:$0xff] %v652_v18  ;;  %v622_v15 = vmul.f32 %v601_v25, %v1197_v30 }
 0x2a9   :  { %v632_v26 = vsel %vm625_vm0, %v613_v21, 0.0 }
 0x2aa   :  { %v655_v27 = vadd.f32 %v1211_v44, %v632_v26  ;;  %v641_v24 = vsel %vm625_vm0, %v622_v15, 0.0  ;;  %v596_v28 = vpop.permute.xlu1 %595 }
 0x2ab   :  { %v664_v36 = vadd.f32 %v1211_v44, %v641_v24  ;;  %v621_v22 = vmul.f32 %v1183_v63, %v596_v28 }
 0x2ac   :  { %671 = vst [vmem:[%s1330_s5 + $0x28] sm:$0xff] %v655_v27 }
 0x2ad   :  { %680 = vst [vmem:[%s1330_s5 + $0x70] sm:$0xff] %v664_v36  ;;  %v640_v30 = vsel %vm625_vm0, %v621_v22, 0.0 }
 0x2ae   :  { %v663_v33 = vadd.f32 %v1211_v44, %v640_v30  ;;  %v551_v43 = vpop.permute.xlu1 %550 }
 0x2af   :  { %v612_v34 = vmul.f32 %v551_v43, %v1180_v23 }
 0x2b0   :  { %679 = vst [vmem:[%s1330_s5 + $0x68] sm:$0xff] %v663_v33 }
 0x2b1   :  { %v631_v63 = vsel %vm625_vm0, %v612_v34, 0.0 }
 0x2b2   :  { %v654_v35 = vadd.f32 %v1211_v44, %v631_v63  ;;  %v566_v37 = vpop.permute.xlu1 %565 }
 0x2b3   :  { %v615_v55 = vmul.f32 %v1189_v17, %v566_v37 }
 0x2b4   :  { %670 = vst [vmem:[%s1330_s5 + $0x20] sm:$0xff] %v654_v35 }
 0x2b5   :  { %v634_v38 = vsel %vm625_vm0, %v615_v55, 0.0 }
 0x2b6   :  { %v657_v23 = vadd.f32 %v1211_v44, %v634_v38  ;;  %v561_v0 = vpop.permute.xlu1 %560 }
 0x2b7   :  { %v614_v39 = vmul.f32 %v561_v0, %v1191_v61 }
 0x2b8   :  { %673 = vst [vmem:[%s1330_s5 + $0x38] sm:$0xff] %v657_v23 }
 0x2b9   :  { %v633_v41 = vsel %vm625_vm0, %v614_v39, 0.0 }
 0x2ba   :  { %v656_v17 = vadd.f32 %v1211_v44, %v633_v41  ;;  %v606_v12 = vpop.permute.xlu1 %605 }
 0x2bb   :  { %v623_v45 = vmul.f32 %v1194_v29, %v606_v12 }
 0x2bc   :  { %672 = vst [vmem:[%s1330_s5 + $0x30] sm:$0xff] %v656_v17 }
 0x2bd   :  { %v642_v46 = vsel %vm625_vm0, %v623_v45, 0.0 }
 0x2be   :  { %v665_v61 = vadd.f32 %v1211_v44, %v642_v46 }
 0x2c0   :  { %681 = vst [vmem:[%s1330_s5 + $0x78] sm:$0xff] %v665_v61 }

</bundles_post_ra>
